<compile_context>
chip_gen: v5e
topology: v5e:2x2
jax: 0.10.0
libtpu: 0.0.40
codegen_flags: <defaults>
</compile_context>

<pallas_src>
import numpy as np
import jax
import jax.numpy as jnp
from jax.experimental import pallas as pl
from jax.experimental.pallas import tpu as pltpu

IMAGE_SIZE = 222
NUM_COEFF = 175
NC_PAD = 256                     # coefficient lane padding (174 real -> 256 lanes)
STACK_ROWS = 3 * IMAGE_SIZE      # 666: three channels stacked along rows


def get_dim(level):
    d = IMAGE_SIZE / level
    if d % 2 == 1:
        d += 1
    return int(d // 2)


def generate_filter(weights, level):
    """JAX equivalent of generateFilter: concentric square rings weighted by weights[i]."""
    fs = int(IMAGE_SIZE / level)
    steps = weights.shape[0]
    r = jnp.arange(fs)
    # distance of each cell to the filter border; ring i sits at distance (steps-1-i)
    m = jnp.minimum(jnp.minimum(r[:, None], r[None, :]),
                    jnp.minimum(fs - 1 - r[:, None], fs - 1 - r[None, :]))
    ring_idx = (steps - 1) - m
    return weights[ring_idx].astype(jnp.float32)  # (fs, fs)


def build_coeff_masks():
    """Host constants: R (666,256) row masks and C (222,256) col masks, one column per coefficient.

    Column c of R lives in the row-block of its slicing level, so a single
    matmul against the channel-stacked image covers all three levels.
    Columns >= 174 are zero (structurally-zero coefficients).
    """
    R = np.zeros((STACK_ROWS, NC_PAD), np.float32)
    C = np.zeros((IMAGE_SIZE, NC_PAD), np.float32)
    idx = 0
    for layer in (1, 2, 3):
        max_r = get_dim(layer)
        bs = IMAGE_SIZE // layer
        row0 = (layer - 1) * IMAGE_SIZE
        for bi in range(layer):
            for bj in range(layer):
                for r in range(0, max_r, 4):
                    R[row0 + bi * bs + r: row0 + (bi + 1) * bs - r, idx] = 1.0
                    C[bj * bs + r: (bj + 1) * bs - r, idx] = 1.0
                    idx += 1
    assert idx == NUM_COEFF - 1   # coefficient 174 is never written by the model
    return jnp.asarray(R), jnp.asarray(C)


# ---------------------------------------------------------------------------
# Pass 1: per-image region sums (grid over batch, "parallel")
# ---------------------------------------------------------------------------
def coeff_kernel(x_ref, fb_ref, c_ref, r_ref, out_ref):
    # x_ref: (1, 666, 222) one image, channels stacked along rows
    p = x_ref[0] * fb_ref[...]                                       # VPU  (666, 222)
    u = jnp.dot(p, c_ref[...], preferred_element_type=jnp.float32)   # MXU  (666, 256)
    out_ref[0] = jnp.sum(u * r_ref[...], axis=0, keepdims=True)      # XLU  (1, 256)


# ---------------------------------------------------------------------------
# Pass 2: BatchNorm1d (training-mode batch stats) + fc1 + ReLU + fc2
# ---------------------------------------------------------------------------
def head_kernel(coeff_ref, gamma_ref, beta_ref, w1_ref, b1_ref, w2_ref, b2_ref, out_ref):
    c = coeff_ref[...]                                               # (B, 256)
    # BatchNorm1d, training mode: batch statistics, biased variance, eps=1e-5.
    # TODO(synk): running-statistics update (training-mode side effect) is not modeled.
    mean = jnp.mean(c, axis=0, keepdims=True)
    var = jnp.mean((c - mean) ** 2, axis=0, keepdims=True)
    xn = (c - mean) * jax.lax.rsqrt(var + 1e-5)
    xn = xn * gamma_ref[...] + beta_ref[...]
    h = jnp.dot(xn, w1_ref[...], preferred_element_type=jnp.float32) + b1_ref[...]
    h = jnp.maximum(h, 0.0)
    out_ref[...] = jnp.dot(h, w2_ref[...], preferred_element_type=jnp.float32) + b2_ref[...]


@jax.jit
def dft_forward_pallas(x_nchw, fbank, r_big, c_big, gamma, beta, W1, b1, W2, b2):
    """x_nchw: (B, 3, 222, 222) channel-major input (one-time preprocessing upstream)."""
    B = x_nchw.shape[0]
    num_classes = W2.shape[0]
    x_stack = x_nchw.reshape(B, STACK_ROWS, IMAGE_SIZE).astype(jnp.float32)   # free reshape
    fb_stack = fbank.reshape(STACK_ROWS, IMAGE_SIZE)

    coeffs = pl.pallas_call(
        coeff_kernel,
        out_shape=jax.ShapeDtypeStruct((B, 1, NC_PAD), jnp.float32),
        grid_spec=pltpu.PrefetchScalarGridSpec(
            num_scalar_prefetch=0,
            grid=(B,),
            in_specs=[
                pl.BlockSpec((1, STACK_ROWS, IMAGE_SIZE), lambda b: (b, 0, 0)),
                pl.BlockSpec((STACK_ROWS, IMAGE_SIZE), lambda b: (0, 0)),
                pl.BlockSpec((IMAGE_SIZE, NC_PAD), lambda b: (0, 0)),
                pl.BlockSpec((STACK_ROWS, NC_PAD), lambda b: (0, 0)),
            ],
            out_specs=pl.BlockSpec((1, 1, NC_PAD), lambda b: (b, 0, 0)),
        ),
        compiler_params=pltpu.CompilerParams(dimension_semantics=("parallel",)),
    )(x_stack, fb_stack, c_big, r_big)
    coeffs = coeffs.reshape(B, NC_PAD)

    # Zero-pad BN / fc1 parameters to the 256-lane coefficient layout (exact: padded
    # coefficient columns are identically zero and padded fc1 rows are zero).
    gamma_p = jnp.zeros((1, NC_PAD), jnp.float32).at[0, :NUM_COEFF].set(gamma)
    beta_p = jnp.zeros((1, NC_PAD), jnp.float32).at[0, :NUM_COEFF].set(beta)
    w1t_p = jnp.zeros((NC_PAD, W1.shape[0]), jnp.float32).at[:NUM_COEFF, :].set(W1.T)

    vmem = pl.BlockSpec(memory_space=pltpu.MemorySpace.VMEM)
    out = pl.pallas_call(
        head_kernel,
        out_shape=jax.ShapeDtypeStruct((B, num_classes), jnp.float32),
        in_specs=[vmem] * 7,
        out_specs=vmem,
    )(coeffs, gamma_p, beta_p, w1t_p, b1.reshape(1, -1), W2.T, b2.reshape(1, -1))
    return out


# ---------------------------------------------------------------------------
# Pure numpy mirror of the PyTorch forward (float64), operating on NHWC x.
# ---------------------------------------------------------------------------
def reference_forward(x_nhwc, fbank_chw, gamma, beta, W1, b1, W2, b2):
    x = np.asarray(x_nhwc, dtype=np.float64)
    fb = np.transpose(np.asarray(fbank_chw, dtype=np.float64), (1, 2, 0))  # (H, W, 3)
    out = x * fb[None]
    B = x.shape[0]
    coeffs = np.zeros((B, NUM_COEFF), dtype=np.float64)
    idx = 0
    for layer in range(1, 4):
        max_r = get_dim(layer)
        bs = IMAGE_SIZE // layer
        for bi in range(layer):
            for bj in range(layer):
                for r in range(0, max_r, 4):
                    blk = out[:, bi * bs + r:(bi + 1) * bs - r,
                              bj * bs + r:(bj + 1) * bs - r, layer - 1]
                    coeffs[:, idx] = blk.sum(axis=(1, 2))
                    idx += 1
    mean = coeffs.mean(0, keepdims=True)
    var = ((coeffs - mean) ** 2).mean(0, keepdims=True)
    xn = (coeffs - mean) / np.sqrt(var + 1e-5)
    xn = xn * np.asarray(gamma, np.float64) + np.asarray(beta, np.float64)
    h = np.maximum(xn @ np.asarray(W1, np.float64).T + np.asarray(b1, np.float64), 0.0)
    return h @ np.asarray(W2, np.float64).T + np.asarray(b2, np.float64)


if __name__ == "__main__":
    B = 2
    num_classes = 10
    key = jax.random.PRNGKey(0)
    ks = jax.random.split(key, 20)

    # filter ring weights (torch.rand equivalents)
    w_l1 = jax.random.uniform(ks[0], (get_dim(1),), jnp.float32)
    w_l2 = [jax.random.uniform(ks[1 + i], (get_dim(2),), jnp.float32) for i in range(4)]
    w_l3 = [jax.random.uniform(ks[5 + i], (get_dim(3),), jnp.float32) for i in range(9)]

    # assemble the (3, 222, 222) filter bank (parameter setup / glue)
    f1 = generate_filter(w_l1, 1)
    bs2 = IMAGE_SIZE // 2
    f2 = jnp.zeros((IMAGE_SIZE, IMAGE_SIZE), jnp.float32)
    f2 = f2.at[:bs2, :bs2].set(generate_filter(w_l2[0], 2))
    f2 = f2.at[:bs2, bs2:].set(generate_filter(w_l2[1], 2))
    f2 = f2.at[bs2:, :bs2].set(generate_filter(w_l2[2], 2))
    f2 = f2.at[bs2:, bs2:].set(generate_filter(w_l2[3], 2))
    bs3 = IMAGE_SIZE // 3
    f3 = jnp.zeros((IMAGE_SIZE, IMAGE_SIZE), jnp.float32)
    for n, (bi, bj) in enumerate([(i, j) for i in range(3) for j in range(3)]):
        f3 = f3.at[bi * bs3:(bi + 1) * bs3, bj * bs3:(bj + 1) * bs3].set(
            generate_filter(w_l3[n], 3))
    fbank = jnp.stack([f1, f2, f3], axis=0).astype(jnp.float32)  # (3, 222, 222)

    # region-sum mask matrices (algorithm constants, built once on host)
    R_big, C_big = build_coeff_masks()   # (666, 256), (222, 256)

    # BatchNorm1d params (default init) and Linear params (torch-style uniform init)
    gamma = jnp.ones((NUM_COEFF,), jnp.float32)
    beta = jnp.zeros((NUM_COEFF,), jnp.float32)
    k1 = 1.0 / (NUM_COEFF ** 0.5)
    W1 = jax.random.uniform(ks[14], (128, NUM_COEFF), jnp.float32, -k1, k1)
    b1 = jax.random.uniform(ks[15], (128,), jnp.float32, -k1, k1)
    k2 = 1.0 / (128 ** 0.5)
    W2 = jax.random.uniform(ks[16], (num_classes, 128), jnp.float32, -k2, k2)
    b2 = jax.random.uniform(ks[17], (num_classes,), jnp.float32, -k2, k2)

    # Input: the PyTorch forward's effective layout is NHWC (B, 222, 222, 3).
    # The kernel's native layout is channel-major; transpose ONCE here as
    # preprocessing (not inside the forward), per the performance review.
    x_nhwc = jax.random.uniform(ks[18], (B, IMAGE_SIZE, IMAGE_SIZE, 3), jnp.float32)
    x_nchw = jax.block_until_ready(jnp.transpose(x_nhwc, (0, 3, 1, 2)))

    out = dft_forward_pallas(x_nchw, fbank, R_big, C_big, gamma, beta, W1, b1, W2, b2)
    out = jax.block_until_ready(out)

    ref = reference_forward(x_nhwc, fbank, gamma, beta, W1, b1, W2, b2)
    np.testing.assert_allclose(np.asarray(out), ref, rtol=2e-2, atol=2e-2)

    print("KERNEL_OK")
</pallas_src>

<mosaic_0001>
module attributes {stable_mosaic.version = 11 : i64} {
  func.func @coeff_kernel(%arg0: i32, %arg1: memref<1x666x222xf32, #tpu.memory_space<vmem>>, %arg2: memref<666x222xf32, #tpu.memory_space<vmem>>, %arg3: memref<222x256xf32, #tpu.memory_space<vmem>>, %arg4: memref<666x256xf32, #tpu.memory_space<vmem>>, %arg5: memref<1x1x256xf32, #tpu.memory_space<vmem>>) attributes {dimension_semantics = [#tpu.dimension_semantics<parallel>], iteration_bounds = array<i64: 2>, scalar_prefetch = 0 : i64, scratch_operands = 0 : i64, tpu.core_type = #tpu.core_type<tc>, window_params = [{transform_indices = @transform_0, window_bounds = array<i64: 1, 666, 222>}, {pipeline_mode = #tpu.pipeline_mode<synchronous>, transform_indices = @transform_1, window_bounds = array<i64: 666, 222>}, {pipeline_mode = #tpu.pipeline_mode<synchronous>, transform_indices = @transform_2, window_bounds = array<i64: 222, 256>}, {pipeline_mode = #tpu.pipeline_mode<synchronous>, transform_indices = @transform_3, window_bounds = array<i64: 666, 256>}, {transform_indices = @transform_4, window_bounds = array<i64: 1, 1, 256>}]} {
    %c0 = arith.constant 0 : index
    %c0_0 = arith.constant 0 : index
    %c0_1 = arith.constant 0 : index
    %0 = vector.load %arg1[%c0, %c0_0, %c0_1] : memref<1x666x222xf32, #tpu.memory_space<vmem>>, vector<1x666x222xf32>
    %1 = vector.shape_cast %0 : vector<1x666x222xf32> to vector<666x222xf32>
    %c0_2 = arith.constant 0 : index
    %c0_3 = arith.constant 0 : index
    %2 = vector.load %arg2[%c0_2, %c0_3] : memref<666x222xf32, #tpu.memory_space<vmem>>, vector<666x222xf32>
    %3 = arith.mulf %1, %2 : vector<666x222xf32>
    %c0_4 = arith.constant 0 : index
    %c0_5 = arith.constant 0 : index
    %4 = vector.load %arg3[%c0_4, %c0_5] : memref<222x256xf32, #tpu.memory_space<vmem>>, vector<222x256xf32>
    %cst = arith.constant dense<0.000000e+00> : vector<666x256xf32>
    %5 = tpu.matmul %3, %4, %cst {dimension_numbers = #tpu.dot_dimension_numbers<[1], [0], [0], [1], [0, 0, 1, 1], [], []>} : vector<666x222xf32>, vector<222x256xf32>, vector<666x256xf32> -> vector<666x256xf32>
    %c0_6 = arith.constant 0 : index
    %c0_7 = arith.constant 0 : index
    %6 = vector.load %arg4[%c0_6, %c0_7] : memref<666x256xf32, #tpu.memory_space<vmem>>, vector<666x256xf32>
    %7 = arith.mulf %5, %6 : vector<666x256xf32>
    %cst_8 = arith.constant dense<0.000000e+00> : vector<256xf32>
    %8 = vector.multi_reduction <add>, %7, %cst_8 [0] : vector<666x256xf32> to vector<256xf32>
    %9 = vector.shape_cast %8 : vector<256xf32> to vector<1x256xf32>
    %c0_9 = arith.constant 0 : index
    %c0_10 = arith.constant 0 : index
    %c0_11 = arith.constant 0 : index
    %10 = vector.load %arg5[%c0_9, %c0_10, %c0_11] : memref<1x1x256xf32, #tpu.memory_space<vmem>>, vector<1x1x256xf32>
    %11 = vector.shape_cast %10 : vector<1x1x256xf32> to vector<1x256xf32>
    %12 = vector.shape_cast %9 : vector<1x256xf32> to vector<1x1x256xf32>
    tpu.vector_store %arg5[%c0_9, %c0_10, %c0_11], %12 {strides = array<i32>} : memref<1x1x256xf32, #tpu.memory_space<vmem>>, vector<1x1x256xf32>,
    return
  }
  func.func @transform_0(%arg0: i32) -> (i32, i32, i32) {
    %c0_i32 = arith.constant 0 : i32
    %c0_i32_0 = arith.constant 0 : i32
    %c0_i32_1 = arith.constant 0 : i32
    return %arg0, %c0_i32, %c0_i32_0 : i32, i32, i32
  }
  func.func @transform_1(%arg0: i32) -> (i32, i32) {
    %c0_i32 = arith.constant 0 : i32
    %c0_i32_0 = arith.constant 0 : i32
    %c0_i32_1 = arith.constant 0 : i32
    return %c0_i32, %c0_i32_0 : i32, i32
  }
  func.func @transform_2(%arg0: i32) -> (i32, i32) {
    %c0_i32 = arith.constant 0 : i32
    %c0_i32_0 = arith.constant 0 : i32
    %c0_i32_1 = arith.constant 0 : i32
    return %c0_i32, %c0_i32_0 : i32, i32
  }
  func.func @transform_3(%arg0: i32) -> (i32, i32) {
    %c0_i32 = arith.constant 0 : i32
    %c0_i32_0 = arith.constant 0 : i32
    %c0_i32_1 = arith.constant 0 : i32
    return %c0_i32, %c0_i32_0 : i32, i32
  }
  func.func @transform_4(%arg0: i32) -> (i32, i32, i32) {
    %c0_i32 = arith.constant 0 : i32
    %c0_i32_0 = arith.constant 0 : i32
    %c0_i32_1 = arith.constant 0 : i32
    return %arg0, %c0_i32, %c0_i32_0 : i32, i32, i32
  }
}

module attributes {stable_mosaic.version = 11 : i64} {
  func.func @head_kernel(%arg0: memref<2x256xf32, #tpu.memory_space<vmem>>, %arg1: memref<1x256xf32, #tpu.memory_space<vmem>>, %arg2: memref<1x256xf32, #tpu.memory_space<vmem>>, %arg3: memref<256x128xf32, #tpu.memory_space<vmem>>, %arg4: memref<1x128xf32, #tpu.memory_space<vmem>>, %arg5: memref<128x10xf32, #tpu.memory_space<vmem>>, %arg6: memref<1x10xf32, #tpu.memory_space<vmem>>, %arg7: memref<2x10xf32, #tpu.memory_space<vmem>>) attributes {dimension_semantics = [], scalar_prefetch = 0 : i64, scratch_operands = 0 : i64, tpu.core_type = #tpu.core_type<tc>} {
    %c0 = arith.constant 0 : index
    %c0_0 = arith.constant 0 : index
    %0 = vector.load %arg0[%c0, %c0_0] : memref<2x256xf32, #tpu.memory_space<vmem>>, vector<2x256xf32>
    %cst = arith.constant dense<0.000000e+00> : vector<256xf32>
    %1 = vector.multi_reduction <add>, %0, %cst [0] : vector<2x256xf32> to vector<256xf32>
    %2 = vector.shape_cast %1 : vector<256xf32> to vector<1x256xf32>
    %cst_1 = arith.constant 2.000000e+00 : f32
    %3 = vector.broadcast %cst_1 : f32 to vector<1x256xf32>
    %4 = arith.divf %2, %3 : vector<1x256xf32>
    %5 = vector.broadcast %4 : vector<1x256xf32> to vector<2x256xf32>
    %6 = arith.subf %0, %5 : vector<2x256xf32>
    %7 = arith.mulf %6, %6 : vector<2x256xf32>
    %cst_2 = arith.constant dense<0.000000e+00> : vector<256xf32>
    %8 = vector.multi_reduction <add>, %7, %cst_2 [0] : vector<2x256xf32> to vector<256xf32>
    %9 = vector.shape_cast %8 : vector<256xf32> to vector<1x256xf32>
    %cst_3 = arith.constant 2.000000e+00 : f32
    %10 = vector.broadcast %cst_3 : f32 to vector<1x256xf32>
    %11 = arith.divf %9, %10 : vector<1x256xf32>
    %12 = vector.broadcast %4 : vector<1x256xf32> to vector<2x256xf32>
    %13 = arith.subf %0, %12 : vector<2x256xf32>
    %cst_4 = arith.constant 9.99999974E-6 : f32
    %14 = vector.broadcast %cst_4 : f32 to vector<1x256xf32>
    %15 = arith.addf %11, %14 : vector<1x256xf32>
    %16 = math.rsqrt %15 : vector<1x256xf32>
    %17 = vector.broadcast %16 : vector<1x256xf32> to vector<2x256xf32>
    %18 = arith.mulf %13, %17 : vector<2x256xf32>
    %c0_5 = arith.constant 0 : index
    %c0_6 = arith.constant 0 : index
    %19 = vector.load %arg1[%c0_5, %c0_6] : memref<1x256xf32, #tpu.memory_space<vmem>>, vector<1x256xf32>
    %20 = vector.broadcast %19 : vector<1x256xf32> to vector<2x256xf32>
    %21 = arith.mulf %18, %20 : vector<2x256xf32>
    %c0_7 = arith.constant 0 : index
    %c0_8 = arith.constant 0 : index
    %22 = vector.load %arg2[%c0_7, %c0_8] : memref<1x256xf32, #tpu.memory_space<vmem>>, vector<1x256xf32>
    %23 = vector.broadcast %22 : vector<1x256xf32> to vector<2x256xf32>
    %24 = arith.addf %21, %23 : vector<2x256xf32>
    %c0_9 = arith.constant 0 : index
    %c0_10 = arith.constant 0 : index
    %25 = vector.load %arg3[%c0_9, %c0_10] : memref<256x128xf32, #tpu.memory_space<vmem>>, vector<256x128xf32>
    %cst_11 = arith.constant dense<0.000000e+00> : vector<2x128xf32>
    %26 = tpu.matmul %24, %25, %cst_11 {dimension_numbers = #tpu.dot_dimension_numbers<[1], [0], [0], [1], [0, 0, 1, 1], [], []>} : vector<2x256xf32>, vector<256x128xf32>, vector<2x128xf32> -> vector<2x128xf32>
    %c0_12 = arith.constant 0 : index
    %c0_13 = arith.constant 0 : index
    %27 = vector.load %arg4[%c0_12, %c0_13] : memref<1x128xf32, #tpu.memory_space<vmem>>, vector<1x128xf32>
    %28 = vector.broadcast %27 : vector<1x128xf32> to vector<2x128xf32>
    %29 = arith.addf %26, %28 : vector<2x128xf32>
    %cst_14 = arith.constant 0.000000e+00 : f32
    %30 = vector.broadcast %cst_14 : f32 to vector<2x128xf32>
    %31 = arith.maximumf %29, %30 : vector<2x128xf32>
    %c0_15 = arith.constant 0 : index
    %c0_16 = arith.constant 0 : index
    %32 = vector.load %arg5[%c0_15, %c0_16] : memref<128x10xf32, #tpu.memory_space<vmem>>, vector<128x10xf32>
    %cst_17 = arith.constant dense<0.000000e+00> : vector<2x10xf32>
    %33 = tpu.matmul %31, %32, %cst_17 {dimension_numbers = #tpu.dot_dimension_numbers<[1], [0], [0], [1], [0, 0, 1, 1], [], []>} : vector<2x128xf32>, vector<128x10xf32>, vector<2x10xf32> -> vector<2x10xf32>
    %c0_18 = arith.constant 0 : index
    %c0_19 = arith.constant 0 : index
    %34 = vector.load %arg6[%c0_18, %c0_19] : memref<1x10xf32, #tpu.memory_space<vmem>>, vector<1x10xf32>
    %35 = vector.broadcast %34 : vector<1x10xf32> to vector<2x10xf32>
    %36 = arith.addf %33, %35 : vector<2x10xf32>
    %c0_20 = arith.constant 0 : index
    %c0_21 = arith.constant 0 : index
    %37 = vector.load %arg7[%c0_20, %c0_21] : memref<2x10xf32, #tpu.memory_space<vmem>>, vector<2x10xf32>
    tpu.vector_store %arg7[%c0_20, %c0_21], %36 {strides = array<i32>} : memref<2x10xf32, #tpu.memory_space<vmem>>, vector<2x10xf32>,
    return
  }
}

</mosaic_0001>

<bundles_post_ra>
// kernel: dft_forward_pallas.3
= control target key start
LH: loop header
LB: loop body
LE: loop exit
PB: predicated region body
PF: predicated region fallthrough
CT: control target
= control target key end

     0   :  { %v308_v8 = vmov 2.0   ;;  %s542_s0 = inlined_call_operand.vmem [shape: f32[2,256], index: 0, kind: input, shape index: {}]   ;;  %s543_s1 = inlined_call_operand.vmem [shape: f32[1,256], index: 1, kind: input, shape index: {}]   ;;  %s544_s2 = inlined_call_operand.vmem [shape: f32[1,256], index: 2, kind: input, shape index: {}]   ;;  %s545_s3 = inlined_call_operand.vmem [shape: f32[256,128], index: 3, kind: input, shape index: {}]   ;;  %s546_s4 = inlined_call_operand.vmem [shape: f32[1,128], index: 4, kind: input, shape index: {}]   ;;  %s547_s5 = inlined_call_operand.vmem [shape: f32[128,10], index: 5, kind: input, shape index: {}]   ;;  %s548_s6 = inlined_call_operand.vmem [shape: f32[1,10], index: 6, kind: input, shape index: {}]   ;;  %s549_s7 = inlined_call_operand.hbm [shape: f32[2,10], index: 7, kind: output, shape index: {}]  }
   0x1   :  { %v146_v0 = vld [vmem:[%s545_s3 + $0x78] sm:$0xff]  ;;  %v145_v1 = vld [vmem:[%s545_s3 + $0x70] sm:$0xff]  ;;  %v144_v4 = vld [vmem:[%s545_s3 + $0x68] sm:$0xff]  ;;  %276 = vrcp.f32 %v308_v8 }
   0x2   :  { %v162_v2 = vld [vmem:[%s545_s3 + $0xf8] sm:$0xff]  ;;  %173 = vmatpush.msra.mxu0 %v146_v0  ;;  %v161_v3 = vld [vmem:[%s545_s3 + $0xf0] sm:$0xff]  ;;  %v160_v5 = vld [vmem:[%s545_s3 + $0xe8] sm:$0xff] }
   0x3   :  { %193 = vmatpush.msra.mxu1 %v162_v2  ;;  %v143_v6 = vld [vmem:[%s545_s3 + $0x60] sm:$0xff]  ;;  %v142_v9 = vld [vmem:[%s545_s3 + $0x58] sm:$0xff]  ;;  %v141_v11 = vld [vmem:[%s545_s3 + $0x50] sm:$0xff] }
   0x4   :  { %174 = vmatpush.msra.mxu0 %v145_v1  ;;  %v159_v7 = vld [vmem:[%s545_s3 + $0xe0] sm:$0xff]  ;;  %v158_v10 = vld [vmem:[%s545_s3 + $0xd8] sm:$0xff]  ;;  %v157_v12 = vld [vmem:[%s545_s3 + $0xd0] sm:$0xff] }
   0x5   :  { %194 = vmatpush.msra.mxu1 %v161_v3  ;;  %v140_v13 = vld [vmem:[%s545_s3 + $0x48] sm:$0xff]  ;;  %v397_v16 = vld [vmem:[%s542_s0] sm:$0xf] }
   0x6   :  { %175 = vmatpush.msra.mxu0 %v144_v4  ;;  %v156_v15 = vld [vmem:[%s545_s3 + $0xc8] sm:$0xff]  ;;  %29 = vst [vmem:[#allocation1] ss:$4 sm:$0xff] %v397_v16 }
   0x7   :  { %195 = vmatpush.msra.mxu1 %v160_v5  ;;  %v389_v14 = vpop.eup %276 }
   0x8   :  { %176 = vmatpush.msra.mxu0 %v143_v6 }
   0x9   :  { %196 = vmatpush.msra.mxu1 %v159_v7 }
   0xa   :  { %177 = vmatpush.msra.mxu0 %v142_v9 }
   0xb   :  { %197 = vmatpush.msra.mxu1 %v158_v10 }
   0xc   :  { %178 = vmatpush.msra.mxu0 %v141_v11 }
   0xd   :  { %198 = vmatpush.msra.mxu1 %v157_v12 }
   0xe   :  { %12 = vsyncpa [#allocation3], 0  ;;  %v139_v17 = vld [vmem:[%s545_s3 + $0x40] sm:$0xff]  ;;  %179 = vmatpush.msra.mxu0 %v140_v13  ;;  %v50_v19 = vmul.f32 2.0, %v389_v14  ;;  %v138_v20 = vld [vmem:[%s545_s3 + $0x38] sm:$0xff]  ;;  %vm34_vm0 = vcmask 1041408   ;;  %vm54_vm1 = vweird.f32 %v389_v14 }
   0xf   :  { %v155_v18 = vld [vmem:[%s545_s3 + $0xc0] sm:$0xff]  ;;  %199 = vmatpush.msra.mxu1 %v156_v15  ;;  %v154_v21 = vld [vmem:[%s545_s3 + $0xb8] sm:$0xff]  ;;  %v137_v22 = vld [vmem:[%s545_s3 + $0x30] sm:$0xff]  ;;  %s309_s8 = smov [#allocation2]   ;;  %vm254_vm8 = vcmask 74752  }
  0x10   :  { %180 = vmatpush.msra.mxu0 %v139_v17  ;;  %v153_v23 = vld [vmem:[%s545_s3 + $0xb0] sm:$0xff]  ;;  %v136_v24 = vld [vmem:[%s545_s3 + $0x28] sm:$0xff]  ;;  %v51_v26 = vsub.f32 1.0, %v50_v19  ;;  %v30_v27 = vld.sshfl [vmem:[#allocation1] sm:$0xff pattern:$0x73625140] }
  0x11   :  { %200 = vmatpush.msra.mxu1 %v155_v18  ;;  %v152_v25 = vld [vmem:[%s545_s3 + $0xa8] sm:$0xff]  ;;  %v35_v29 = vsel %vm34_vm0, %v30_v27, 0.0  ;;  %v135_v31 = vld [vmem:[%s545_s3 + $0x20] sm:$0xff]  ;;  %v134_v36 = vld [vmem:[%s545_s3 + $0x18] sm:$0xff]  ;;  %s261_s9 = sshll.u32 %s309_s8, 4  ;;  %s262_s9 = int_to_ptr.vmem [resolvable:$true] %s261_s9 }
  0x12   :  { %181 = vmatpush.msra.mxu0 %v138_v20  ;;  %v31_v28 = vld.sshfl [vmem:[#allocation1 + $0x8] sm:$0xff pattern:$0x73625140]  ;;  %v151_v32 = vld [vmem:[%s545_s3 + $0xa0] sm:$0xff]  ;;  %v36_v33 = vrot.slane %v35_v29, 4  ;;  %v52_v35 = vmul.f32 %v389_v14, %v51_v26  ;;  %v150_v37 = vld [vmem:[%s545_s3 + $0x98] sm:$0xff] }
  0x13   :  { %201 = vmatpush.msra.mxu1 %v154_v21  ;;  %v42_v30 = vsel %vm34_vm0, %v31_v28, 0.0  ;;  %v133_v40 = vld [vmem:[%s545_s3 + $0x10] sm:$0xff]  ;;  %v132_v45 = vld [vmem:[%s545_s3 + $0x8] sm:$0xff]  ;;  %v131_v49 = vld [vmem:[%s545_s3] sm:$0xff] }
  0x14   :  { %182 = vmatpush.msra.mxu0 %v137_v22  ;;  %v43_v34 = vrot.slane %v42_v30, 4  ;;  %v37_v38 = vadd.f32 %v36_v33, %v35_v29  ;;  %v149_v41 = vld [vmem:[%s545_s3 + $0x90] sm:$0xff]  ;;  %v53_v44 = vadd.f32 %v389_v14, %v52_v35  ;;  %v148_v46 = vld [vmem:[%s545_s3 + $0x88] sm:$0xff]  ;;  %v147_v17 = vld [vmem:[%s545_s3 + $0x80] sm:$0xff] }
  0x15   :  { %202 = vmatpush.msra.mxu1 %v153_v23  ;;  %v229_v18 = vld [vmem:[%s547_s5 + $0x78] sm:$0xff]  ;;  %v228_v19 = vld [vmem:[%s547_s5 + $0x70] sm:$0xff]  ;;  %v227_v21 = vld [vmem:[%s547_s5 + $0x68] sm:$0xff] }
  0x16   :  { %183 = vmatpush.msra.mxu0 %v136_v24  ;;  %v44_v39 = vadd.f32 %v43_v34, %v42_v30  ;;  %v38_v42 = vrot.slane %v37_v38, 2  ;;  %v55_v52 = vsel %vm54_vm1, %v389_v14, %v53_v44  ;;  %234 = vmatpush.msra.mxu2 %v229_v18  ;;  %v115_v28 = vld [vmem:[%s543_s1] sm:$0x3]  ;;  %v225_v29 = vld [vmem:[%s547_s5 + $0x58] sm:$0xff]  ;;  %v224_v33 = vld [vmem:[%s547_s5 + $0x50] sm:$0xff] }
  0x17   :  { %203 = vmatpush.msra.mxu1 %v152_v25  ;;  %v226_v25 = vld [vmem:[%s547_s5 + $0x60] sm:$0xff]  ;;  %v118_v35 = vperm.slane %v115_v28, 1 }
  0x18   :  { %184 = vmatpush.msra.mxu0 %v135_v31  ;;  %v45_v43 = vrot.slane %v44_v39, 2  ;;  %v39_v47 = vadd.f32 %v38_v42, %v37_v38  ;;  %235 = vmatpush.msra.mxu2 %v228_v19  ;;  %v223_v38 = vld [vmem:[%s547_s5 + $0x48] sm:$0xff]  ;;  %v222_v42 = vld [vmem:[%s547_s5 + $0x40] sm:$0xff] }
  0x19   :  { %204 = vmatpush.msra.mxu1 %v151_v32  ;;  %v123_v32 = vld [vmem:[%s544_s2] sm:$0x3]  ;;  %v119_v44 = vrot.slane %v118_v35, 6 }
  0x1a   :  { %185 = vmatpush.msra.mxu0 %v134_v36  ;;  %v46_v48 = vadd.f32 %v45_v43, %v44_v39  ;;  %v40_v50 = vrot.slane %v39_v47, 1  ;;  %236 = vmatpush.msra.mxu2 %v227_v21  ;;  %v117_v43 = vperm.slane %v115_v28, 0 }
  0x1b   :  { %205 = vmatpush.msra.mxu1 %v150_v37 }
  0x1c   :  { %186 = vmatpush.msra.mxu0 %v133_v40  ;;  %v47_v51 = vrot.slane %v46_v48, 1  ;;  %v41_v53 = vadd.f32 %v40_v50, %v39_v47  ;;  %237 = vmatpush.msra.mxu2 %v226_v25  ;;  %v126_v40 = vperm.slane %v123_v32, 1  ;;  %v221_v47 = vld [vmem:[%s547_s5 + $0x38] sm:$0xff] }
  0x1d   :  { %206 = vmatpush.msra.mxu1 %v149_v41 }
  0x1e   :  { %187 = vmatpush.msra.mxu0 %v132_v45  ;;  %v48_v54 = vadd.f32 %v47_v51, %v46_v48  ;;  %v56_v55 = vmul.f32 %v55_v52, %v41_v53  ;;  %238 = vmatpush.msra.mxu2 %v225_v29  ;;  %v127_v50 = vrot.slane %v126_v40, 6  ;;  %v220_v51 = vld [vmem:[%s547_s5 + $0x30] sm:$0xff]  ;;  %v120_v53 = vsel %vm34_vm0, %v117_v43, %v119_v44 }
  0x1f   :  { %207 = vmatpush.msra.mxu1 %v148_v46 }
  0x20   :  { %188 = vmatpush.msra.mxu0 %v131_v49  ;;  %v57_v56 = vmul.f32 %v55_v52, %v48_v54  ;;  %239 = vmatpush.msra.mxu2 %v224_v33  ;;  %v125_v49 = vperm.slane %v123_v32, 0 }
  0x21   :  { %208 = vmatpush.msra.mxu1 %v147_v17 }
  0x22   :  { %v60_v57 = vrot.slane %v57_v56, 6  ;;  %240 = vmatpush.msra.mxu2 %v223_v38  ;;  %v128_v56 = vsel %vm34_vm0, %v125_v49, %v127_v50 }
  0x24   :  { %v61_v58 = vsel %vm34_vm0, %v56_v55, %v60_v57  ;;  %241 = vmatpush.msra.mxu2 %v222_v42  ;;  %v219_v55 = vld [vmem:[%s547_s5 + $0x28] sm:$0xff] }
  0x25   :  { %v460_v59 = vsub.f32 %v397_v16, %v61_v58  ;;  %v218_v58 = vld [vmem:[%s547_s5 + $0x20] sm:$0xff] }
  0x26   :  { %242 = vmatpush.msra.mxu2 %v221_v47 }
  0x27   :  { %v64_v60 = vmul.f32 %v460_v59, %v460_v59 }
  0x28   :  { %243 = vmatpush.msra.mxu2 %v220_v51 }
  0x29   :  { %66 = vst [vmem:[#allocation1] ss:$4 sm:$0xff] %v64_v60 }
  0x2a   :  { %244 = vmatpush.msra.mxu2 %v219_v55 }
  0x2c   :  { %245 = vmatpush.msra.mxu2 %v218_v58 }
  0x30   :  { %v67_v61 = vld.sshfl [vmem:[#allocation1] sm:$0xff pattern:$0x73625140]  ;;  %v68_v62 = vld.sshfl [vmem:[#allocation1 + $0x8] sm:$0xff pattern:$0x73625140] }
  0x31   :  { %v71_v63 = vsel %vm34_vm0, %v67_v61, 0.0  ;;  %v78_v0 = vsel %vm34_vm0, %v68_v62, 0.0 }
  0x32   :  { %v72_v1 = vrot.slane %v71_v63, 4  ;;  %v79_v2 = vrot.slane %v78_v0, 4 }
  0x34   :  { %v73_v3 = vadd.f32 %v72_v1, %v71_v63  ;;  %v80_v4 = vadd.f32 %v79_v2, %v78_v0  ;;  %v216_v63 = vld [vmem:[%s547_s5 + $0x10] sm:$0xff]  ;;  %v215_v0 = vld [vmem:[%s547_s5 + $0x8] sm:$0xff]  ;;  %v214_v1 = vld [vmem:[%s547_s5] sm:$0xff] }
  0x35   :  { %v274_v2 = vld [vmem:[%s546_s4] ss:$0 sm:$0xff] }
  0x36   :  { %v74_v5 = vrot.slane %v73_v3, 2  ;;  %v81_v6 = vrot.slane %v80_v4, 2 }
  0x38   :  { %v75_v7 = vadd.f32 %v74_v5, %v73_v3  ;;  %v82_v8 = vadd.f32 %v81_v6, %v80_v4 }
  0x3a   :  { %v76_v9 = vrot.slane %v75_v7, 1  ;;  %v83_v10 = vrot.slane %v82_v8, 1 }
  0x3c   :  { %v77_v11 = vadd.f32 %v76_v9, %v75_v7  ;;  %v84_v12 = vadd.f32 %v83_v10, %v82_v8  ;;  %v275_v8 = vld [vmem:[%s548_s6] ss:$0 sm:$0xff] }
  0x3e   :  { %v85_v13 = vmul.f32 %v77_v11, %v55_v52  ;;  %v86_v14 = vmul.f32 %v84_v12, %v55_v52 }
  0x40   :  { %v87_v15 = vadd.f32 1e-05, %v85_v13  ;;  %v88_v16 = vadd.f32 1e-05, %v86_v14 }
  0x42   :  { %278 = vrsqrt.f32 %v87_v15  ;;  %vm95_vm2 = vweird.f32 %v87_v15  ;;  %vm105_vm4 = vweird.f32 %v88_v16 }
  0x43   :  { %280 = vrsqrt.f32 %v88_v16 }
  0x48   :  { %v279_v20 = vpop.eup %278 }
  0x49   :  { %v281_v22 = vpop.eup %280  ;;  %v90_v23 = vmul.f32 %v279_v20, %v87_v15  ;;  %vm96_vm3 = vweird.f32 %v279_v20 }
  0x4a   :  { %v100_v24 = vmul.f32 %v281_v22, %v88_v16  ;;  %vm106_vm5 = vweird.f32 %v281_v22  ;;  %vm493_vm6 = vmor %vm95_vm2, %vm96_vm3 }
  0x4b   :  { %v91_v26 = vmul.f32 %v279_v20, %v90_v23  ;;  %vm107_vm7 = vmor %vm105_vm4, %vm106_vm5 }
  0x4c   :  { %v101_v27 = vmul.f32 %v281_v22, %v100_v24 }
  0x4d   :  { %v92_v30 = vmul.f32 0.5, %v91_v26 }
  0x4e   :  { %v102_v31 = vmul.f32 0.5, %v101_v27 }
  0x4f   :  { %v93_v34 = vsub.f32 1.5, %v92_v30 }
  0x50   :  { %v103_v37 = vsub.f32 1.5, %v102_v31 }
  0x51   :  { %v94_v39 = vmul.f32 %v279_v20, %v93_v34 }
  0x52   :  { %v104_v41 = vmul.f32 %v281_v22, %v103_v37 }
  0x53   :  { %v98_v45 = vsel %vm493_vm6, %v279_v20, %v94_v39 }
  0x54   :  { %v108_v46 = vsel %vm107_vm7, %v281_v22, %v104_v41 }
  0x55   :  { %v111_v48 = vrot.slane %v108_v46, 6 }
  0x57   :  { %v112_v52 = vsel %vm34_vm0, %v98_v45, %v111_v48 }
  0x58   :  { %v114_v54 = vmul.f32 %v112_v52, %v460_v59  ;;  %v217_v59 = vld [vmem:[%s547_s5 + $0x18] sm:$0xff]  ;;  %s263_s5 = sshll.u32 %s549_s7, 4  ;;  %s264_s5 = int_to_ptr.hbm [resolvable:$true] %s263_s5 }
  0x59   :  { %246 = vmatpush.msra.mxu2 %v217_v59 }
  0x5a   :  { %v122_v57 = vmul.f32 %v120_v53, %v114_v54 }
  0x5b   :  { %247 = vmatpush.msra.mxu2 %v216_v63 }
  0x5c   :  { %v130_v60 = vadd.f32 %v128_v56, %v122_v57 }
  0x5d   :  { %248 = vmatpush.msra.mxu2 %v215_v0 }
  0x5e   :  { %168 = vst [vmem:[#allocation1] ss:$4 sm:$0xff] %v130_v60 }
  0x5f   :  { %249 = vmatpush.msra.mxu2 %v214_v1 }
  0x65   :  { %v169_v61 = vld.sshfl [vmem:[#allocation1] sm:$0xff pattern:$0x73625140]  ;;  %v170_v62 = vld.sshfl [vmem:[#allocation1 + $0x8] sm:$0xff pattern:$0x73625140] }
  0x66   :  { %189 = vmatmul.f32.vlgmr.msra.gmra.mxu0 %v169_v61  ;;  %209 = vmatmul.f32.vlgmr.msra.gmra.mxu1 %v170_v62 }
  0xe3   :  { %v190_v3 = vpop.f32.mrf.mxu0  ;;  %v210_v4 = vpop.f32.mrf.mxu1 }
  0xe4   :  { %v191_v5 = vadd.f32 %v274_v2, %v190_v3 }
  0xe6   :  { %v211_v6 = vadd.f32 %v210_v4, %v191_v5 }
  0xe8   :  { %v213_v7 = vmax.f32 %v211_v6, 0.0 }
  0xea   :  { %250 = vmatmul.f32.vlgmr.msra.gmra.mxu2 %v213_v7 }
 0x16d   :  { %v251_v9 = vpop.f32.mrf.mxu2 }
 0x16e   :  { %v252_v10 = vadd.f32 %v275_v8, %v251_v9 }
 0x170   :  { %255 = vst.msk [vmem:[#allocation2] sm:$0x3] %vm254_vm8, %v252_v10 }
 0x171   :  { %266 = dma.vmem_to_hbm [thread:$0]  %s262_s9, 32, %s264_s5, [#allocation3]  }
 0x172   :  { %306 = dma.done.wait [#allocation3], 32  }
 0x173   :  { %307 = vsyncadd [#allocation3], 4294967264 }
 0x174   :  { %271 = vsyncpa [#allocation3], 1 }

// kernel: dft_forward_pallas.2
= control target key start
LH: loop header
LB: loop body
LE: loop exit
PB: predicated region body
PF: predicated region fallthrough
CT: control target
= control target key end

     0   :  { %s2894_s15 = smov 0   ;;  %s4450_s0 = inlined_call_operand.vmem [shape: f32[2,666,222], index: 0, kind: input, shape index: {}]   ;;  %s4451_s1 = inlined_call_operand.vmem [shape: f32[666,222], index: 1, kind: input, shape index: {}]   ;;  %s4452_s2 = inlined_call_operand.vmem [shape: f32[222,256], index: 2, kind: input, shape index: {}]   ;;  %s4453_s3 = inlined_call_operand.vmem [shape: f32[666,256], index: 3, kind: input, shape index: {}]   ;;  %s4454_s4 = inlined_call_operand.vmem [shape: f32[2,1,256], index: 4, kind: output, shape index: {}]  }
   0x1 LB: > { %s2673_s16 = sadd.s32 4294967295, %s2867_s15   ;;  %p2677_p0 = scmp.ge.s32.totalorder %s2867_s15, 1  ;;  %s2867_s15 = sphi %s2894_s15, %s14_s15  }
   0x2   : > { %p162_p1 = scmp.lt.s32.totalorder %s2867_s15, 3 }
   0x4   : > { %p163_p2 = pnand %p2677_p0, %p162_p1 }
   0x5   : > { %p2952_p3 = scmp.lt.s32.totalorder (!%p163_p2), %s2673_s16, 1 }
   0x6   : > { %166 = sbr.rel (%p163_p2) target bundleno = 862 (0x35e), region = 36 }
   0xb   : > { %v730_v0 = vld [vmem:[%s4452_s2 + $0xf0] sm:$0xff]  ;;  %v731_v1 = vld [vmem:[%s4452_s2 + $0xf8] sm:$0xff]  ;;  %v728_v2 = vld [vmem:[%s4452_s2 + $0xe0] sm:$0xff]  ;;  %vm1009_vm0 = vcmask 1045504   ;;  %s4457_s16 = smov (!%p2952_p3, %s2673_s16), 1  ;;  %vm756_vm1 = vcmask 769024  }
   0xc   : > { %1016 = vmatpush.msra.mxu0 %v730_v0  ;;  %1554 = vmatpush.msra.mxu2 %v731_v1  ;;  %v729_v3 = vld [vmem:[%s4452_s2 + $0xe8] sm:$0xff]  ;;  %v726_v4 = vld [vmem:[%s4452_s2 + $0xd0] sm:$0xff]  ;;  %v727_v5 = vld [vmem:[%s4452_s2 + $0xd8] sm:$0xff]  ;;  %s2852_s8 = smul.u32 1344, %s4457_s16  ;;  %vm2510_vm2 = vcmask 1041408   ;;  %s2679_s17 = sshll.u32 %s4457_s16, 1 }
   0xd   : > { %v754_v6 = vld [vmem:[%s4452_s2 + $0x1b0] sm:$0x3f]  ;;  %v755_v7 = vld [vmem:[%s4452_s2 + $0x1b8] sm:$0x3f]  ;;  %v724_v8 = vld [vmem:[%s4452_s2 + $0xc0] sm:$0xff]  ;;  %vm2612_vm3 = vcmask 1040384   ;;  %s195_s20 = scalar_lea.vmem %s4454_s4, %s2679_s17 }
   0xe   : > { %1017 = vmatpush.msra.mxu0 %v728_v2  ;;  %1555 = vmatpush.msra.mxu2 %v729_v3  ;;  %v725_v9 = vld [vmem:[%s4452_s2 + $0xc8] sm:$0xff]  ;;  %v752_v10 = vld [vmem:[%s4452_s2 + $0x1a0] sm:$0xff]  ;;  %v750_v12 = vld [vmem:[%s4452_s2 + $0x190] sm:$0xff]  ;;  %s3038_s29 = scalar_lea.vmem %s4450_s0, %s2852_s8 }
   0xf   : > { %2680 = vmatpush.msk.msra.mxu1 %vm1009_vm0, %v754_v6  ;;  %2765 = vmatpush.msk.msra.mxu3 %vm1009_vm0, %v755_v7  ;;  %v753_v11 = vld [vmem:[%s4452_s2 + $0x1a8] sm:$0xff]  ;;  %v722_v13 = vld [vmem:[%s4452_s2 + $0xb0] sm:$0xff]  ;;  %v723_v14 = vld [vmem:[%s4452_s2 + $0xb8] sm:$0xff] }
  0x10   : > { %1018 = vmatpush.msra.mxu0 %v726_v4  ;;  %1556 = vmatpush.msra.mxu2 %v727_v5  ;;  %v751_v15 = vld [vmem:[%s4452_s2 + $0x198] sm:$0xff]  ;;  %v748_v16 = vld [vmem:[%s4452_s2 + $0x180] sm:$0xff]  ;;  %v749_v17 = vld [vmem:[%s4452_s2 + $0x188] sm:$0xff] }
  0x11   : > { %1290 = vmatpush.msra.mxu1 %v752_v10  ;;  %1828 = vmatpush.msra.mxu3 %v753_v11  ;;  %v720_v18 = vld [vmem:[%s4452_s2 + $0xa0] sm:$0xff]  ;;  %v721_v19 = vld [vmem:[%s4452_s2 + $0xa8] sm:$0xff]  ;;  %v746_v20 = vld [vmem:[%s4452_s2 + $0x170] sm:$0xff] }
  0x12   : > { %1019 = vmatpush.msra.mxu0 %v724_v8  ;;  %1557 = vmatpush.msra.mxu2 %v725_v9  ;;  %v747_v21 = vld [vmem:[%s4452_s2 + $0x178] sm:$0xff]  ;;  %v718_v22 = vld [vmem:[%s4452_s2 + $0x90] sm:$0xff]  ;;  %v744_v24 = vld [vmem:[%s4452_s2 + $0x160] sm:$0xff] }
  0x13   : > { %1291 = vmatpush.msra.mxu1 %v750_v12  ;;  %1829 = vmatpush.msra.mxu3 %v751_v15  ;;  %v719_v23 = vld [vmem:[%s4452_s2 + $0x98] sm:$0xff]  ;;  %v745_v25 = vld [vmem:[%s4452_s2 + $0x168] sm:$0xff]  ;;  %v716_v26 = vld [vmem:[%s4452_s2 + $0x80] sm:$0xff] }
  0x14   : > { %1020 = vmatpush.msra.mxu0 %v722_v13  ;;  %1558 = vmatpush.msra.mxu2 %v723_v14  ;;  %v717_v27 = vld [vmem:[%s4452_s2 + $0x88] sm:$0xff]  ;;  %v742_v28 = vld [vmem:[%s4452_s2 + $0x150] sm:$0xff]  ;;  %v743_v29 = vld [vmem:[%s4452_s2 + $0x158] sm:$0xff] }
  0x15   : > { %1292 = vmatpush.msra.mxu1 %v748_v16  ;;  %1830 = vmatpush.msra.mxu3 %v749_v17  ;;  %v714_v30 = vld [vmem:[%s4452_s2 + $0x70] sm:$0xff]  ;;  %v715_v31 = vld [vmem:[%s4452_s2 + $0x78] sm:$0xff]  ;;  %v740_v32 = vld [vmem:[%s4452_s2 + $0x140] sm:$0xff] }
  0x16   : > { %1021 = vmatpush.msra.mxu0 %v720_v18  ;;  %1559 = vmatpush.msra.mxu2 %v721_v19  ;;  %v741_v33 = vld [vmem:[%s4452_s2 + $0x148] sm:$0xff]  ;;  %v712_v34 = vld [vmem:[%s4452_s2 + $0x60] sm:$0xff]  ;;  %v738_v36 = vld [vmem:[%s4452_s2 + $0x130] sm:$0xff] }
  0x17   : > { %1293 = vmatpush.msra.mxu1 %v746_v20  ;;  %1831 = vmatpush.msra.mxu3 %v747_v21  ;;  %v713_v35 = vld [vmem:[%s4452_s2 + $0x68] sm:$0xff]  ;;  %v739_v37 = vld [vmem:[%s4452_s2 + $0x138] sm:$0xff]  ;;  %v710_v38 = vld [vmem:[%s4452_s2 + $0x50] sm:$0xff] }
  0x18   : > { %1022 = vmatpush.msra.mxu0 %v718_v22  ;;  %1560 = vmatpush.msra.mxu2 %v719_v23  ;;  %v711_v39 = vld [vmem:[%s4452_s2 + $0x58] sm:$0xff]  ;;  %v736_v40 = vld [vmem:[%s4452_s2 + $0x120] sm:$0xff]  ;;  %v737_v41 = vld [vmem:[%s4452_s2 + $0x128] sm:$0xff] }
  0x19   : > { %1294 = vmatpush.msra.mxu1 %v744_v24  ;;  %1832 = vmatpush.msra.mxu3 %v745_v25  ;;  %v708_v42 = vld [vmem:[%s4452_s2 + $0x40] sm:$0xff]  ;;  %v709_v43 = vld [vmem:[%s4452_s2 + $0x48] sm:$0xff]  ;;  %v734_v44 = vld [vmem:[%s4452_s2 + $0x110] sm:$0xff] }
  0x1a   : > { %1023 = vmatpush.msra.mxu0 %v716_v26  ;;  %1561 = vmatpush.msra.mxu2 %v717_v27  ;;  %v735_v45 = vld [vmem:[%s4452_s2 + $0x118] sm:$0xff]  ;;  %v197_v46 = vld [vmem:[%s3038_s29 + $0x8] sm:$0xff]  ;;  %v706_v48 = vld [vmem:[%s4452_s2 + $0x30] sm:$0xff] }
  0x1b   : > { %1295 = vmatpush.msra.mxu1 %v742_v28  ;;  %1833 = vmatpush.msra.mxu3 %v743_v29  ;;  %v365_v47 = vld [vmem:[%s4451_s1 + $0x8] sm:$0xff]  ;;  %v707_v49 = vld [vmem:[%s4452_s2 + $0x38] sm:$0xff]  ;;  %v732_v50 = vld [vmem:[%s4452_s2 + $0x100] sm:$0xff] }
  0x1c   : > { %1024 = vmatpush.msra.mxu0 %v714_v30  ;;  %1562 = vmatpush.msra.mxu2 %v715_v31  ;;  %v733_v51 = vld [vmem:[%s4452_s2 + $0x108] sm:$0xff]  ;;  %v704_v52 = vld [vmem:[%s4452_s2 + $0x20] sm:$0xff]  ;;  %v533_v54 = vmul.f32 %v365_v47, %v197_v46  ;;  %v702_v57 = vld [vmem:[%s4452_s2 + $0x10] sm:$0xff] }
  0x1d   : > { %1296 = vmatpush.msra.mxu1 %v740_v32  ;;  %1834 = vmatpush.msra.mxu3 %v741_v33  ;;  %v705_v53 = vld [vmem:[%s4452_s2 + $0x28] sm:$0xff]  ;;  %v196_v55 = vld [vmem:[%s3038_s29] sm:$0xff]  ;;  %v703_v58 = vld [vmem:[%s4452_s2 + $0x18] sm:$0xff] }
  0x1e   : > { %1025 = vmatpush.msra.mxu0 %v712_v34  ;;  %1563 = vmatpush.msra.mxu2 %v713_v35  ;;  %v364_v56 = vld [vmem:[%s4451_s1] sm:$0xff]  ;;  %v701_v60 = vld [vmem:[%s4452_s2 + $0x8] sm:$0xff]  ;;  %v199_v62 = vld [vmem:[%s3038_s29 + $0x18] sm:$0xff] }
  0x1f   : > { %1297 = vmatpush.msra.mxu1 %v738_v36  ;;  %1835 = vmatpush.msra.mxu3 %v739_v37  ;;  %v700_v59 = vld [vmem:[%s4452_s2] sm:$0xff]  ;;  %v532_v61 = vmul.f32 %v364_v56, %v196_v55  ;;  %v367_v63 = vld [vmem:[%s4451_s1 + $0x18] sm:$0xff]  ;;  %v198_v1 = vld [vmem:[%s3038_s29 + $0x10] sm:$0xff] }
  0x20   : > { %1026 = vmatpush.msra.mxu0 %v710_v38  ;;  %1564 = vmatpush.msra.mxu2 %v711_v39  ;;  %v535_v0 = vmul.f32 %v367_v63, %v199_v62  ;;  %v366_v2 = vld [vmem:[%s4451_s1 + $0x10] sm:$0xff]  ;;  %v201_v4 = vld [vmem:[%s3038_s29 + $0x28] sm:$0xff]  ;;  %v200_v7 = vld [vmem:[%s3038_s29 + $0x20] sm:$0xff] }
  0x21   : > { %1298 = vmatpush.msra.mxu1 %v736_v40  ;;  %1836 = vmatpush.msra.mxu3 %v737_v41  ;;  %v534_v3 = vmul.f32 %v366_v2, %v198_v1  ;;  %v369_v5 = vld [vmem:[%s4451_s1 + $0x28] sm:$0xff]  ;;  %v368_v8 = vld [vmem:[%s4451_s1 + $0x20] sm:$0xff]  ;;  %v203_v10 = vld [vmem:[%s3038_s29 + $0x38] sm:$0xff] }
  0x22   : > { %1027 = vmatpush.msra.mxu0 %v708_v42  ;;  %1565 = vmatpush.msra.mxu2 %v709_v43  ;;  %v537_v6 = vmul.f32 %v369_v5, %v201_v4  ;;  %v536_v9 = vmul.f32 %v368_v8, %v200_v7  ;;  %v371_v11 = vld [vmem:[%s4451_s1 + $0x38] sm:$0xff]  ;;  %v202_v13 = vld [vmem:[%s3038_s29 + $0x30] sm:$0xff]  ;;  %v205_v16 = vld [vmem:[%s3038_s29 + $0x48] sm:$0xff] }
  0x23   : > { %1299 = vmatpush.msra.mxu1 %v734_v44  ;;  %1837 = vmatpush.msra.mxu3 %v735_v45  ;;  %v539_v12 = vmul.f32 %v371_v11, %v203_v10  ;;  %v370_v14 = vld [vmem:[%s4451_s1 + $0x30] sm:$0xff]  ;;  %v373_v17 = vld [vmem:[%s4451_s1 + $0x48] sm:$0xff]  ;;  %v204_v19 = vld [vmem:[%s3038_s29 + $0x40] sm:$0xff] }
  0x24   : > { %1028 = vmatpush.msra.mxu0 %v706_v48  ;;  %1566 = vmatpush.msra.mxu2 %v707_v49  ;;  %v538_v15 = vmul.f32 %v370_v14, %v202_v13  ;;  %v541_v18 = vmul.f32 %v373_v17, %v205_v16  ;;  %v372_v20 = vld [vmem:[%s4451_s1 + $0x40] sm:$0xff]  ;;  %v207_v22 = vld [vmem:[%s3038_s29 + $0x58] sm:$0xff]  ;;  %v206_v25 = vld [vmem:[%s3038_s29 + $0x50] sm:$0xff] }
  0x25   : > { %1300 = vmatpush.msra.mxu1 %v732_v50  ;;  %1838 = vmatpush.msra.mxu3 %v733_v51  ;;  %v540_v21 = vmul.f32 %v372_v20, %v204_v19  ;;  %v375_v23 = vld [vmem:[%s4451_s1 + $0x58] sm:$0xff]  ;;  %v374_v26 = vld [vmem:[%s4451_s1 + $0x50] sm:$0xff]  ;;  %v209_v28 = vld [vmem:[%s3038_s29 + $0x68] sm:$0xff] }
  0x26   : > { %1029 = vmatpush.msra.mxu0 %v704_v52  ;;  %1567 = vmatpush.msra.mxu2 %v705_v53  ;;  %v543_v24 = vmul.f32 %v375_v23, %v207_v22  ;;  %v542_v27 = vmul.f32 %v374_v26, %v206_v25  ;;  %v377_v29 = vld [vmem:[%s4451_s1 + $0x68] sm:$0xff]  ;;  %v208_v31 = vld [vmem:[%s3038_s29 + $0x60] sm:$0xff]  ;;  %v211_v34 = vld [vmem:[%s3038_s29 + $0x78] sm:$0xff] }
  0x27   : > { %2681 = vmatmul.msk.f32.vlgmr.msra.gmra.mxu1 %vm756_vm1, %v533_v54  ;;  %2766 = vmatmul.msk.f32.vlgmr.msra.gmra.mxu3 %vm756_vm1, %v533_v54  ;;  %v545_v30 = vmul.f32 %v377_v29, %v209_v28  ;;  %v376_v32 = vld [vmem:[%s4451_s1 + $0x60] sm:$0xff]  ;;  %v379_v35 = vld [vmem:[%s4451_s1 + $0x78] sm:$0xff]  ;;  %v210_v37 = vld [vmem:[%s3038_s29 + $0x70] sm:$0xff] }
  0x28   : > { %1030 = vmatpush.msra.mxu0 %v702_v57  ;;  %1568 = vmatpush.msra.mxu2 %v703_v58  ;;  %v544_v33 = vmul.f32 %v376_v32, %v208_v31  ;;  %v547_v36 = vmul.f32 %v379_v35, %v211_v34  ;;  %v378_v38 = vld [vmem:[%s4451_s1 + $0x70] sm:$0xff]  ;;  %v213_v40 = vld [vmem:[%s3038_s29 + $0x88] sm:$0xff]  ;;  %v212_v43 = vld [vmem:[%s3038_s29 + $0x80] sm:$0xff] }
  0x29   : > { %v546_v39 = vmul.f32 %v378_v38, %v210_v37  ;;  %v381_v41 = vld [vmem:[%s4451_s1 + $0x88] sm:$0xff]  ;;  %v380_v44 = vld [vmem:[%s4451_s1 + $0x80] sm:$0xff]  ;;  %v215_v46 = vld [vmem:[%s3038_s29 + $0x98] sm:$0xff] }
  0x2a   : > { %1031 = vmatpush.msra.mxu0 %v700_v59  ;;  %1569 = vmatpush.msra.mxu2 %v701_v60  ;;  %v549_v42 = vmul.f32 %v381_v41, %v213_v40  ;;  %v548_v45 = vmul.f32 %v380_v44, %v212_v43  ;;  %v383_v47 = vld [vmem:[%s4451_s1 + $0x98] sm:$0xff]  ;;  %v214_v49 = vld [vmem:[%s3038_s29 + $0x90] sm:$0xff]  ;;  %v217_v52 = vld [vmem:[%s3038_s29 + $0xa8] sm:$0xff] }
  0x2b   : > { %1032 = vmatmul.f32.vlgmr.msra.gmra.mxu0 %v532_v61  ;;  %1570 = vmatmul.f32.vlgmr.msra.gmra.mxu2 %v532_v61  ;;  %v551_v48 = vmul.f32 %v383_v47, %v215_v46  ;;  %v382_v50 = vld [vmem:[%s4451_s1 + $0x90] sm:$0xff]  ;;  %v385_v53 = vld [vmem:[%s4451_s1 + $0xa8] sm:$0xff]  ;;  %v216_v55 = vld [vmem:[%s3038_s29 + $0xa0] sm:$0xff] }
  0x2c   : > { %v550_v51 = vmul.f32 %v382_v50, %v214_v49  ;;  %v553_v54 = vmul.f32 %v385_v53, %v217_v52  ;;  %v384_v56 = vld [vmem:[%s4451_s1 + $0xa0] sm:$0xff]  ;;  %v219_v58 = vld [vmem:[%s3038_s29 + $0xb8] sm:$0xff]  ;;  %v218_v61 = vld [vmem:[%s3038_s29 + $0xb0] sm:$0xff] }
  0x2d   : > { %v552_v57 = vmul.f32 %v384_v56, %v216_v55  ;;  %v387_v59 = vld [vmem:[%s4451_s1 + $0xb8] sm:$0xff]  ;;  %v386_v62 = vld [vmem:[%s4451_s1 + $0xb0] sm:$0xff]  ;;  %v389_v1 = vld [vmem:[%s4451_s1 + $0xc8] sm:$0xff] }
  0x2e   : > { %v555_v60 = vmul.f32 %v387_v59, %v219_v58  ;;  %v554_v63 = vmul.f32 %v386_v62, %v218_v61  ;;  %v388_v4 = vld [vmem:[%s4451_s1 + $0xc0] sm:$0xff]  ;;  %v391_v7 = vld [vmem:[%s4451_s1 + $0xd8] sm:$0xff]  ;;  %v390_v10 = vld [vmem:[%s4451_s1 + $0xd0] sm:$0xff] }
  0x2f   : > { %2682 = vmatmul.msk.f32.gmra.mxu1 %vm756_vm1, %v535_v0  ;;  %2767 = vmatmul.msk.f32.gmra.mxu3 %vm756_vm1, %v535_v0  ;;  %v221_v0 = vld [vmem:[%s3038_s29 + $0xc8] sm:$0xff]  ;;  %v392_v16 = vld [vmem:[%s4451_s1 + $0xe0] sm:$0xff]  ;;  %v395_v19 = vld [vmem:[%s4451_s1 + $0xf8] sm:$0xff] }
  0x30   : > { %v557_v2 = vmul.f32 %v389_v1, %v221_v0  ;;  %v393_v13 = vld [vmem:[%s4451_s1 + $0xe8] sm:$0xff]  ;;  %v394_v22 = vld [vmem:[%s4451_s1 + $0xf0] sm:$0xff]  ;;  %v228_v28 = vld [vmem:[%s3038_s29 + $0x100] sm:$0xff] }
  0x31   : > { %v397_v25 = vld [vmem:[%s4451_s1 + $0x108] sm:$0xff]  ;;  %v396_v29 = vld [vmem:[%s4451_s1 + $0x100] sm:$0xff]  ;;  %v231_v32 = vld [vmem:[%s3038_s29 + $0x118] sm:$0xff] }
  0x32   : > { %v230_v37 = vld [vmem:[%s3038_s29 + $0x110] sm:$0xff]  ;;  %v2092_v40 = vld [vmem:[%s4453_s3] sm:$0xff]  ;;  %v233_v46 = vld [vmem:[%s3038_s29 + $0x128] sm:$0xff] }
  0x33   : > { %1035 = vmatmul.f32.gmra.mxu0 %v534_v3  ;;  %1573 = vmatmul.f32.gmra.mxu2 %v534_v3  ;;  %v220_v3 = vld [vmem:[%s3038_s29 + $0xc0] sm:$0xff]  ;;  %v398_v38 = vld [vmem:[%s4451_s1 + $0x110] sm:$0xff]  ;;  %v401_v47 = vld [vmem:[%s4451_s1 + $0x128] sm:$0xff] }
  0x34   : > { %v556_v5 = vmul.f32 %v388_v4, %v220_v3  ;;  %v566_v43 = vmul.f32 %v398_v38, %v230_v37  ;;  %v569_v52 = vmul.f32 %v401_v47, %v233_v46  ;;  %v400_v55 = vld [vmem:[%s4451_s1 + $0x120] sm:$0xff]  ;;  %v2095_v59 = vld [vmem:[%s4453_s3 + $0x18] sm:$0xff]  ;;  %v238_v46 = vld [vmem:[%s3038_s29 + $0x150] sm:$0xff] }
  0x35   : > { %v235_v0 = vld [vmem:[%s3038_s29 + $0x138] sm:$0xff]  ;;  %v406_v47 = vld [vmem:[%s4451_s1 + $0x150] sm:$0xff] }
  0x36   : > { %v403_v1 = vld [vmem:[%s4451_s1 + $0x138] sm:$0xff] }
  0x37   : > { %2683 = vmatmul.msk.f32.gmra.mxu1 %vm756_vm1, %v537_v6  ;;  %2768 = vmatmul.msk.f32.gmra.mxu3 %vm756_vm1, %v537_v6  ;;  %v223_v6 = vld [vmem:[%s3038_s29 + $0xd8] sm:$0xff] }
  0x38   : > { %v559_v8 = vmul.f32 %v391_v7, %v223_v6  ;;  %v239_v37 = vld [vmem:[%s3038_s29 + $0x158] sm:$0xff] }
  0x39   : > { %v407_v38 = vld [vmem:[%s4451_s1 + $0x158] sm:$0xff] }
  0x3b   : > { %1038 = vmatmul.f32.gmra.mxu0 %v536_v9  ;;  %1576 = vmatmul.f32.gmra.mxu2 %v536_v9  ;;  %v222_v9 = vld [vmem:[%s3038_s29 + $0xd0] sm:$0xff] }
  0x3c   : > { %v558_v11 = vmul.f32 %v390_v10, %v222_v9  ;;  %v234_v10 = vld [vmem:[%s3038_s29 + $0x130] sm:$0xff] }
  0x3f   : > { %2684 = vmatmul.msk.f32.gmra.mxu1 %vm756_vm1, %v539_v12  ;;  %2769 = vmatmul.msk.f32.gmra.mxu3 %vm756_vm1, %v539_v12  ;;  %v225_v12 = vld [vmem:[%s3038_s29 + $0xe8] sm:$0xff] }
  0x40   : > { %v561_v14 = vmul.f32 %v393_v13, %v225_v12 }
  0x43   : > { %1041 = vmatmul.f32.gmra.mxu0 %v538_v15  ;;  %1579 = vmatmul.f32.gmra.mxu2 %v538_v15  ;;  %v224_v15 = vld [vmem:[%s3038_s29 + $0xe0] sm:$0xff] }
  0x44   : > { %v560_v17 = vmul.f32 %v392_v16, %v224_v15 }
  0x47   : > { %2685 = vmatmul.msk.f32.gmra.mxu1 %vm756_vm1, %v541_v18  ;;  %2770 = vmatmul.msk.f32.gmra.mxu3 %vm756_vm1, %v541_v18  ;;  %v227_v18 = vld [vmem:[%s3038_s29 + $0xf8] sm:$0xff] }
  0x48   : > { %v563_v20 = vmul.f32 %v395_v19, %v227_v18  ;;  %v2098_v18 = vld [vmem:[%s4453_s3 + $0x30] sm:$0xff]  ;;  %v237_v19 = vld [vmem:[%s3038_s29 + $0x148] sm:$0xff] }
  0x4b   : > { %1044 = vmatmul.f32.gmra.mxu0 %v540_v21  ;;  %1582 = vmatmul.f32.gmra.mxu2 %v540_v21  ;;  %v226_v21 = vld [vmem:[%s3038_s29 + $0xf0] sm:$0xff] }
  0x4c   : > { %v562_v23 = vmul.f32 %v394_v22, %v226_v21 }
  0x4f   : > { %2686 = vmatmul.msk.f32.gmra.mxu1 %vm756_vm1, %v543_v24  ;;  %2771 = vmatmul.msk.f32.gmra.mxu3 %vm756_vm1, %v543_v24  ;;  %v229_v24 = vld [vmem:[%s3038_s29 + $0x108] sm:$0xff] }
  0x50   : > { %v565_v26 = vmul.f32 %v397_v25, %v229_v24 }
  0x53   : > { %1047 = vmatmul.f32.gmra.mxu0 %v542_v27  ;;  %1585 = vmatmul.f32.gmra.mxu2 %v542_v27 }
  0x57   : > { %2687 = vmatmul.msk.f32.gmra.mxu1 %vm756_vm1, %v545_v30  ;;  %2772 = vmatmul.msk.f32.gmra.mxu3 %vm756_vm1, %v545_v30  ;;  %v564_v30 = vmul.f32 %v396_v29, %v228_v28  ;;  %v236_v28 = vld [vmem:[%s3038_s29 + $0x140] sm:$0xff] }
  0x58   : > { %v404_v29 = vld [vmem:[%s4451_s1 + $0x140] sm:$0xff] }
  0x5b   : > { %1050 = vmatmul.f32.gmra.mxu0 %v544_v33  ;;  %1588 = vmatmul.f32.gmra.mxu2 %v544_v33  ;;  %v399_v33 = vld [vmem:[%s4451_s1 + $0x118] sm:$0xff] }
  0x5c   : > { %v567_v35 = vmul.f32 %v399_v33, %v231_v32  ;;  %v2099_v32 = vld [vmem:[%s4453_s3 + $0x38] sm:$0xff] }
  0x5f   : > { %2688 = vmatmul.msk.f32.gmra.mxu1 %vm756_vm1, %v547_v36  ;;  %2773 = vmatmul.msk.f32.gmra.mxu3 %vm756_vm1, %v547_v36 }
  0x63   : > { %1053 = vmatmul.f32.gmra.mxu0 %v546_v39  ;;  %1591 = vmatmul.f32.gmra.mxu2 %v546_v39 }
  0x67   : > { %2689 = vmatmul.msk.f32.gmra.mxu1 %vm756_vm1, %v549_v42  ;;  %2774 = vmatmul.msk.f32.gmra.mxu3 %vm756_vm1, %v549_v42 }
  0x6b   : > { %1056 = vmatmul.f32.gmra.mxu0 %v548_v45  ;;  %1594 = vmatmul.f32.gmra.mxu2 %v548_v45  ;;  %v2094_v45 = vld [vmem:[%s4453_s3 + $0x10] sm:$0xff] }
  0x6f   : > { %2690 = vmatmul.msk.f32.gmra.mxu1 %vm756_vm1, %v551_v48  ;;  %2775 = vmatmul.msk.f32.gmra.mxu3 %vm756_vm1, %v551_v48 }
  0x73   : > { %1059 = vmatmul.f32.gmra.mxu0 %v550_v51  ;;  %1597 = vmatmul.f32.gmra.mxu2 %v550_v51 }
  0x77   : > { %2691 = vmatmul.msk.f32.gmra.mxu1 %vm756_vm1, %v553_v54  ;;  %2776 = vmatmul.msk.f32.gmra.mxu3 %vm756_vm1, %v553_v54  ;;  %v232_v54 = vld [vmem:[%s3038_s29 + $0x120] sm:$0xff] }
  0x78   : > { %v568_v61 = vmul.f32 %v400_v55, %v232_v54  ;;  %v2102_v54 = vld [vmem:[%s4453_s3 + $0x50] sm:$0xff]  ;;  %v241_v55 = vld [vmem:[%s3038_s29 + $0x168] sm:$0xff] }
  0x7b   : > { %1062 = vmatmul.f32.gmra.mxu0 %v552_v57  ;;  %1600 = vmatmul.f32.gmra.mxu2 %v552_v57  ;;  %v2093_v57 = vld [vmem:[%s4453_s3 + $0x8] sm:$0xff] }
  0x7f   : > { %2692 = vmatmul.msk.f32.gmra.mxu1 %vm756_vm1, %v555_v60  ;;  %2777 = vmatmul.msk.f32.gmra.mxu3 %vm756_vm1, %v555_v60 }
  0x83   : > { %1065 = vmatmul.f32.gmra.mxu0 %v554_v63  ;;  %1603 = vmatmul.f32.gmra.mxu2 %v554_v63  ;;  %v2096_v63 = vld [vmem:[%s4453_s3 + $0x20] sm:$0xff] }
  0x87   : > { %2693 = vmatmul.msk.f32.gmra.mxu1 %vm756_vm1, %v557_v2  ;;  %2778 = vmatmul.msk.f32.gmra.mxu3 %vm756_vm1, %v557_v2 }
  0x8b   : > { %1068 = vmatmul.f32.gmra.mxu0 %v556_v5  ;;  %1606 = vmatmul.f32.gmra.mxu2 %v556_v5 }
  0x8f   : > { %2694 = vmatmul.msk.f32.gmra.mxu1 %vm756_vm1, %v559_v8  ;;  %2779 = vmatmul.msk.f32.gmra.mxu3 %vm756_vm1, %v559_v8  ;;  %v571_v8 = vmul.f32 %v403_v1, %v235_v0  ;;  %v240_v0 = vld [vmem:[%s3038_s29 + $0x160] sm:$0xff] }
  0x90   : > { %v408_v1 = vld [vmem:[%s4451_s1 + $0x160] sm:$0xff] }
  0x93   : > { %1071 = vmatmul.f32.gmra.mxu0 %v558_v11  ;;  %1609 = vmatmul.f32.gmra.mxu2 %v558_v11  ;;  %v402_v11 = vld [vmem:[%s4451_s1 + $0x130] sm:$0xff] }
  0x94   : > { %v570_v16 = vmul.f32 %v402_v11, %v234_v10  ;;  %v411_v10 = vld [vmem:[%s4451_s1 + $0x178] sm:$0xff] }
  0x97   : > { %2695 = vmatmul.msk.f32.gmra.mxu1 %vm756_vm1, %v561_v14  ;;  %2780 = vmatmul.msk.f32.gmra.mxu3 %vm756_vm1, %v561_v14  ;;  %v2097_v14 = vld [vmem:[%s4453_s3 + $0x28] sm:$0xff] }
  0x9b   : > { %1074 = vmatmul.f32.gmra.mxu0 %v560_v17  ;;  %1612 = vmatmul.f32.gmra.mxu2 %v560_v17 }
  0x9f   : > { %2696 = vmatmul.msk.f32.gmra.mxu1 %vm756_vm1, %v563_v20  ;;  %2781 = vmatmul.msk.f32.gmra.mxu3 %vm756_vm1, %v563_v20  ;;  %v405_v20 = vld [vmem:[%s4451_s1 + $0x148] sm:$0xff] }
  0xa3   : > { %1077 = vmatmul.f32.gmra.mxu0 %v562_v23  ;;  %1615 = vmatmul.f32.gmra.mxu2 %v562_v23 }
  0xa4   : > { %v1302_v27 = vpop.f32.mrf.mxu1 }
  0xa7   : > { %2697 = vmatmul.msk.f32.gmra.mxu1 %vm756_vm1, %v565_v26  ;;  %2782 = vmatmul.msk.f32.gmra.mxu3 %vm756_vm1, %v565_v26  ;;  %v573_v26 = vmul.f32 %v405_v20, %v237_v19  ;;  %v410_v19 = vld [vmem:[%s4451_s1 + $0x170] sm:$0xff] }
  0xa8   : > { %v1033_v31 = vpop.f32.mrf.mxu0 }
  0xa9   : > { %v1303_v39 = vadd.f32 %v1302_v27, %v1033_v31 }
  0xaa   : > { %v1840_v34 = vpop.f32.mrf.mxu3 }
  0xab   : > { %1080 = vmatmul.f32.gmra.mxu0 %v564_v30  ;;  %1618 = vmatmul.f32.gmra.mxu2 %v564_v30  ;;  %v2260_v48 = vmul.f32 %v2092_v40, %v1303_v39 }
  0xac   : > { %v1305_v36 = vpop.f32.mrf.mxu1 }
  0xae   : > { %v1571_v41 = vpop.f32.mrf.mxu2 }
  0xaf   : > { %v1841_v42 = vadd.f32 %v1840_v34, %v1571_v41  ;;  %2698 = vmatmul.msk.f32.gmra.mxu1 %vm756_vm1, %v567_v35  ;;  %2783 = vmatmul.msk.f32.gmra.mxu3 %vm756_vm1, %v567_v35  ;;  %v572_v34 = vmul.f32 %v404_v29, %v236_v28  ;;  %v413_v28 = vld [vmem:[%s4451_s1 + $0x188] sm:$0xff] }
  0xb0   : > { %v1036_v44 = vpop.f32.mrf.mxu0 }
  0xb1   : > { %v1306_v49 = vadd.f32 %v1305_v36, %v1036_v44  ;;  %v2261_v2 = vmul.f32 %v2093_v57, %v1841_v42  ;;  %v2100_v36 = vld [vmem:[%s4453_s3 + $0x40] sm:$0xff]  ;;  %v575_v44 = vmul.f32 %v407_v38, %v239_v37 }
  0xb2   : > { %v1843_v50 = vpop.f32.mrf.mxu3  ;;  %v412_v37 = vld [vmem:[%s4451_s1 + $0x180] sm:$0xff] }
  0xb3   : > { %v2262_v51 = vmul.f32 %v2094_v45, %v1306_v49  ;;  %1083 = vmatmul.f32.gmra.mxu0 %v566_v43  ;;  %1621 = vmatmul.f32.gmra.mxu2 %v566_v43 }
  0xb4   : > { %v1308_v53 = vpop.f32.mrf.mxu1 }
  0xb5   : > { %v2428_v56 = vadd.f32 %v2262_v51, %v2260_v48 }
  0xb6   : > { %v1574_v58 = vpop.f32.mrf.mxu2 }
  0xb7   : > { %v1844_v60 = vadd.f32 %v1843_v50, %v1574_v58  ;;  %2699 = vmatmul.msk.f32.gmra.mxu1 %vm756_vm1, %v569_v52  ;;  %2784 = vmatmul.msk.f32.gmra.mxu3 %vm756_vm1, %v569_v52  ;;  %v2101_v50 = vld [vmem:[%s4453_s3 + $0x48] sm:$0xff]  ;;  %v574_v52 = vmul.f32 %v406_v47, %v238_v46  ;;  %v415_v46 = vld [vmem:[%s4451_s1 + $0x198] sm:$0xff] }
  0xb8   : > { %v1039_v62 = vpop.f32.mrf.mxu0 }
  0xb9   : > { %v2263_v3 = vmul.f32 %v2095_v59, %v1844_v60  ;;  %v1309_v4 = vadd.f32 %v1308_v53, %v1039_v62 }
  0xba   : > { %v1846_v5 = vpop.f32.mrf.mxu3 }
  0xbb   : > { %v2519_v6 = vadd.f32 %v2263_v3, %v2261_v2  ;;  %v2264_v7 = vmul.f32 %v2096_v63, %v1309_v4  ;;  %1086 = vmatmul.f32.gmra.mxu0 %v568_v61  ;;  %1624 = vmatmul.f32.gmra.mxu2 %v568_v61  ;;  %v2103_v4 = vld [vmem:[%s4453_s3 + $0x58] sm:$0xff] }
  0xbc   : > { %v1311_v9 = vpop.f32.mrf.mxu1 }
  0xbd   : > { %v2429_v12 = vadd.f32 %v2428_v56, %v2264_v7  ;;  %v409_v56 = vld [vmem:[%s4451_s1 + $0x168] sm:$0xff] }
  0xbe   : > { %v1577_v13 = vpop.f32.mrf.mxu2  ;;  %v577_v62 = vmul.f32 %v409_v56, %v241_v55  ;;  %v414_v55 = vld [vmem:[%s4451_s1 + $0x190] sm:$0xff] }
  0xbf   : > { %v1847_v15 = vadd.f32 %v1846_v5, %v1577_v13  ;;  %2700 = vmatmul.msk.f32.gmra.mxu1 %vm756_vm1, %v571_v8  ;;  %2785 = vmatmul.msk.f32.gmra.mxu3 %vm756_vm1, %v571_v8  ;;  %v2104_v8 = vld [vmem:[%s4453_s3 + $0x60] sm:$0xff] }
  0xc0   : > { %v1042_v17 = vpop.f32.mrf.mxu0 }
  0xc1   : > { %v2265_v21 = vmul.f32 %v2097_v14, %v1847_v15  ;;  %v1312_v22 = vadd.f32 %v1311_v9, %v1042_v17  ;;  %v243_v9 = vld [vmem:[%s3038_s29 + $0x178] sm:$0xff] }
  0xc2   : > { %v1849_v23 = vpop.f32.mrf.mxu3 }
  0xc3   : > { %v2520_v24 = vadd.f32 %v2519_v6, %v2265_v21  ;;  %v2266_v25 = vmul.f32 %v2098_v18, %v1312_v22  ;;  %1089 = vmatmul.f32.gmra.mxu0 %v570_v16  ;;  %1627 = vmatmul.f32.gmra.mxu2 %v570_v16  ;;  %v576_v6 = vmul.f32 %v408_v1, %v240_v0  ;;  %v242_v18 = vld [vmem:[%s3038_s29 + $0x170] sm:$0xff]  ;;  %v2105_v22 = vld [vmem:[%s4453_s3 + $0x68] sm:$0xff] }
  0xc4   : > { %v1314_v27 = vpop.f32.mrf.mxu1  ;;  %v579_v16 = vmul.f32 %v411_v10, %v243_v9  ;;  %v417_v0 = vld [vmem:[%s4451_s1 + $0x1a8] sm:$0xff]  ;;  %v416_v9 = vld [vmem:[%s4451_s1 + $0x1a0] sm:$0xff] }
  0xc5   : > { %v2430_v30 = vadd.f32 %v2429_v12, %v2266_v25 }
  0xc6   : > { %v1580_v31 = vpop.f32.mrf.mxu2 }
  0xc7   : > { %v1850_v33 = vadd.f32 %v1849_v23, %v1580_v31  ;;  %2701 = vmatmul.msk.f32.gmra.mxu1 %vm756_vm1, %v573_v26  ;;  %2786 = vmatmul.msk.f32.gmra.mxu3 %vm756_vm1, %v573_v26  ;;  %v2106_v26 = vld [vmem:[%s4453_s3 + $0x70] sm:$0xff] }
  0xc8   : > { %v1045_v35 = vpop.f32.mrf.mxu0 }
  0xc9   : > { %v2267_v39 = vmul.f32 %v2099_v32, %v1850_v33  ;;  %v1315_v40 = vadd.f32 %v1314_v27, %v1045_v35  ;;  %v245_v27 = vld [vmem:[%s3038_s29 + $0x188] sm:$0xff] }
  0xca   : > { %v1852_v41 = vpop.f32.mrf.mxu3 }
  0xcb   : > { %v2521_v42 = vadd.f32 %v2520_v24, %v2267_v39  ;;  %v2268_v43 = vmul.f32 %v2100_v36, %v1315_v40  ;;  %1092 = vmatmul.f32.gmra.mxu0 %v572_v34  ;;  %1630 = vmatmul.f32.gmra.mxu2 %v572_v34  ;;  %v578_v24 = vmul.f32 %v410_v19, %v242_v18  ;;  %v244_v36 = vld [vmem:[%s3038_s29 + $0x180] sm:$0xff]  ;;  %v2107_v40 = vld [vmem:[%s4453_s3 + $0x78] sm:$0xff] }
  0xcc   : > { %v1317_v45 = vpop.f32.mrf.mxu1  ;;  %v581_v34 = vmul.f32 %v413_v28, %v245_v27  ;;  %v419_v18 = vld [vmem:[%s4451_s1 + $0x1b8] sm:$0xff]  ;;  %v418_v27 = vld [vmem:[%s4451_s1 + $0x1b0] sm:$0xff] }
  0xcd   : > { %v2431_v48 = vadd.f32 %v2430_v30, %v2268_v43 }
  0xce   : > { %v1583_v49 = vpop.f32.mrf.mxu2 }
  0xcf   : > { %v1853_v51 = vadd.f32 %v1852_v41, %v1583_v49  ;;  %2702 = vmatmul.msk.f32.gmra.mxu1 %vm756_vm1, %v575_v44  ;;  %2787 = vmatmul.msk.f32.gmra.mxu3 %vm756_vm1, %v575_v44  ;;  %v2108_v44 = vld [vmem:[%s4453_s3 + $0x80] sm:$0xff] }
  0xd0   : > { %v1048_v53 = vpop.f32.mrf.mxu0 }
  0xd1   : > { %v2269_v57 = vmul.f32 %v2101_v50, %v1853_v51  ;;  %v1318_v58 = vadd.f32 %v1317_v45, %v1048_v53  ;;  %v247_v45 = vld [vmem:[%s3038_s29 + $0x198] sm:$0xff] }
  0xd2   : > { %v1855_v59 = vpop.f32.mrf.mxu3 }
  0xd3   : > { %v2522_v60 = vadd.f32 %v2521_v42, %v2269_v57  ;;  %v2270_v61 = vmul.f32 %v2102_v54, %v1318_v58  ;;  %1095 = vmatmul.f32.gmra.mxu0 %v574_v52  ;;  %1633 = vmatmul.f32.gmra.mxu2 %v574_v52  ;;  %v580_v42 = vmul.f32 %v412_v37, %v244_v36  ;;  %v246_v54 = vld [vmem:[%s3038_s29 + $0x190] sm:$0xff]  ;;  %v2109_v58 = vld [vmem:[%s4453_s3 + $0x88] sm:$0xff] }
  0xd4   : > { %v1320_v63 = vpop.f32.mrf.mxu1  ;;  %v583_v52 = vmul.f32 %v415_v46, %v247_v45  ;;  %v421_v36 = vld [vmem:[%s4451_s1 + $0x1c8] sm:$0xff]  ;;  %v420_v45 = vld [vmem:[%s4451_s1 + $0x1c0] sm:$0xff] }
  0xd5   : > { %v2432_v2 = vadd.f32 %v2431_v48, %v2270_v61 }
  0xd6   : > { %v1586_v3 = vpop.f32.mrf.mxu2 }
  0xd7   : > { %v1856_v5 = vadd.f32 %v1855_v59, %v1586_v3  ;;  %2703 = vmatmul.msk.f32.gmra.mxu1 %vm756_vm1, %v577_v62  ;;  %2788 = vmatmul.msk.f32.gmra.mxu3 %vm756_vm1, %v577_v62  ;;  %v2110_v62 = vld [vmem:[%s4453_s3 + $0x90] sm:$0xff] }
  0xd8   : > { %v1051_v7 = vpop.f32.mrf.mxu0 }
  0xd9   : > { %v2271_v11 = vmul.f32 %v2103_v4, %v1856_v5  ;;  %v1321_v12 = vadd.f32 %v1320_v63, %v1051_v7  ;;  %v249_v63 = vld [vmem:[%s3038_s29 + $0x1a8] sm:$0xff] }
  0xda   : > { %v1858_v13 = vpop.f32.mrf.mxu3 }
  0xdb   : > { %v2523_v14 = vadd.f32 %v2522_v60, %v2271_v11  ;;  %v2272_v15 = vmul.f32 %v2104_v8, %v1321_v12  ;;  %1098 = vmatmul.f32.gmra.mxu0 %v576_v6  ;;  %1636 = vmatmul.f32.gmra.mxu2 %v576_v6  ;;  %v582_v60 = vmul.f32 %v414_v55, %v246_v54  ;;  %v248_v8 = vld [vmem:[%s3038_s29 + $0x1a0] sm:$0xff]  ;;  %v2111_v12 = vld [vmem:[%s4453_s3 + $0x98] sm:$0xff] }
  0xdc   : > { %v1323_v17 = vpop.f32.mrf.mxu1  ;;  %v585_v6 = vmul.f32 %v417_v0, %v249_v63  ;;  %v423_v54 = vld [vmem:[%s4451_s1 + $0x1d8] sm:$0xff]  ;;  %v422_v63 = vld [vmem:[%s4451_s1 + $0x1d0] sm:$0xff] }
  0xdd   : > { %v2433_v20 = vadd.f32 %v2432_v2, %v2272_v15 }
  0xde   : > { %v1589_v21 = vpop.f32.mrf.mxu2 }
  0xdf   : > { %v1859_v23 = vadd.f32 %v1858_v13, %v1589_v21  ;;  %2704 = vmatmul.msk.f32.gmra.mxu1 %vm756_vm1, %v579_v16  ;;  %2789 = vmatmul.msk.f32.gmra.mxu3 %vm756_vm1, %v579_v16  ;;  %v2112_v16 = vld [vmem:[%s4453_s3 + $0xa0] sm:$0xff] }
  0xe0   : > { %v1054_v25 = vpop.f32.mrf.mxu0 }
  0xe1   : > { %v2273_v29 = vmul.f32 %v2105_v22, %v1859_v23  ;;  %v1324_v30 = vadd.f32 %v1323_v17, %v1054_v25  ;;  %v251_v17 = vld [vmem:[%s3038_s29 + $0x1b8] sm:$0xff] }
  0xe2   : > { %v1861_v31 = vpop.f32.mrf.mxu3 }
  0xe3   : > { %v2524_v32 = vadd.f32 %v2523_v14, %v2273_v29  ;;  %v2274_v33 = vmul.f32 %v2106_v26, %v1324_v30  ;;  %1101 = vmatmul.f32.gmra.mxu0 %v578_v24  ;;  %1639 = vmatmul.f32.gmra.mxu2 %v578_v24  ;;  %v584_v14 = vmul.f32 %v416_v9, %v248_v8  ;;  %v250_v26 = vld [vmem:[%s3038_s29 + $0x1b0] sm:$0xff]  ;;  %v2113_v30 = vld [vmem:[%s4453_s3 + $0xa8] sm:$0xff] }
  0xe4   : > { %v1326_v35 = vpop.f32.mrf.mxu1  ;;  %v587_v24 = vmul.f32 %v419_v18, %v251_v17  ;;  %v425_v8 = vld [vmem:[%s4451_s1 + $0x1e8] sm:$0xff]  ;;  %v424_v17 = vld [vmem:[%s4451_s1 + $0x1e0] sm:$0xff] }
  0xe5   : > { %v2434_v38 = vadd.f32 %v2433_v20, %v2274_v33 }
  0xe6   : > { %v1592_v39 = vpop.f32.mrf.mxu2 }
  0xe7   : > { %v1862_v41 = vadd.f32 %v1861_v31, %v1592_v39  ;;  %2705 = vmatmul.msk.f32.gmra.mxu1 %vm756_vm1, %v581_v34  ;;  %2790 = vmatmul.msk.f32.gmra.mxu3 %vm756_vm1, %v581_v34  ;;  %v2114_v34 = vld [vmem:[%s4453_s3 + $0xb0] sm:$0xff] }
  0xe8   : > { %v1057_v43 = vpop.f32.mrf.mxu0 }
  0xe9   : > { %v2275_v47 = vmul.f32 %v2107_v40, %v1862_v41  ;;  %v1327_v48 = vadd.f32 %v1326_v35, %v1057_v43  ;;  %v253_v35 = vld [vmem:[%s3038_s29 + $0x1c8] sm:$0xff] }
  0xea   : > { %v1864_v49 = vpop.f32.mrf.mxu3 }
  0xeb   : > { %v2525_v50 = vadd.f32 %v2524_v32, %v2275_v47  ;;  %v2276_v51 = vmul.f32 %v2108_v44, %v1327_v48  ;;  %1104 = vmatmul.f32.gmra.mxu0 %v580_v42  ;;  %1642 = vmatmul.f32.gmra.mxu2 %v580_v42  ;;  %v586_v32 = vmul.f32 %v418_v27, %v250_v26  ;;  %v252_v44 = vld [vmem:[%s3038_s29 + $0x1c0] sm:$0xff]  ;;  %v2115_v48 = vld [vmem:[%s4453_s3 + $0xb8] sm:$0xff] }
  0xec   : > { %v1329_v53 = vpop.f32.mrf.mxu1  ;;  %v589_v42 = vmul.f32 %v421_v36, %v253_v35  ;;  %v427_v26 = vld [vmem:[%s4451_s1 + $0x1f8] sm:$0xff]  ;;  %v426_v35 = vld [vmem:[%s4451_s1 + $0x1f0] sm:$0xff] }
  0xed   : > { %v2435_v56 = vadd.f32 %v2434_v38, %v2276_v51 }
  0xee   : > { %v1595_v57 = vpop.f32.mrf.mxu2 }
  0xef   : > { %v1865_v59 = vadd.f32 %v1864_v49, %v1595_v57  ;;  %2706 = vmatmul.msk.f32.gmra.mxu1 %vm756_vm1, %v583_v52  ;;  %2791 = vmatmul.msk.f32.gmra.mxu3 %vm756_vm1, %v583_v52  ;;  %v2116_v52 = vld [vmem:[%s4453_s3 + $0xc0] sm:$0xff] }
  0xf0   : > { %v1060_v61 = vpop.f32.mrf.mxu0 }
  0xf1   : > { %v2277_v1 = vmul.f32 %v2109_v58, %v1865_v59  ;;  %v1330_v2 = vadd.f32 %v1329_v53, %v1060_v61  ;;  %v255_v53 = vld [vmem:[%s3038_s29 + $0x1d8] sm:$0xff] }
  0xf2   : > { %v1867_v3 = vpop.f32.mrf.mxu3 }
  0xf3   : > { %v2526_v4 = vadd.f32 %v2525_v50, %v2277_v1  ;;  %v2278_v5 = vmul.f32 %v2110_v62, %v1330_v2  ;;  %1107 = vmatmul.f32.gmra.mxu0 %v582_v60  ;;  %1645 = vmatmul.f32.gmra.mxu2 %v582_v60  ;;  %v588_v50 = vmul.f32 %v420_v45, %v252_v44  ;;  %v254_v62 = vld [vmem:[%s3038_s29 + $0x1d0] sm:$0xff]  ;;  %v2117_v2 = vld [vmem:[%s4453_s3 + $0xc8] sm:$0xff] }
  0xf4   : > { %v1332_v7 = vpop.f32.mrf.mxu1  ;;  %v591_v60 = vmul.f32 %v423_v54, %v255_v53  ;;  %v429_v44 = vld [vmem:[%s4451_s1 + $0x208] sm:$0xff]  ;;  %v428_v53 = vld [vmem:[%s4451_s1 + $0x200] sm:$0xff] }
  0xf5   : > { %v2436_v10 = vadd.f32 %v2435_v56, %v2278_v5 }
  0xf6   : > { %v1598_v11 = vpop.f32.mrf.mxu2 }
  0xf7   : > { %v1868_v13 = vadd.f32 %v1867_v3, %v1598_v11  ;;  %2707 = vmatmul.msk.f32.gmra.mxu1 %vm756_vm1, %v585_v6  ;;  %2792 = vmatmul.msk.f32.gmra.mxu3 %vm756_vm1, %v585_v6  ;;  %v2118_v6 = vld [vmem:[%s4453_s3 + $0xd0] sm:$0xff] }
  0xf8   : > { %v1063_v15 = vpop.f32.mrf.mxu0 }
  0xf9   : > { %v2279_v19 = vmul.f32 %v2111_v12, %v1868_v13  ;;  %v1333_v20 = vadd.f32 %v1332_v7, %v1063_v15  ;;  %v257_v7 = vld [vmem:[%s3038_s29 + $0x1e8] sm:$0xff] }
  0xfa   : > { %v1870_v21 = vpop.f32.mrf.mxu3 }
  0xfb   : > { %v2527_v22 = vadd.f32 %v2526_v4, %v2279_v19  ;;  %v2280_v23 = vmul.f32 %v2112_v16, %v1333_v20  ;;  %1110 = vmatmul.f32.gmra.mxu0 %v584_v14  ;;  %1648 = vmatmul.f32.gmra.mxu2 %v584_v14  ;;  %v590_v4 = vmul.f32 %v422_v63, %v254_v62  ;;  %v256_v16 = vld [vmem:[%s3038_s29 + $0x1e0] sm:$0xff]  ;;  %v2119_v20 = vld [vmem:[%s4453_s3 + $0xd8] sm:$0xff] }
  0xfc   : > { %v1335_v25 = vpop.f32.mrf.mxu1  ;;  %v593_v14 = vmul.f32 %v425_v8, %v257_v7  ;;  %v431_v62 = vld [vmem:[%s4451_s1 + $0x218] sm:$0xff]  ;;  %v430_v7 = vld [vmem:[%s4451_s1 + $0x210] sm:$0xff] }
  0xfd   : > { %v2437_v28 = vadd.f32 %v2436_v10, %v2280_v23 }
  0xfe   : > { %v1601_v29 = vpop.f32.mrf.mxu2 }
  0xff   : > { %v1871_v31 = vadd.f32 %v1870_v21, %v1601_v29  ;;  %2708 = vmatmul.msk.f32.gmra.mxu1 %vm756_vm1, %v587_v24  ;;  %2793 = vmatmul.msk.f32.gmra.mxu3 %vm756_vm1, %v587_v24  ;;  %v2120_v24 = vld [vmem:[%s4453_s3 + $0xe0] sm:$0xff] }
 0x100   : > { %v1066_v33 = vpop.f32.mrf.mxu0 }
 0x101   : > { %v2281_v37 = vmul.f32 %v2113_v30, %v1871_v31  ;;  %v1336_v38 = vadd.f32 %v1335_v25, %v1066_v33  ;;  %v259_v25 = vld [vmem:[%s3038_s29 + $0x1f8] sm:$0xff] }
 0x102   : > { %v1873_v39 = vpop.f32.mrf.mxu3 }
 0x103   : > { %v2528_v40 = vadd.f32 %v2527_v22, %v2281_v37  ;;  %v2282_v41 = vmul.f32 %v2114_v34, %v1336_v38  ;;  %1113 = vmatmul.f32.gmra.mxu0 %v586_v32  ;;  %1651 = vmatmul.f32.gmra.mxu2 %v586_v32  ;;  %v592_v22 = vmul.f32 %v424_v17, %v256_v16  ;;  %v258_v34 = vld [vmem:[%s3038_s29 + $0x1f0] sm:$0xff]  ;;  %v2121_v38 = vld [vmem:[%s4453_s3 + $0xe8] sm:$0xff] }
 0x104   : > { %v1338_v43 = vpop.f32.mrf.mxu1  ;;  %v595_v32 = vmul.f32 %v427_v26, %v259_v25  ;;  %v433_v16 = vld [vmem:[%s4451_s1 + $0x228] sm:$0xff]  ;;  %v432_v25 = vld [vmem:[%s4451_s1 + $0x220] sm:$0xff] }
 0x105   : > { %v2438_v46 = vadd.f32 %v2437_v28, %v2282_v41 }
 0x106   : > { %v1604_v47 = vpop.f32.mrf.mxu2 }
 0x107   : > { %v1874_v49 = vadd.f32 %v1873_v39, %v1604_v47  ;;  %2709 = vmatmul.msk.f32.gmra.mxu1 %vm756_vm1, %v589_v42  ;;  %2794 = vmatmul.msk.f32.gmra.mxu3 %vm756_vm1, %v589_v42  ;;  %v2122_v42 = vld [vmem:[%s4453_s3 + $0xf0] sm:$0xff] }
 0x108   : > { %v1069_v51 = vpop.f32.mrf.mxu0 }
 0x109   : > { %v2283_v55 = vmul.f32 %v2115_v48, %v1874_v49  ;;  %v1339_v56 = vadd.f32 %v1338_v43, %v1069_v51  ;;  %v261_v43 = vld [vmem:[%s3038_s29 + $0x208] sm:$0xff] }
 0x10a   : > { %v1876_v57 = vpop.f32.mrf.mxu3 }
 0x10b   : > { %v2529_v58 = vadd.f32 %v2528_v40, %v2283_v55  ;;  %v2284_v59 = vmul.f32 %v2116_v52, %v1339_v56  ;;  %1116 = vmatmul.f32.gmra.mxu0 %v588_v50  ;;  %1654 = vmatmul.f32.gmra.mxu2 %v588_v50  ;;  %v594_v40 = vmul.f32 %v426_v35, %v258_v34  ;;  %v260_v52 = vld [vmem:[%s3038_s29 + $0x200] sm:$0xff]  ;;  %v2123_v56 = vld [vmem:[%s4453_s3 + $0xf8] sm:$0xff] }
 0x10c   : > { %v1341_v61 = vpop.f32.mrf.mxu1  ;;  %v597_v50 = vmul.f32 %v429_v44, %v261_v43  ;;  %v435_v34 = vld [vmem:[%s4451_s1 + $0x238] sm:$0xff]  ;;  %v434_v43 = vld [vmem:[%s4451_s1 + $0x230] sm:$0xff] }
 0x10d   : > { %v2439_v0 = vadd.f32 %v2438_v46, %v2284_v59 }
 0x10e   : > { %v1607_v1 = vpop.f32.mrf.mxu2 }
 0x10f   : > { %v1877_v3 = vadd.f32 %v1876_v57, %v1607_v1  ;;  %2710 = vmatmul.msk.f32.gmra.mxu1 %vm756_vm1, %v591_v60  ;;  %2795 = vmatmul.msk.f32.gmra.mxu3 %vm756_vm1, %v591_v60  ;;  %v2124_v60 = vld [vmem:[%s4453_s3 + $0x100] sm:$0xff] }
 0x110   : > { %v1072_v5 = vpop.f32.mrf.mxu0 }
 0x111   : > { %v2285_v9 = vmul.f32 %v2117_v2, %v1877_v3  ;;  %v1342_v10 = vadd.f32 %v1341_v61, %v1072_v5  ;;  %v263_v61 = vld [vmem:[%s3038_s29 + $0x218] sm:$0xff] }
 0x112   : > { %v1879_v11 = vpop.f32.mrf.mxu3 }
 0x113   : > { %v2530_v12 = vadd.f32 %v2529_v58, %v2285_v9  ;;  %v2286_v13 = vmul.f32 %v2118_v6, %v1342_v10  ;;  %1119 = vmatmul.f32.gmra.mxu0 %v590_v4  ;;  %1657 = vmatmul.f32.gmra.mxu2 %v590_v4  ;;  %v596_v58 = vmul.f32 %v428_v53, %v260_v52  ;;  %v262_v6 = vld [vmem:[%s3038_s29 + $0x210] sm:$0xff]  ;;  %v2125_v10 = vld [vmem:[%s4453_s3 + $0x108] sm:$0xff] }
 0x114   : > { %v1344_v15 = vpop.f32.mrf.mxu1  ;;  %v599_v4 = vmul.f32 %v431_v62, %v263_v61  ;;  %v437_v52 = vld [vmem:[%s4451_s1 + $0x248] sm:$0xff]  ;;  %v436_v61 = vld [vmem:[%s4451_s1 + $0x240] sm:$0xff] }
 0x115   : > { %v2440_v18 = vadd.f32 %v2439_v0, %v2286_v13 }
 0x116   : > { %v1610_v19 = vpop.f32.mrf.mxu2 }
 0x117   : > { %v1880_v21 = vadd.f32 %v1879_v11, %v1610_v19  ;;  %2711 = vmatmul.msk.f32.gmra.mxu1 %vm756_vm1, %v593_v14  ;;  %2796 = vmatmul.msk.f32.gmra.mxu3 %vm756_vm1, %v593_v14  ;;  %v2126_v14 = vld [vmem:[%s4453_s3 + $0x110] sm:$0xff] }
 0x118   : > { %v1075_v23 = vpop.f32.mrf.mxu0 }
 0x119   : > { %v2287_v27 = vmul.f32 %v2119_v20, %v1880_v21  ;;  %v1345_v28 = vadd.f32 %v1344_v15, %v1075_v23  ;;  %v265_v15 = vld [vmem:[%s3038_s29 + $0x228] sm:$0xff] }
 0x11a   : > { %v1882_v29 = vpop.f32.mrf.mxu3 }
 0x11b   : > { %v2531_v30 = vadd.f32 %v2530_v12, %v2287_v27  ;;  %v2288_v31 = vmul.f32 %v2120_v24, %v1345_v28  ;;  %1122 = vmatmul.f32.gmra.mxu0 %v592_v22  ;;  %1660 = vmatmul.f32.gmra.mxu2 %v592_v22  ;;  %v598_v12 = vmul.f32 %v430_v7, %v262_v6  ;;  %v264_v24 = vld [vmem:[%s3038_s29 + $0x220] sm:$0xff]  ;;  %v2127_v28 = vld [vmem:[%s4453_s3 + $0x118] sm:$0xff] }
 0x11c   : > { %v1347_v33 = vpop.f32.mrf.mxu1  ;;  %v601_v22 = vmul.f32 %v433_v16, %v265_v15  ;;  %v439_v6 = vld [vmem:[%s4451_s1 + $0x258] sm:$0xff]  ;;  %v438_v15 = vld [vmem:[%s4451_s1 + $0x250] sm:$0xff] }
 0x11d   : > { %v2441_v36 = vadd.f32 %v2440_v18, %v2288_v31 }
 0x11e   : > { %v1613_v37 = vpop.f32.mrf.mxu2 }
 0x11f   : > { %v1883_v39 = vadd.f32 %v1882_v29, %v1613_v37  ;;  %2712 = vmatmul.msk.f32.gmra.mxu1 %vm756_vm1, %v595_v32  ;;  %2797 = vmatmul.msk.f32.gmra.mxu3 %vm756_vm1, %v595_v32  ;;  %v2128_v32 = vld [vmem:[%s4453_s3 + $0x120] sm:$0xff] }
 0x120   : > { %v1078_v41 = vpop.f32.mrf.mxu0 }
 0x121   : > { %v2289_v45 = vmul.f32 %v2121_v38, %v1883_v39  ;;  %v1348_v46 = vadd.f32 %v1347_v33, %v1078_v41  ;;  %v267_v33 = vld [vmem:[%s3038_s29 + $0x238] sm:$0xff] }
 0x122   : > { %v1885_v47 = vpop.f32.mrf.mxu3 }
 0x123   : > { %v2532_v48 = vadd.f32 %v2531_v30, %v2289_v45  ;;  %v2290_v49 = vmul.f32 %v2122_v42, %v1348_v46  ;;  %1125 = vmatmul.f32.gmra.mxu0 %v594_v40  ;;  %1663 = vmatmul.f32.gmra.mxu2 %v594_v40  ;;  %v600_v30 = vmul.f32 %v432_v25, %v264_v24  ;;  %v266_v42 = vld [vmem:[%s3038_s29 + $0x230] sm:$0xff]  ;;  %v2129_v46 = vld [vmem:[%s4453_s3 + $0x128] sm:$0xff] }
 0x124   : > { %v1350_v51 = vpop.f32.mrf.mxu1  ;;  %v603_v40 = vmul.f32 %v435_v34, %v267_v33  ;;  %v441_v24 = vld [vmem:[%s4451_s1 + $0x268] sm:$0xff]  ;;  %v440_v33 = vld [vmem:[%s4451_s1 + $0x260] sm:$0xff] }
 0x125   : > { %v2442_v54 = vadd.f32 %v2441_v36, %v2290_v49 }
 0x126   : > { %v1616_v55 = vpop.f32.mrf.mxu2 }
 0x127   : > { %v1886_v57 = vadd.f32 %v1885_v47, %v1616_v55  ;;  %2713 = vmatmul.msk.f32.gmra.mxu1 %vm756_vm1, %v597_v50  ;;  %2798 = vmatmul.msk.f32.gmra.mxu3 %vm756_vm1, %v597_v50  ;;  %v2130_v50 = vld [vmem:[%s4453_s3 + $0x130] sm:$0xff] }
 0x128   : > { %v1081_v59 = vpop.f32.mrf.mxu0 }
 0x129   : > { %v2291_v63 = vmul.f32 %v2123_v56, %v1886_v57  ;;  %v1351_v0 = vadd.f32 %v1350_v51, %v1081_v59  ;;  %v269_v51 = vld [vmem:[%s3038_s29 + $0x248] sm:$0xff] }
 0x12a   : > { %v1888_v1 = vpop.f32.mrf.mxu3 }
 0x12b   : > { %v2533_v2 = vadd.f32 %v2532_v48, %v2291_v63  ;;  %v2292_v3 = vmul.f32 %v2124_v60, %v1351_v0  ;;  %1128 = vmatmul.f32.gmra.mxu0 %v596_v58  ;;  %1666 = vmatmul.f32.gmra.mxu2 %v596_v58  ;;  %v602_v48 = vmul.f32 %v434_v43, %v266_v42  ;;  %v268_v60 = vld [vmem:[%s3038_s29 + $0x240] sm:$0xff]  ;;  %v2131_v0 = vld [vmem:[%s4453_s3 + $0x138] sm:$0xff] }
 0x12c   : > { %v1353_v5 = vpop.f32.mrf.mxu1  ;;  %v605_v58 = vmul.f32 %v437_v52, %v269_v51  ;;  %v443_v42 = vld [vmem:[%s4451_s1 + $0x278] sm:$0xff]  ;;  %v442_v51 = vld [vmem:[%s4451_s1 + $0x270] sm:$0xff] }
 0x12d   : > { %v2443_v8 = vadd.f32 %v2442_v54, %v2292_v3 }
 0x12e   : > { %v1619_v9 = vpop.f32.mrf.mxu2 }
 0x12f   : > { %v1889_v11 = vadd.f32 %v1888_v1, %v1619_v9  ;;  %2714 = vmatmul.msk.f32.gmra.mxu1 %vm756_vm1, %v599_v4  ;;  %2799 = vmatmul.msk.f32.gmra.mxu3 %vm756_vm1, %v599_v4  ;;  %v2132_v4 = vld [vmem:[%s4453_s3 + $0x140] sm:$0xff] }
 0x130   : > { %v1084_v13 = vpop.f32.mrf.mxu0 }
 0x131   : > { %v2293_v17 = vmul.f32 %v2125_v10, %v1889_v11  ;;  %v1354_v18 = vadd.f32 %v1353_v5, %v1084_v13  ;;  %v271_v5 = vld [vmem:[%s3038_s29 + $0x258] sm:$0xff] }
 0x132   : > { %v1891_v19 = vpop.f32.mrf.mxu3 }
 0x133   : > { %v2534_v20 = vadd.f32 %v2533_v2, %v2293_v17  ;;  %v2294_v21 = vmul.f32 %v2126_v14, %v1354_v18  ;;  %1131 = vmatmul.f32.gmra.mxu0 %v598_v12  ;;  %1669 = vmatmul.f32.gmra.mxu2 %v598_v12  ;;  %v604_v2 = vmul.f32 %v436_v61, %v268_v60  ;;  %v270_v14 = vld [vmem:[%s3038_s29 + $0x250] sm:$0xff]  ;;  %v2133_v18 = vld [vmem:[%s4453_s3 + $0x148] sm:$0xff] }
 0x134   : > { %v1356_v23 = vpop.f32.mrf.mxu1  ;;  %v607_v12 = vmul.f32 %v439_v6, %v271_v5  ;;  %v445_v60 = vld [vmem:[%s4451_s1 + $0x288] sm:$0xff]  ;;  %v444_v5 = vld [vmem:[%s4451_s1 + $0x280] sm:$0xff] }
 0x135   : > { %v2444_v26 = vadd.f32 %v2443_v8, %v2294_v21 }
 0x136   : > { %v1622_v27 = vpop.f32.mrf.mxu2 }
 0x137   : > { %v1892_v29 = vadd.f32 %v1891_v19, %v1622_v27  ;;  %2715 = vmatmul.msk.f32.gmra.mxu1 %vm756_vm1, %v601_v22  ;;  %2800 = vmatmul.msk.f32.gmra.mxu3 %vm756_vm1, %v601_v22  ;;  %v2134_v22 = vld [vmem:[%s4453_s3 + $0x150] sm:$0xff] }
 0x138   : > { %v1087_v31 = vpop.f32.mrf.mxu0 }
 0x139   : > { %v2295_v35 = vmul.f32 %v2127_v28, %v1892_v29  ;;  %v1357_v36 = vadd.f32 %v1356_v23, %v1087_v31  ;;  %v273_v23 = vld [vmem:[%s3038_s29 + $0x268] sm:$0xff] }
 0x13a   : > { %v1894_v37 = vpop.f32.mrf.mxu3 }
 0x13b   : > { %v2535_v38 = vadd.f32 %v2534_v20, %v2295_v35  ;;  %v2296_v39 = vmul.f32 %v2128_v32, %v1357_v36  ;;  %1134 = vmatmul.f32.gmra.mxu0 %v600_v30  ;;  %1672 = vmatmul.f32.gmra.mxu2 %v600_v30  ;;  %v606_v20 = vmul.f32 %v438_v15, %v270_v14  ;;  %v272_v32 = vld [vmem:[%s3038_s29 + $0x260] sm:$0xff]  ;;  %v2135_v36 = vld [vmem:[%s4453_s3 + $0x158] sm:$0xff] }
 0x13c   : > { %v1359_v41 = vpop.f32.mrf.mxu1  ;;  %v609_v30 = vmul.f32 %v441_v24, %v273_v23  ;;  %v447_v14 = vld [vmem:[%s4451_s1 + $0x298] sm:$0xff]  ;;  %v446_v23 = vld [vmem:[%s4451_s1 + $0x290] sm:$0xff] }
 0x13d   : > { %v2445_v44 = vadd.f32 %v2444_v26, %v2296_v39 }
 0x13e   : > { %v1625_v45 = vpop.f32.mrf.mxu2 }
 0x13f   : > { %v1895_v47 = vadd.f32 %v1894_v37, %v1625_v45  ;;  %2716 = vmatmul.msk.f32.gmra.mxu1 %vm756_vm1, %v603_v40  ;;  %2801 = vmatmul.msk.f32.gmra.mxu3 %vm756_vm1, %v603_v40  ;;  %v2136_v40 = vld [vmem:[%s4453_s3 + $0x160] sm:$0xff] }
 0x140   : > { %v1090_v49 = vpop.f32.mrf.mxu0 }
 0x141   : > { %v2297_v53 = vmul.f32 %v2129_v46, %v1895_v47  ;;  %v1360_v54 = vadd.f32 %v1359_v41, %v1090_v49  ;;  %v275_v41 = vld [vmem:[%s3038_s29 + $0x278] sm:$0xff] }
 0x142   : > { %v1897_v55 = vpop.f32.mrf.mxu3 }
 0x143   : > { %v2536_v56 = vadd.f32 %v2535_v38, %v2297_v53  ;;  %v2298_v57 = vmul.f32 %v2130_v50, %v1360_v54  ;;  %1137 = vmatmul.f32.gmra.mxu0 %v602_v48  ;;  %1675 = vmatmul.f32.gmra.mxu2 %v602_v48  ;;  %v608_v38 = vmul.f32 %v440_v33, %v272_v32  ;;  %v274_v50 = vld [vmem:[%s3038_s29 + $0x270] sm:$0xff]  ;;  %v2137_v54 = vld [vmem:[%s4453_s3 + $0x168] sm:$0xff] }
 0x144   : > { %v1362_v59 = vpop.f32.mrf.mxu1  ;;  %v611_v48 = vmul.f32 %v443_v42, %v275_v41  ;;  %v449_v32 = vld [vmem:[%s4451_s1 + $0x2a8] sm:$0xff]  ;;  %v448_v41 = vld [vmem:[%s4451_s1 + $0x2a0] sm:$0xff] }
 0x145   : > { %v2446_v62 = vadd.f32 %v2445_v44, %v2298_v57 }
 0x146   : > { %v1628_v63 = vpop.f32.mrf.mxu2 }
 0x147   : > { %v1898_v1 = vadd.f32 %v1897_v55, %v1628_v63  ;;  %2717 = vmatmul.msk.f32.gmra.mxu1 %vm756_vm1, %v605_v58  ;;  %2802 = vmatmul.msk.f32.gmra.mxu3 %vm756_vm1, %v605_v58  ;;  %v2138_v58 = vld [vmem:[%s4453_s3 + $0x170] sm:$0xff] }
 0x148   : > { %v1093_v3 = vpop.f32.mrf.mxu0 }
 0x149   : > { %v2299_v7 = vmul.f32 %v2131_v0, %v1898_v1  ;;  %v1363_v8 = vadd.f32 %v1362_v59, %v1093_v3  ;;  %v277_v59 = vld [vmem:[%s3038_s29 + $0x288] sm:$0xff] }
 0x14a   : > { %v1900_v9 = vpop.f32.mrf.mxu3 }
 0x14b   : > { %v2537_v10 = vadd.f32 %v2536_v56, %v2299_v7  ;;  %v2300_v11 = vmul.f32 %v2132_v4, %v1363_v8  ;;  %1140 = vmatmul.f32.gmra.mxu0 %v604_v2  ;;  %1678 = vmatmul.f32.gmra.mxu2 %v604_v2  ;;  %v610_v56 = vmul.f32 %v442_v51, %v274_v50  ;;  %v276_v4 = vld [vmem:[%s3038_s29 + $0x280] sm:$0xff]  ;;  %v2139_v8 = vld [vmem:[%s4453_s3 + $0x178] sm:$0xff] }
 0x14c   : > { %v1365_v13 = vpop.f32.mrf.mxu1  ;;  %v613_v2 = vmul.f32 %v445_v60, %v277_v59  ;;  %v451_v50 = vld [vmem:[%s4451_s1 + $0x2b8] sm:$0xff]  ;;  %v450_v59 = vld [vmem:[%s4451_s1 + $0x2b0] sm:$0xff] }
 0x14d   : > { %v2447_v16 = vadd.f32 %v2446_v62, %v2300_v11 }
 0x14e   : > { %v1631_v17 = vpop.f32.mrf.mxu2 }
 0x14f   : > { %v1901_v19 = vadd.f32 %v1900_v9, %v1631_v17  ;;  %2718 = vmatmul.msk.f32.gmra.mxu1 %vm756_vm1, %v607_v12  ;;  %2803 = vmatmul.msk.f32.gmra.mxu3 %vm756_vm1, %v607_v12  ;;  %v2140_v12 = vld [vmem:[%s4453_s3 + $0x180] sm:$0xff] }
 0x150   : > { %v1096_v21 = vpop.f32.mrf.mxu0 }
 0x151   : > { %v2301_v25 = vmul.f32 %v2133_v18, %v1901_v19  ;;  %v1366_v26 = vadd.f32 %v1365_v13, %v1096_v21  ;;  %v279_v13 = vld [vmem:[%s3038_s29 + $0x298] sm:$0xff] }
 0x152   : > { %v1903_v27 = vpop.f32.mrf.mxu3 }
 0x153   : > { %v2538_v28 = vadd.f32 %v2537_v10, %v2301_v25  ;;  %v2302_v29 = vmul.f32 %v2134_v22, %v1366_v26  ;;  %1143 = vmatmul.f32.gmra.mxu0 %v606_v20  ;;  %1681 = vmatmul.f32.gmra.mxu2 %v606_v20  ;;  %v612_v10 = vmul.f32 %v444_v5, %v276_v4  ;;  %v278_v22 = vld [vmem:[%s3038_s29 + $0x290] sm:$0xff]  ;;  %v2141_v26 = vld [vmem:[%s4453_s3 + $0x188] sm:$0xff] }
 0x154   : > { %v1368_v31 = vpop.f32.mrf.mxu1  ;;  %v615_v20 = vmul.f32 %v447_v14, %v279_v13  ;;  %v453_v4 = vld [vmem:[%s4451_s1 + $0x2c8] sm:$0xff]  ;;  %v452_v13 = vld [vmem:[%s4451_s1 + $0x2c0] sm:$0xff] }
 0x155   : > { %v2448_v34 = vadd.f32 %v2447_v16, %v2302_v29 }
 0x156   : > { %v1634_v35 = vpop.f32.mrf.mxu2 }
 0x157   : > { %v1904_v37 = vadd.f32 %v1903_v27, %v1634_v35  ;;  %2719 = vmatmul.msk.f32.gmra.mxu1 %vm756_vm1, %v609_v30  ;;  %2804 = vmatmul.msk.f32.gmra.mxu3 %vm756_vm1, %v609_v30  ;;  %v2142_v30 = vld [vmem:[%s4453_s3 + $0x190] sm:$0xff] }
 0x158   : > { %v1099_v39 = vpop.f32.mrf.mxu0 }
 0x159   : > { %v2303_v43 = vmul.f32 %v2135_v36, %v1904_v37  ;;  %v1369_v44 = vadd.f32 %v1368_v31, %v1099_v39  ;;  %v281_v31 = vld [vmem:[%s3038_s29 + $0x2a8] sm:$0xff] }
 0x15a   : > { %v1906_v45 = vpop.f32.mrf.mxu3 }
 0x15b   : > { %v2539_v46 = vadd.f32 %v2538_v28, %v2303_v43  ;;  %v2304_v47 = vmul.f32 %v2136_v40, %v1369_v44  ;;  %1146 = vmatmul.f32.gmra.mxu0 %v608_v38  ;;  %1684 = vmatmul.f32.gmra.mxu2 %v608_v38  ;;  %v614_v28 = vmul.f32 %v446_v23, %v278_v22  ;;  %v280_v40 = vld [vmem:[%s3038_s29 + $0x2a0] sm:$0xff]  ;;  %v2143_v44 = vld [vmem:[%s4453_s3 + $0x198] sm:$0xff] }
 0x15c   : > { %v1371_v49 = vpop.f32.mrf.mxu1  ;;  %v617_v38 = vmul.f32 %v449_v32, %v281_v31  ;;  %v455_v22 = vld [vmem:[%s4451_s1 + $0x2d8] sm:$0xff]  ;;  %v454_v31 = vld [vmem:[%s4451_s1 + $0x2d0] sm:$0xff] }
 0x15d   : > { %v2449_v52 = vadd.f32 %v2448_v34, %v2304_v47 }
 0x15e   : > { %v1637_v53 = vpop.f32.mrf.mxu2 }
 0x15f   : > { %v1907_v55 = vadd.f32 %v1906_v45, %v1637_v53  ;;  %2720 = vmatmul.msk.f32.gmra.mxu1 %vm756_vm1, %v611_v48  ;;  %2805 = vmatmul.msk.f32.gmra.mxu3 %vm756_vm1, %v611_v48  ;;  %v2144_v48 = vld [vmem:[%s4453_s3 + $0x1a0] sm:$0xff] }
 0x160   : > { %v1102_v57 = vpop.f32.mrf.mxu0 }
 0x161   : > { %v2305_v61 = vmul.f32 %v2137_v54, %v1907_v55  ;;  %v1372_v62 = vadd.f32 %v1371_v49, %v1102_v57  ;;  %v283_v49 = vld [vmem:[%s3038_s29 + $0x2b8] sm:$0xff] }
 0x162   : > { %v1909_v63 = vpop.f32.mrf.mxu3 }
 0x163   : > { %v2540_v0 = vadd.f32 %v2539_v46, %v2305_v61  ;;  %v2306_v1 = vmul.f32 %v2138_v58, %v1372_v62  ;;  %1149 = vmatmul.f32.gmra.mxu0 %v610_v56  ;;  %1687 = vmatmul.f32.gmra.mxu2 %v610_v56  ;;  %v616_v46 = vmul.f32 %v448_v41, %v280_v40  ;;  %v282_v58 = vld [vmem:[%s3038_s29 + $0x2b0] sm:$0xff]  ;;  %v2145_v62 = vld [vmem:[%s4453_s3 + $0x1a8] sm:$0xff] }
 0x164   : > { %v1374_v3 = vpop.f32.mrf.mxu1  ;;  %v619_v56 = vmul.f32 %v451_v50, %v283_v49  ;;  %v457_v40 = vld [vmem:[%s4451_s1 + $0x2e8] sm:$0xff]  ;;  %v456_v49 = vld [vmem:[%s4451_s1 + $0x2e0] sm:$0xff] }
 0x165   : > { %v2450_v6 = vadd.f32 %v2449_v52, %v2306_v1 }
 0x166   : > { %v1640_v7 = vpop.f32.mrf.mxu2 }
 0x167   : > { %v1910_v9 = vadd.f32 %v1909_v63, %v1640_v7  ;;  %2721 = vmatmul.msk.f32.gmra.mxu1 %vm756_vm1, %v613_v2  ;;  %2806 = vmatmul.msk.f32.gmra.mxu3 %vm756_vm1, %v613_v2  ;;  %v2146_v2 = vld [vmem:[%s4453_s3 + $0x1b0] sm:$0xff] }
 0x168   : > { %v1105_v11 = vpop.f32.mrf.mxu0 }
 0x169   : > { %v2307_v15 = vmul.f32 %v2139_v8, %v1910_v9  ;;  %v1375_v16 = vadd.f32 %v1374_v3, %v1105_v11  ;;  %v285_v3 = vld [vmem:[%s3038_s29 + $0x2c8] sm:$0xff] }
 0x16a   : > { %v1912_v17 = vpop.f32.mrf.mxu3 }
 0x16b   : > { %v2541_v18 = vadd.f32 %v2540_v0, %v2307_v15  ;;  %v2308_v19 = vmul.f32 %v2140_v12, %v1375_v16  ;;  %1152 = vmatmul.f32.gmra.mxu0 %v612_v10  ;;  %1690 = vmatmul.f32.gmra.mxu2 %v612_v10  ;;  %v618_v0 = vmul.f32 %v450_v59, %v282_v58  ;;  %v284_v12 = vld [vmem:[%s3038_s29 + $0x2c0] sm:$0xff]  ;;  %v2147_v16 = vld [vmem:[%s4453_s3 + $0x1b8] sm:$0xff] }
 0x16c   : > { %v1377_v21 = vpop.f32.mrf.mxu1  ;;  %v621_v10 = vmul.f32 %v453_v4, %v285_v3  ;;  %v459_v58 = vld [vmem:[%s4451_s1 + $0x2f8] sm:$0xff]  ;;  %v458_v3 = vld [vmem:[%s4451_s1 + $0x2f0] sm:$0xff] }
 0x16d   : > { %v2451_v24 = vadd.f32 %v2450_v6, %v2308_v19 }
 0x16e   : > { %v1643_v25 = vpop.f32.mrf.mxu2 }
 0x16f   : > { %v1913_v27 = vadd.f32 %v1912_v17, %v1643_v25  ;;  %2722 = vmatmul.msk.f32.gmra.mxu1 %vm756_vm1, %v615_v20  ;;  %2807 = vmatmul.msk.f32.gmra.mxu3 %vm756_vm1, %v615_v20  ;;  %v2148_v20 = vld [vmem:[%s4453_s3 + $0x1c0] sm:$0xff] }
 0x170   : > { %v1108_v29 = vpop.f32.mrf.mxu0 }
 0x171   : > { %v2309_v33 = vmul.f32 %v2141_v26, %v1913_v27  ;;  %v1378_v34 = vadd.f32 %v1377_v21, %v1108_v29  ;;  %v287_v21 = vld [vmem:[%s3038_s29 + $0x2d8] sm:$0xff] }
 0x172   : > { %v1915_v35 = vpop.f32.mrf.mxu3 }
 0x173   : > { %v2542_v36 = vadd.f32 %v2541_v18, %v2309_v33  ;;  %v2310_v37 = vmul.f32 %v2142_v30, %v1378_v34  ;;  %1155 = vmatmul.f32.gmra.mxu0 %v614_v28  ;;  %1693 = vmatmul.f32.gmra.mxu2 %v614_v28  ;;  %v620_v18 = vmul.f32 %v452_v13, %v284_v12  ;;  %v286_v30 = vld [vmem:[%s3038_s29 + $0x2d0] sm:$0xff]  ;;  %v2149_v34 = vld [vmem:[%s4453_s3 + $0x1c8] sm:$0xff] }
 0x174   : > { %v1380_v39 = vpop.f32.mrf.mxu1  ;;  %v623_v28 = vmul.f32 %v455_v22, %v287_v21  ;;  %v461_v12 = vld [vmem:[%s4451_s1 + $0x308] sm:$0xff]  ;;  %v460_v21 = vld [vmem:[%s4451_s1 + $0x300] sm:$0xff] }
 0x175   : > { %v2452_v42 = vadd.f32 %v2451_v24, %v2310_v37 }
 0x176   : > { %v1646_v43 = vpop.f32.mrf.mxu2 }
 0x177   : > { %v1916_v45 = vadd.f32 %v1915_v35, %v1646_v43  ;;  %2723 = vmatmul.msk.f32.gmra.mxu1 %vm756_vm1, %v617_v38  ;;  %2808 = vmatmul.msk.f32.gmra.mxu3 %vm756_vm1, %v617_v38  ;;  %v2150_v38 = vld [vmem:[%s4453_s3 + $0x1d0] sm:$0xff] }
 0x178   : > { %v1111_v47 = vpop.f32.mrf.mxu0 }
 0x179   : > { %v2311_v51 = vmul.f32 %v2143_v44, %v1916_v45  ;;  %v1381_v52 = vadd.f32 %v1380_v39, %v1111_v47  ;;  %v289_v39 = vld [vmem:[%s3038_s29 + $0x2e8] sm:$0xff] }
 0x17a   : > { %v1918_v53 = vpop.f32.mrf.mxu3 }
 0x17b   : > { %v2543_v54 = vadd.f32 %v2542_v36, %v2311_v51  ;;  %v2312_v55 = vmul.f32 %v2144_v48, %v1381_v52  ;;  %1158 = vmatmul.f32.gmra.mxu0 %v616_v46  ;;  %1696 = vmatmul.f32.gmra.mxu2 %v616_v46  ;;  %v622_v36 = vmul.f32 %v454_v31, %v286_v30  ;;  %v288_v48 = vld [vmem:[%s3038_s29 + $0x2e0] sm:$0xff]  ;;  %v2151_v52 = vld [vmem:[%s4453_s3 + $0x1d8] sm:$0xff] }
 0x17c   : > { %v1383_v57 = vpop.f32.mrf.mxu1  ;;  %v625_v46 = vmul.f32 %v457_v40, %v289_v39  ;;  %v463_v30 = vld [vmem:[%s4451_s1 + $0x318] sm:$0xff]  ;;  %v462_v39 = vld [vmem:[%s4451_s1 + $0x310] sm:$0xff] }
 0x17d   : > { %v2453_v60 = vadd.f32 %v2452_v42, %v2312_v55 }
 0x17e   : > { %v1649_v61 = vpop.f32.mrf.mxu2 }
 0x17f   : > { %v1919_v63 = vadd.f32 %v1918_v53, %v1649_v61  ;;  %2724 = vmatmul.msk.f32.gmra.mxu1 %vm756_vm1, %v619_v56  ;;  %2809 = vmatmul.msk.f32.gmra.mxu3 %vm756_vm1, %v619_v56  ;;  %v2152_v56 = vld [vmem:[%s4453_s3 + $0x1e0] sm:$0xff] }
 0x180   : > { %v1114_v1 = vpop.f32.mrf.mxu0 }
 0x181   : > { %v2313_v5 = vmul.f32 %v2145_v62, %v1919_v63  ;;  %v1384_v6 = vadd.f32 %v1383_v57, %v1114_v1  ;;  %v291_v57 = vld [vmem:[%s3038_s29 + $0x2f8] sm:$0xff] }
 0x182   : > { %v1921_v7 = vpop.f32.mrf.mxu3 }
 0x183   : > { %v2544_v8 = vadd.f32 %v2543_v54, %v2313_v5  ;;  %v2314_v9 = vmul.f32 %v2146_v2, %v1384_v6  ;;  %1161 = vmatmul.f32.gmra.mxu0 %v618_v0  ;;  %1699 = vmatmul.f32.gmra.mxu2 %v618_v0  ;;  %v624_v54 = vmul.f32 %v456_v49, %v288_v48  ;;  %v290_v2 = vld [vmem:[%s3038_s29 + $0x2f0] sm:$0xff]  ;;  %v2153_v6 = vld [vmem:[%s4453_s3 + $0x1e8] sm:$0xff] }
 0x184   : > { %v1386_v11 = vpop.f32.mrf.mxu1  ;;  %v627_v0 = vmul.f32 %v459_v58, %v291_v57  ;;  %v465_v48 = vld [vmem:[%s4451_s1 + $0x328] sm:$0xff]  ;;  %v464_v57 = vld [vmem:[%s4451_s1 + $0x320] sm:$0xff] }
 0x185   : > { %v2454_v14 = vadd.f32 %v2453_v60, %v2314_v9 }
 0x186   : > { %v1652_v15 = vpop.f32.mrf.mxu2 }
 0x187   : > { %v1922_v17 = vadd.f32 %v1921_v7, %v1652_v15  ;;  %2725 = vmatmul.msk.f32.gmra.mxu1 %vm756_vm1, %v621_v10  ;;  %2810 = vmatmul.msk.f32.gmra.mxu3 %vm756_vm1, %v621_v10  ;;  %v2154_v10 = vld [vmem:[%s4453_s3 + $0x1f0] sm:$0xff] }
 0x188   : > { %v1117_v19 = vpop.f32.mrf.mxu0 }
 0x189   : > { %v2315_v23 = vmul.f32 %v2147_v16, %v1922_v17  ;;  %v1387_v24 = vadd.f32 %v1386_v11, %v1117_v19  ;;  %v293_v11 = vld [vmem:[%s3038_s29 + $0x308] sm:$0xff] }
 0x18a   : > { %v1924_v25 = vpop.f32.mrf.mxu3 }
 0x18b   : > { %v2545_v26 = vadd.f32 %v2544_v8, %v2315_v23  ;;  %v2316_v27 = vmul.f32 %v2148_v20, %v1387_v24  ;;  %1164 = vmatmul.f32.gmra.mxu0 %v620_v18  ;;  %1702 = vmatmul.f32.gmra.mxu2 %v620_v18  ;;  %v626_v8 = vmul.f32 %v458_v3, %v290_v2  ;;  %v292_v20 = vld [vmem:[%s3038_s29 + $0x300] sm:$0xff]  ;;  %v2155_v24 = vld [vmem:[%s4453_s3 + $0x1f8] sm:$0xff] }
 0x18c   : > { %v1389_v29 = vpop.f32.mrf.mxu1  ;;  %v629_v18 = vmul.f32 %v461_v12, %v293_v11  ;;  %v467_v2 = vld [vmem:[%s4451_s1 + $0x338] sm:$0xff]  ;;  %v466_v11 = vld [vmem:[%s4451_s1 + $0x330] sm:$0xff] }
 0x18d   : > { %v2455_v32 = vadd.f32 %v2454_v14, %v2316_v27 }
 0x18e   : > { %v1655_v33 = vpop.f32.mrf.mxu2 }
 0x18f   : > { %v1925_v35 = vadd.f32 %v1924_v25, %v1655_v33  ;;  %2726 = vmatmul.msk.f32.gmra.mxu1 %vm756_vm1, %v623_v28  ;;  %2811 = vmatmul.msk.f32.gmra.mxu3 %vm756_vm1, %v623_v28  ;;  %v2156_v28 = vld [vmem:[%s4453_s3 + $0x200] sm:$0xff] }
 0x190   : > { %v1120_v37 = vpop.f32.mrf.mxu0 }
 0x191   : > { %v2317_v41 = vmul.f32 %v2149_v34, %v1925_v35  ;;  %v1390_v42 = vadd.f32 %v1389_v29, %v1120_v37  ;;  %v295_v29 = vld [vmem:[%s3038_s29 + $0x318] sm:$0xff] }
 0x192   : > { %v1927_v43 = vpop.f32.mrf.mxu3 }
 0x193   : > { %v2546_v44 = vadd.f32 %v2545_v26, %v2317_v41  ;;  %v2318_v45 = vmul.f32 %v2150_v38, %v1390_v42  ;;  %1167 = vmatmul.f32.gmra.mxu0 %v622_v36  ;;  %1705 = vmatmul.f32.gmra.mxu2 %v622_v36  ;;  %v628_v26 = vmul.f32 %v460_v21, %v292_v20  ;;  %v294_v38 = vld [vmem:[%s3038_s29 + $0x310] sm:$0xff]  ;;  %v2157_v42 = vld [vmem:[%s4453_s3 + $0x208] sm:$0xff] }
 0x194   : > { %v1392_v47 = vpop.f32.mrf.mxu1  ;;  %v631_v36 = vmul.f32 %v463_v30, %v295_v29  ;;  %v469_v20 = vld [vmem:[%s4451_s1 + $0x348] sm:$0xff]  ;;  %v468_v29 = vld [vmem:[%s4451_s1 + $0x340] sm:$0xff] }
 0x195   : > { %v2456_v50 = vadd.f32 %v2455_v32, %v2318_v45 }
 0x196   : > { %v1658_v51 = vpop.f32.mrf.mxu2 }
 0x197   : > { %v1928_v53 = vadd.f32 %v1927_v43, %v1658_v51  ;;  %2727 = vmatmul.msk.f32.gmra.mxu1 %vm756_vm1, %v625_v46  ;;  %2812 = vmatmul.msk.f32.gmra.mxu3 %vm756_vm1, %v625_v46  ;;  %v2158_v46 = vld [vmem:[%s4453_s3 + $0x210] sm:$0xff] }
 0x198   : > { %v1123_v55 = vpop.f32.mrf.mxu0 }
 0x199   : > { %v2319_v59 = vmul.f32 %v2151_v52, %v1928_v53  ;;  %v1393_v60 = vadd.f32 %v1392_v47, %v1123_v55  ;;  %v297_v47 = vld [vmem:[%s3038_s29 + $0x328] sm:$0xff] }
 0x19a   : > { %v1930_v61 = vpop.f32.mrf.mxu3 }
 0x19b   : > { %v2547_v62 = vadd.f32 %v2546_v44, %v2319_v59  ;;  %v2320_v63 = vmul.f32 %v2152_v56, %v1393_v60  ;;  %1170 = vmatmul.f32.gmra.mxu0 %v624_v54  ;;  %1708 = vmatmul.f32.gmra.mxu2 %v624_v54  ;;  %v630_v44 = vmul.f32 %v462_v39, %v294_v38  ;;  %v296_v56 = vld [vmem:[%s3038_s29 + $0x320] sm:$0xff]  ;;  %v2159_v60 = vld [vmem:[%s4453_s3 + $0x218] sm:$0xff] }
 0x19c   : > { %v1395_v1 = vpop.f32.mrf.mxu1  ;;  %v633_v54 = vmul.f32 %v465_v48, %v297_v47  ;;  %v471_v38 = vld [vmem:[%s4451_s1 + $0x358] sm:$0xff]  ;;  %v470_v47 = vld [vmem:[%s4451_s1 + $0x350] sm:$0xff] }
 0x19d   : > { %v2457_v4 = vadd.f32 %v2456_v50, %v2320_v63 }
 0x19e   : > { %v1661_v5 = vpop.f32.mrf.mxu2 }
 0x19f   : > { %v1931_v7 = vadd.f32 %v1930_v61, %v1661_v5  ;;  %2728 = vmatmul.msk.f32.gmra.mxu1 %vm756_vm1, %v627_v0  ;;  %2813 = vmatmul.msk.f32.gmra.mxu3 %vm756_vm1, %v627_v0  ;;  %v2160_v0 = vld [vmem:[%s4453_s3 + $0x220] sm:$0xff] }
 0x1a0   : > { %v1126_v9 = vpop.f32.mrf.mxu0 }
 0x1a1   : > { %v2321_v13 = vmul.f32 %v2153_v6, %v1931_v7  ;;  %v1396_v14 = vadd.f32 %v1395_v1, %v1126_v9  ;;  %v299_v1 = vld [vmem:[%s3038_s29 + $0x338] sm:$0xff] }
 0x1a2   : > { %v1933_v15 = vpop.f32.mrf.mxu3 }
 0x1a3   : > { %v2548_v16 = vadd.f32 %v2547_v62, %v2321_v13  ;;  %v2322_v17 = vmul.f32 %v2154_v10, %v1396_v14  ;;  %1173 = vmatmul.f32.gmra.mxu0 %v626_v8  ;;  %1711 = vmatmul.f32.gmra.mxu2 %v626_v8  ;;  %v632_v62 = vmul.f32 %v464_v57, %v296_v56  ;;  %v298_v10 = vld [vmem:[%s3038_s29 + $0x330] sm:$0xff]  ;;  %v2161_v14 = vld [vmem:[%s4453_s3 + $0x228] sm:$0xff] }
 0x1a4   : > { %v1398_v19 = vpop.f32.mrf.mxu1  ;;  %v635_v8 = vmul.f32 %v467_v2, %v299_v1  ;;  %v473_v56 = vld [vmem:[%s4451_s1 + $0x368] sm:$0xff]  ;;  %v472_v1 = vld [vmem:[%s4451_s1 + $0x360] sm:$0xff] }
 0x1a5   : > { %v2458_v22 = vadd.f32 %v2457_v4, %v2322_v17 }
 0x1a6   : > { %v1664_v23 = vpop.f32.mrf.mxu2 }
 0x1a7   : > { %v1934_v25 = vadd.f32 %v1933_v15, %v1664_v23  ;;  %2729 = vmatmul.msk.f32.gmra.mxu1 %vm756_vm1, %v629_v18  ;;  %2814 = vmatmul.msk.f32.gmra.mxu3 %vm756_vm1, %v629_v18  ;;  %v2162_v18 = vld [vmem:[%s4453_s3 + $0x230] sm:$0xff] }
 0x1a8   : > { %v1129_v27 = vpop.f32.mrf.mxu0 }
 0x1a9   : > { %v2323_v31 = vmul.f32 %v2155_v24, %v1934_v25  ;;  %v1399_v32 = vadd.f32 %v1398_v19, %v1129_v27  ;;  %v301_v19 = vld [vmem:[%s3038_s29 + $0x348] sm:$0xff] }
 0x1aa   : > { %v1936_v33 = vpop.f32.mrf.mxu3 }
 0x1ab   : > { %v2549_v34 = vadd.f32 %v2548_v16, %v2323_v31  ;;  %v2324_v35 = vmul.f32 %v2156_v28, %v1399_v32  ;;  %1176 = vmatmul.f32.gmra.mxu0 %v628_v26  ;;  %1714 = vmatmul.f32.gmra.mxu2 %v628_v26  ;;  %v634_v16 = vmul.f32 %v466_v11, %v298_v10  ;;  %v300_v28 = vld [vmem:[%s3038_s29 + $0x340] sm:$0xff]  ;;  %v2163_v32 = vld [vmem:[%s4453_s3 + $0x238] sm:$0xff] }
 0x1ac   : > { %v1401_v37 = vpop.f32.mrf.mxu1  ;;  %v637_v26 = vmul.f32 %v469_v20, %v301_v19  ;;  %v475_v10 = vld [vmem:[%s4451_s1 + $0x378] sm:$0xff]  ;;  %v474_v19 = vld [vmem:[%s4451_s1 + $0x370] sm:$0xff] }
 0x1ad   : > { %v2459_v40 = vadd.f32 %v2458_v22, %v2324_v35 }
 0x1ae   : > { %v1667_v41 = vpop.f32.mrf.mxu2 }
 0x1af   : > { %v1937_v43 = vadd.f32 %v1936_v33, %v1667_v41  ;;  %2730 = vmatmul.msk.f32.gmra.mxu1 %vm756_vm1, %v631_v36  ;;  %2815 = vmatmul.msk.f32.gmra.mxu3 %vm756_vm1, %v631_v36  ;;  %v2164_v36 = vld [vmem:[%s4453_s3 + $0x240] sm:$0xff] }
 0x1b0   : > { %v1132_v45 = vpop.f32.mrf.mxu0 }
 0x1b1   : > { %v2325_v49 = vmul.f32 %v2157_v42, %v1937_v43  ;;  %v1402_v50 = vadd.f32 %v1401_v37, %v1132_v45  ;;  %v303_v37 = vld [vmem:[%s3038_s29 + $0x358] sm:$0xff] }
 0x1b2   : > { %v1939_v51 = vpop.f32.mrf.mxu3 }
 0x1b3   : > { %v2550_v52 = vadd.f32 %v2549_v34, %v2325_v49  ;;  %v2326_v53 = vmul.f32 %v2158_v46, %v1402_v50  ;;  %1179 = vmatmul.f32.gmra.mxu0 %v630_v44  ;;  %1717 = vmatmul.f32.gmra.mxu2 %v630_v44  ;;  %v636_v34 = vmul.f32 %v468_v29, %v300_v28  ;;  %v302_v46 = vld [vmem:[%s3038_s29 + $0x350] sm:$0xff]  ;;  %v2165_v50 = vld [vmem:[%s4453_s3 + $0x248] sm:$0xff] }
 0x1b4   : > { %v1404_v55 = vpop.f32.mrf.mxu1  ;;  %v639_v44 = vmul.f32 %v471_v38, %v303_v37  ;;  %v477_v28 = vld [vmem:[%s4451_s1 + $0x388] sm:$0xff]  ;;  %v476_v37 = vld [vmem:[%s4451_s1 + $0x380] sm:$0xff] }
 0x1b5   : > { %v2460_v58 = vadd.f32 %v2459_v40, %v2326_v53 }
 0x1b6   : > { %v1670_v59 = vpop.f32.mrf.mxu2 }
 0x1b7   : > { %v1940_v61 = vadd.f32 %v1939_v51, %v1670_v59  ;;  %2731 = vmatmul.msk.f32.gmra.mxu1 %vm756_vm1, %v633_v54  ;;  %2816 = vmatmul.msk.f32.gmra.mxu3 %vm756_vm1, %v633_v54  ;;  %v2166_v54 = vld [vmem:[%s4453_s3 + $0x250] sm:$0xff] }
 0x1b8   : > { %v1135_v63 = vpop.f32.mrf.mxu0 }
 0x1b9   : > { %v2327_v3 = vmul.f32 %v2159_v60, %v1940_v61  ;;  %v1405_v4 = vadd.f32 %v1404_v55, %v1135_v63  ;;  %v305_v55 = vld [vmem:[%s3038_s29 + $0x368] sm:$0xff] }
 0x1ba   : > { %v1942_v5 = vpop.f32.mrf.mxu3 }
 0x1bb   : > { %v2551_v6 = vadd.f32 %v2550_v52, %v2327_v3  ;;  %v2328_v7 = vmul.f32 %v2160_v0, %v1405_v4  ;;  %1182 = vmatmul.f32.gmra.mxu0 %v632_v62  ;;  %1720 = vmatmul.f32.gmra.mxu2 %v632_v62  ;;  %v638_v52 = vmul.f32 %v470_v47, %v302_v46  ;;  %v304_v0 = vld [vmem:[%s3038_s29 + $0x360] sm:$0xff]  ;;  %v2167_v4 = vld [vmem:[%s4453_s3 + $0x258] sm:$0xff] }
 0x1bc   : > { %v1407_v9 = vpop.f32.mrf.mxu1  ;;  %v641_v62 = vmul.f32 %v473_v56, %v305_v55  ;;  %v479_v46 = vld [vmem:[%s4451_s1 + $0x398] sm:$0xff]  ;;  %v478_v55 = vld [vmem:[%s4451_s1 + $0x390] sm:$0xff] }
 0x1bd   : > { %v2461_v12 = vadd.f32 %v2460_v58, %v2328_v7 }
 0x1be   : > { %v1673_v13 = vpop.f32.mrf.mxu2 }
 0x1bf   : > { %v1943_v15 = vadd.f32 %v1942_v5, %v1673_v13  ;;  %2732 = vmatmul.msk.f32.gmra.mxu1 %vm756_vm1, %v635_v8  ;;  %2817 = vmatmul.msk.f32.gmra.mxu3 %vm756_vm1, %v635_v8  ;;  %v2168_v8 = vld [vmem:[%s4453_s3 + $0x260] sm:$0xff] }
 0x1c0   : > { %v1138_v17 = vpop.f32.mrf.mxu0 }
 0x1c1   : > { %v2329_v21 = vmul.f32 %v2161_v14, %v1943_v15  ;;  %v1408_v22 = vadd.f32 %v1407_v9, %v1138_v17  ;;  %v307_v9 = vld [vmem:[%s3038_s29 + $0x378] sm:$0xff] }
 0x1c2   : > { %v1945_v23 = vpop.f32.mrf.mxu3 }
 0x1c3   : > { %v2552_v24 = vadd.f32 %v2551_v6, %v2329_v21  ;;  %v2330_v25 = vmul.f32 %v2162_v18, %v1408_v22  ;;  %1185 = vmatmul.f32.gmra.mxu0 %v634_v16  ;;  %1723 = vmatmul.f32.gmra.mxu2 %v634_v16  ;;  %v640_v6 = vmul.f32 %v472_v1, %v304_v0  ;;  %v306_v18 = vld [vmem:[%s3038_s29 + $0x370] sm:$0xff]  ;;  %v2169_v22 = vld [vmem:[%s4453_s3 + $0x268] sm:$0xff] }
 0x1c4   : > { %v1410_v27 = vpop.f32.mrf.mxu1  ;;  %v643_v16 = vmul.f32 %v475_v10, %v307_v9  ;;  %v481_v0 = vld [vmem:[%s4451_s1 + $0x3a8] sm:$0xff]  ;;  %v480_v9 = vld [vmem:[%s4451_s1 + $0x3a0] sm:$0xff] }
 0x1c5   : > { %v2462_v30 = vadd.f32 %v2461_v12, %v2330_v25 }
 0x1c6   : > { %v1676_v31 = vpop.f32.mrf.mxu2 }
 0x1c7   : > { %v1946_v33 = vadd.f32 %v1945_v23, %v1676_v31  ;;  %2733 = vmatmul.msk.f32.gmra.mxu1 %vm756_vm1, %v637_v26  ;;  %2818 = vmatmul.msk.f32.gmra.mxu3 %vm756_vm1, %v637_v26  ;;  %v2170_v26 = vld [vmem:[%s4453_s3 + $0x270] sm:$0xff] }
 0x1c8   : > { %v1141_v35 = vpop.f32.mrf.mxu0 }
 0x1c9   : > { %v2331_v39 = vmul.f32 %v2163_v32, %v1946_v33  ;;  %v1411_v40 = vadd.f32 %v1410_v27, %v1141_v35  ;;  %v309_v27 = vld [vmem:[%s3038_s29 + $0x388] sm:$0xff] }
 0x1ca   : > { %v1948_v41 = vpop.f32.mrf.mxu3 }
 0x1cb   : > { %v2553_v42 = vadd.f32 %v2552_v24, %v2331_v39  ;;  %v2332_v43 = vmul.f32 %v2164_v36, %v1411_v40  ;;  %1188 = vmatmul.f32.gmra.mxu0 %v636_v34  ;;  %1726 = vmatmul.f32.gmra.mxu2 %v636_v34  ;;  %v642_v24 = vmul.f32 %v474_v19, %v306_v18  ;;  %v308_v36 = vld [vmem:[%s3038_s29 + $0x380] sm:$0xff]  ;;  %v2171_v40 = vld [vmem:[%s4453_s3 + $0x278] sm:$0xff] }
 0x1cc   : > { %v1413_v45 = vpop.f32.mrf.mxu1  ;;  %v645_v34 = vmul.f32 %v477_v28, %v309_v27  ;;  %v483_v18 = vld [vmem:[%s4451_s1 + $0x3b8] sm:$0xff]  ;;  %v482_v27 = vld [vmem:[%s4451_s1 + $0x3b0] sm:$0xff] }
 0x1cd   : > { %v2463_v48 = vadd.f32 %v2462_v30, %v2332_v43 }
 0x1ce   : > { %v1679_v49 = vpop.f32.mrf.mxu2 }
 0x1cf   : > { %v1949_v51 = vadd.f32 %v1948_v41, %v1679_v49  ;;  %2734 = vmatmul.msk.f32.gmra.mxu1 %vm756_vm1, %v639_v44  ;;  %2819 = vmatmul.msk.f32.gmra.mxu3 %vm756_vm1, %v639_v44  ;;  %v2172_v44 = vld [vmem:[%s4453_s3 + $0x280] sm:$0xff] }
 0x1d0   : > { %v1144_v53 = vpop.f32.mrf.mxu0 }
 0x1d1   : > { %v2333_v57 = vmul.f32 %v2165_v50, %v1949_v51  ;;  %v1414_v58 = vadd.f32 %v1413_v45, %v1144_v53  ;;  %v311_v45 = vld [vmem:[%s3038_s29 + $0x398] sm:$0xff] }
 0x1d2   : > { %v1951_v59 = vpop.f32.mrf.mxu3 }
 0x1d3   : > { %v2554_v60 = vadd.f32 %v2553_v42, %v2333_v57  ;;  %v2334_v61 = vmul.f32 %v2166_v54, %v1414_v58  ;;  %1191 = vmatmul.f32.gmra.mxu0 %v638_v52  ;;  %1729 = vmatmul.f32.gmra.mxu2 %v638_v52  ;;  %v644_v42 = vmul.f32 %v476_v37, %v308_v36  ;;  %v310_v54 = vld [vmem:[%s3038_s29 + $0x390] sm:$0xff]  ;;  %v2173_v58 = vld [vmem:[%s4453_s3 + $0x288] sm:$0xff] }
 0x1d4   : > { %v1416_v63 = vpop.f32.mrf.mxu1  ;;  %v647_v52 = vmul.f32 %v479_v46, %v311_v45  ;;  %v485_v36 = vld [vmem:[%s4451_s1 + $0x3c8] sm:$0xff]  ;;  %v484_v45 = vld [vmem:[%s4451_s1 + $0x3c0] sm:$0xff] }
 0x1d5   : > { %v2464_v2 = vadd.f32 %v2463_v48, %v2334_v61 }
 0x1d6   : > { %v1682_v3 = vpop.f32.mrf.mxu2 }
 0x1d7   : > { %v1952_v5 = vadd.f32 %v1951_v59, %v1682_v3  ;;  %2735 = vmatmul.msk.f32.gmra.mxu1 %vm756_vm1, %v641_v62  ;;  %2820 = vmatmul.msk.f32.gmra.mxu3 %vm756_vm1, %v641_v62  ;;  %v2174_v62 = vld [vmem:[%s4453_s3 + $0x290] sm:$0xff] }
 0x1d8   : > { %v1147_v7 = vpop.f32.mrf.mxu0 }
 0x1d9   : > { %v2335_v11 = vmul.f32 %v2167_v4, %v1952_v5  ;;  %v1417_v12 = vadd.f32 %v1416_v63, %v1147_v7  ;;  %v313_v63 = vld [vmem:[%s3038_s29 + $0x3a8] sm:$0xff] }
 0x1da   : > { %v1954_v13 = vpop.f32.mrf.mxu3 }
 0x1db   : > { %v2555_v14 = vadd.f32 %v2554_v60, %v2335_v11  ;;  %v2336_v15 = vmul.f32 %v2168_v8, %v1417_v12  ;;  %1194 = vmatmul.f32.gmra.mxu0 %v640_v6  ;;  %1732 = vmatmul.f32.gmra.mxu2 %v640_v6  ;;  %v646_v60 = vmul.f32 %v478_v55, %v310_v54  ;;  %v312_v8 = vld [vmem:[%s3038_s29 + $0x3a0] sm:$0xff]  ;;  %v2175_v12 = vld [vmem:[%s4453_s3 + $0x298] sm:$0xff] }
 0x1dc   : > { %v1419_v17 = vpop.f32.mrf.mxu1  ;;  %v649_v6 = vmul.f32 %v481_v0, %v313_v63  ;;  %v487_v54 = vld [vmem:[%s4451_s1 + $0x3d8] sm:$0xff]  ;;  %v486_v63 = vld [vmem:[%s4451_s1 + $0x3d0] sm:$0xff] }
 0x1dd   : > { %v2465_v20 = vadd.f32 %v2464_v2, %v2336_v15 }
 0x1de   : > { %v1685_v21 = vpop.f32.mrf.mxu2 }
 0x1df   : > { %v1955_v23 = vadd.f32 %v1954_v13, %v1685_v21  ;;  %2736 = vmatmul.msk.f32.gmra.mxu1 %vm756_vm1, %v643_v16  ;;  %2821 = vmatmul.msk.f32.gmra.mxu3 %vm756_vm1, %v643_v16  ;;  %v2176_v16 = vld [vmem:[%s4453_s3 + $0x2a0] sm:$0xff] }
 0x1e0   : > { %v1150_v25 = vpop.f32.mrf.mxu0 }
 0x1e1   : > { %v2337_v29 = vmul.f32 %v2169_v22, %v1955_v23  ;;  %v1420_v30 = vadd.f32 %v1419_v17, %v1150_v25  ;;  %v315_v17 = vld [vmem:[%s3038_s29 + $0x3b8] sm:$0xff] }
 0x1e2   : > { %v1957_v31 = vpop.f32.mrf.mxu3 }
 0x1e3   : > { %v2556_v32 = vadd.f32 %v2555_v14, %v2337_v29  ;;  %v2338_v33 = vmul.f32 %v2170_v26, %v1420_v30  ;;  %1197 = vmatmul.f32.gmra.mxu0 %v642_v24  ;;  %1735 = vmatmul.f32.gmra.mxu2 %v642_v24  ;;  %v648_v14 = vmul.f32 %v480_v9, %v312_v8  ;;  %v314_v26 = vld [vmem:[%s3038_s29 + $0x3b0] sm:$0xff]  ;;  %v2177_v30 = vld [vmem:[%s4453_s3 + $0x2a8] sm:$0xff] }
 0x1e4   : > { %v1422_v35 = vpop.f32.mrf.mxu1  ;;  %v651_v24 = vmul.f32 %v483_v18, %v315_v17  ;;  %v489_v8 = vld [vmem:[%s4451_s1 + $0x3e8] sm:$0xff]  ;;  %v488_v17 = vld [vmem:[%s4451_s1 + $0x3e0] sm:$0xff] }
 0x1e5   : > { %v2466_v38 = vadd.f32 %v2465_v20, %v2338_v33 }
 0x1e6   : > { %v1688_v39 = vpop.f32.mrf.mxu2 }
 0x1e7   : > { %v1958_v41 = vadd.f32 %v1957_v31, %v1688_v39  ;;  %2737 = vmatmul.msk.f32.gmra.mxu1 %vm756_vm1, %v645_v34  ;;  %2822 = vmatmul.msk.f32.gmra.mxu3 %vm756_vm1, %v645_v34  ;;  %v2178_v34 = vld [vmem:[%s4453_s3 + $0x2b0] sm:$0xff] }
 0x1e8   : > { %v1153_v43 = vpop.f32.mrf.mxu0 }
 0x1e9   : > { %v2339_v47 = vmul.f32 %v2171_v40, %v1958_v41  ;;  %v1423_v48 = vadd.f32 %v1422_v35, %v1153_v43  ;;  %v317_v35 = vld [vmem:[%s3038_s29 + $0x3c8] sm:$0xff] }
 0x1ea   : > { %v1960_v49 = vpop.f32.mrf.mxu3 }
 0x1eb   : > { %v2557_v50 = vadd.f32 %v2556_v32, %v2339_v47  ;;  %v2340_v51 = vmul.f32 %v2172_v44, %v1423_v48  ;;  %1200 = vmatmul.f32.gmra.mxu0 %v644_v42  ;;  %1738 = vmatmul.f32.gmra.mxu2 %v644_v42  ;;  %v650_v32 = vmul.f32 %v482_v27, %v314_v26  ;;  %v316_v44 = vld [vmem:[%s3038_s29 + $0x3c0] sm:$0xff]  ;;  %v2179_v48 = vld [vmem:[%s4453_s3 + $0x2b8] sm:$0xff] }
 0x1ec   : > { %v1425_v53 = vpop.f32.mrf.mxu1  ;;  %v653_v42 = vmul.f32 %v485_v36, %v317_v35  ;;  %v491_v26 = vld [vmem:[%s4451_s1 + $0x3f8] sm:$0xff]  ;;  %v490_v35 = vld [vmem:[%s4451_s1 + $0x3f0] sm:$0xff] }
 0x1ed   : > { %v2467_v56 = vadd.f32 %v2466_v38, %v2340_v51 }
 0x1ee   : > { %v1691_v57 = vpop.f32.mrf.mxu2 }
 0x1ef   : > { %v1961_v59 = vadd.f32 %v1960_v49, %v1691_v57  ;;  %2738 = vmatmul.msk.f32.gmra.mxu1 %vm756_vm1, %v647_v52  ;;  %2823 = vmatmul.msk.f32.gmra.mxu3 %vm756_vm1, %v647_v52  ;;  %v2180_v52 = vld [vmem:[%s4453_s3 + $0x2c0] sm:$0xff] }
 0x1f0   : > { %v1156_v61 = vpop.f32.mrf.mxu0 }
 0x1f1   : > { %v2341_v1 = vmul.f32 %v2173_v58, %v1961_v59  ;;  %v1426_v2 = vadd.f32 %v1425_v53, %v1156_v61  ;;  %v319_v53 = vld [vmem:[%s3038_s29 + $0x3d8] sm:$0xff] }
 0x1f2   : > { %v1963_v3 = vpop.f32.mrf.mxu3 }
 0x1f3   : > { %v2558_v4 = vadd.f32 %v2557_v50, %v2341_v1  ;;  %v2342_v5 = vmul.f32 %v2174_v62, %v1426_v2  ;;  %1203 = vmatmul.f32.gmra.mxu0 %v646_v60  ;;  %1741 = vmatmul.f32.gmra.mxu2 %v646_v60  ;;  %v652_v50 = vmul.f32 %v484_v45, %v316_v44  ;;  %v318_v62 = vld [vmem:[%s3038_s29 + $0x3d0] sm:$0xff]  ;;  %v2181_v2 = vld [vmem:[%s4453_s3 + $0x2c8] sm:$0xff] }
 0x1f4   : > { %v1428_v7 = vpop.f32.mrf.mxu1  ;;  %v655_v60 = vmul.f32 %v487_v54, %v319_v53  ;;  %v493_v44 = vld [vmem:[%s4451_s1 + $0x408] sm:$0xff]  ;;  %v492_v53 = vld [vmem:[%s4451_s1 + $0x400] sm:$0xff] }
 0x1f5   : > { %v2468_v10 = vadd.f32 %v2467_v56, %v2342_v5 }
 0x1f6   : > { %v1694_v11 = vpop.f32.mrf.mxu2 }
 0x1f7   : > { %v1964_v13 = vadd.f32 %v1963_v3, %v1694_v11  ;;  %2739 = vmatmul.msk.f32.gmra.mxu1 %vm756_vm1, %v649_v6  ;;  %2824 = vmatmul.msk.f32.gmra.mxu3 %vm756_vm1, %v649_v6  ;;  %v2182_v6 = vld [vmem:[%s4453_s3 + $0x2d0] sm:$0xff] }
 0x1f8   : > { %v1159_v15 = vpop.f32.mrf.mxu0 }
 0x1f9   : > { %v2343_v19 = vmul.f32 %v2175_v12, %v1964_v13  ;;  %v1429_v20 = vadd.f32 %v1428_v7, %v1159_v15  ;;  %v321_v7 = vld [vmem:[%s3038_s29 + $0x3e8] sm:$0xff] }
 0x1fa   : > { %v1966_v21 = vpop.f32.mrf.mxu3 }
 0x1fb   : > { %v2559_v22 = vadd.f32 %v2558_v4, %v2343_v19  ;;  %v2344_v23 = vmul.f32 %v2176_v16, %v1429_v20  ;;  %1206 = vmatmul.f32.gmra.mxu0 %v648_v14  ;;  %1744 = vmatmul.f32.gmra.mxu2 %v648_v14  ;;  %v654_v4 = vmul.f32 %v486_v63, %v318_v62  ;;  %v320_v16 = vld [vmem:[%s3038_s29 + $0x3e0] sm:$0xff]  ;;  %v2183_v20 = vld [vmem:[%s4453_s3 + $0x2d8] sm:$0xff] }
 0x1fc   : > { %v1431_v25 = vpop.f32.mrf.mxu1  ;;  %v657_v14 = vmul.f32 %v489_v8, %v321_v7  ;;  %v495_v62 = vld [vmem:[%s4451_s1 + $0x418] sm:$0xff]  ;;  %v494_v7 = vld [vmem:[%s4451_s1 + $0x410] sm:$0xff] }
 0x1fd   : > { %v2469_v28 = vadd.f32 %v2468_v10, %v2344_v23 }
 0x1fe   : > { %v1697_v29 = vpop.f32.mrf.mxu2 }
 0x1ff   : > { %v1967_v31 = vadd.f32 %v1966_v21, %v1697_v29  ;;  %2740 = vmatmul.msk.f32.gmra.mxu1 %vm756_vm1, %v651_v24  ;;  %2825 = vmatmul.msk.f32.gmra.mxu3 %vm756_vm1, %v651_v24  ;;  %v2184_v24 = vld [vmem:[%s4453_s3 + $0x2e0] sm:$0xff] }
 0x200   : > { %v1162_v33 = vpop.f32.mrf.mxu0 }
 0x201   : > { %v2345_v37 = vmul.f32 %v2177_v30, %v1967_v31  ;;  %v1432_v38 = vadd.f32 %v1431_v25, %v1162_v33  ;;  %v323_v25 = vld [vmem:[%s3038_s29 + $0x3f8] sm:$0xff] }
 0x202   : > { %v1969_v39 = vpop.f32.mrf.mxu3 }
 0x203   : > { %v2560_v40 = vadd.f32 %v2559_v22, %v2345_v37  ;;  %v2346_v41 = vmul.f32 %v2178_v34, %v1432_v38  ;;  %1209 = vmatmul.f32.gmra.mxu0 %v650_v32  ;;  %1747 = vmatmul.f32.gmra.mxu2 %v650_v32  ;;  %v656_v22 = vmul.f32 %v488_v17, %v320_v16  ;;  %v322_v34 = vld [vmem:[%s3038_s29 + $0x3f0] sm:$0xff]  ;;  %v2185_v38 = vld [vmem:[%s4453_s3 + $0x2e8] sm:$0xff] }
 0x204   : > { %v1434_v43 = vpop.f32.mrf.mxu1  ;;  %v659_v32 = vmul.f32 %v491_v26, %v323_v25  ;;  %v497_v16 = vld [vmem:[%s4451_s1 + $0x428] sm:$0xff]  ;;  %v496_v25 = vld [vmem:[%s4451_s1 + $0x420] sm:$0xff] }
 0x205   : > { %v2470_v46 = vadd.f32 %v2469_v28, %v2346_v41 }
 0x206   : > { %v1700_v47 = vpop.f32.mrf.mxu2 }
 0x207   : > { %v1970_v49 = vadd.f32 %v1969_v39, %v1700_v47  ;;  %2741 = vmatmul.msk.f32.gmra.mxu1 %vm756_vm1, %v653_v42  ;;  %2826 = vmatmul.msk.f32.gmra.mxu3 %vm756_vm1, %v653_v42  ;;  %v2186_v42 = vld [vmem:[%s4453_s3 + $0x2f0] sm:$0xff] }
 0x208   : > { %v1165_v51 = vpop.f32.mrf.mxu0 }
 0x209   : > { %v2347_v55 = vmul.f32 %v2179_v48, %v1970_v49  ;;  %v1435_v56 = vadd.f32 %v1434_v43, %v1165_v51  ;;  %v325_v43 = vld [vmem:[%s3038_s29 + $0x408] sm:$0xff] }
 0x20a   : > { %v1972_v57 = vpop.f32.mrf.mxu3 }
 0x20b   : > { %v2561_v58 = vadd.f32 %v2560_v40, %v2347_v55  ;;  %v2348_v59 = vmul.f32 %v2180_v52, %v1435_v56  ;;  %1212 = vmatmul.f32.gmra.mxu0 %v652_v50  ;;  %1750 = vmatmul.f32.gmra.mxu2 %v652_v50  ;;  %v658_v40 = vmul.f32 %v490_v35, %v322_v34  ;;  %v324_v52 = vld [vmem:[%s3038_s29 + $0x400] sm:$0xff]  ;;  %v2187_v56 = vld [vmem:[%s4453_s3 + $0x2f8] sm:$0xff] }
 0x20c   : > { %v1437_v61 = vpop.f32.mrf.mxu1  ;;  %v661_v50 = vmul.f32 %v493_v44, %v325_v43  ;;  %v499_v34 = vld [vmem:[%s4451_s1 + $0x438] sm:$0xff]  ;;  %v498_v43 = vld [vmem:[%s4451_s1 + $0x430] sm:$0xff] }
 0x20d   : > { %v2471_v0 = vadd.f32 %v2470_v46, %v2348_v59 }
 0x20e   : > { %v1703_v1 = vpop.f32.mrf.mxu2 }
 0x20f   : > { %v1973_v3 = vadd.f32 %v1972_v57, %v1703_v1  ;;  %2742 = vmatmul.msk.f32.gmra.mxu1 %vm756_vm1, %v655_v60  ;;  %2827 = vmatmul.msk.f32.gmra.mxu3 %vm756_vm1, %v655_v60  ;;  %v2188_v60 = vld [vmem:[%s4453_s3 + $0x300] sm:$0xff] }
 0x210   : > { %v1168_v5 = vpop.f32.mrf.mxu0 }
 0x211   : > { %v2349_v9 = vmul.f32 %v2181_v2, %v1973_v3  ;;  %v1438_v10 = vadd.f32 %v1437_v61, %v1168_v5  ;;  %v327_v61 = vld [vmem:[%s3038_s29 + $0x418] sm:$0xff] }
 0x212   : > { %v1975_v11 = vpop.f32.mrf.mxu3 }
 0x213   : > { %v2562_v12 = vadd.f32 %v2561_v58, %v2349_v9  ;;  %v2350_v13 = vmul.f32 %v2182_v6, %v1438_v10  ;;  %1215 = vmatmul.f32.gmra.mxu0 %v654_v4  ;;  %1753 = vmatmul.f32.gmra.mxu2 %v654_v4  ;;  %v660_v58 = vmul.f32 %v492_v53, %v324_v52  ;;  %v326_v6 = vld [vmem:[%s3038_s29 + $0x410] sm:$0xff]  ;;  %v2189_v10 = vld [vmem:[%s4453_s3 + $0x308] sm:$0xff] }
 0x214   : > { %v1440_v15 = vpop.f32.mrf.mxu1  ;;  %v663_v4 = vmul.f32 %v495_v62, %v327_v61  ;;  %v501_v52 = vld [vmem:[%s4451_s1 + $0x448] sm:$0xff]  ;;  %v500_v61 = vld [vmem:[%s4451_s1 + $0x440] sm:$0xff] }
 0x215   : > { %v2472_v18 = vadd.f32 %v2471_v0, %v2350_v13 }
 0x216   : > { %v1706_v19 = vpop.f32.mrf.mxu2 }
 0x217   : > { %v1976_v21 = vadd.f32 %v1975_v11, %v1706_v19  ;;  %2743 = vmatmul.msk.f32.gmra.mxu1 %vm756_vm1, %v657_v14  ;;  %2828 = vmatmul.msk.f32.gmra.mxu3 %vm756_vm1, %v657_v14  ;;  %v2190_v14 = vld [vmem:[%s4453_s3 + $0x310] sm:$0xff] }
 0x218   : > { %v1171_v23 = vpop.f32.mrf.mxu0 }
 0x219   : > { %v2351_v27 = vmul.f32 %v2183_v20, %v1976_v21  ;;  %v1441_v28 = vadd.f32 %v1440_v15, %v1171_v23  ;;  %v329_v15 = vld [vmem:[%s3038_s29 + $0x428] sm:$0xff] }
 0x21a   : > { %v1978_v29 = vpop.f32.mrf.mxu3 }
 0x21b   : > { %v2563_v30 = vadd.f32 %v2562_v12, %v2351_v27  ;;  %v2352_v31 = vmul.f32 %v2184_v24, %v1441_v28  ;;  %1218 = vmatmul.f32.gmra.mxu0 %v656_v22  ;;  %1756 = vmatmul.f32.gmra.mxu2 %v656_v22  ;;  %v662_v12 = vmul.f32 %v494_v7, %v326_v6  ;;  %v328_v24 = vld [vmem:[%s3038_s29 + $0x420] sm:$0xff]  ;;  %v2191_v28 = vld [vmem:[%s4453_s3 + $0x318] sm:$0xff] }
 0x21c   : > { %v1443_v33 = vpop.f32.mrf.mxu1  ;;  %v665_v22 = vmul.f32 %v497_v16, %v329_v15  ;;  %v503_v6 = vld [vmem:[%s4451_s1 + $0x458] sm:$0xff]  ;;  %v502_v15 = vld [vmem:[%s4451_s1 + $0x450] sm:$0xff] }
 0x21d   : > { %v2473_v36 = vadd.f32 %v2472_v18, %v2352_v31 }
 0x21e   : > { %v1709_v37 = vpop.f32.mrf.mxu2 }
 0x21f   : > { %v1979_v39 = vadd.f32 %v1978_v29, %v1709_v37  ;;  %2744 = vmatmul.msk.f32.gmra.mxu1 %vm756_vm1, %v659_v32  ;;  %2829 = vmatmul.msk.f32.gmra.mxu3 %vm756_vm1, %v659_v32  ;;  %v2192_v32 = vld [vmem:[%s4453_s3 + $0x320] sm:$0xff] }
 0x220   : > { %v1174_v41 = vpop.f32.mrf.mxu0 }
 0x221   : > { %v2353_v45 = vmul.f32 %v2185_v38, %v1979_v39  ;;  %v1444_v46 = vadd.f32 %v1443_v33, %v1174_v41  ;;  %v331_v33 = vld [vmem:[%s3038_s29 + $0x438] sm:$0xff] }
 0x222   : > { %v1981_v47 = vpop.f32.mrf.mxu3 }
 0x223   : > { %v2564_v48 = vadd.f32 %v2563_v30, %v2353_v45  ;;  %v2354_v49 = vmul.f32 %v2186_v42, %v1444_v46  ;;  %1221 = vmatmul.f32.gmra.mxu0 %v658_v40  ;;  %1759 = vmatmul.f32.gmra.mxu2 %v658_v40  ;;  %v664_v30 = vmul.f32 %v496_v25, %v328_v24  ;;  %v330_v42 = vld [vmem:[%s3038_s29 + $0x430] sm:$0xff]  ;;  %v2193_v46 = vld [vmem:[%s4453_s3 + $0x328] sm:$0xff] }
 0x224   : > { %v1446_v51 = vpop.f32.mrf.mxu1  ;;  %v667_v40 = vmul.f32 %v499_v34, %v331_v33  ;;  %v505_v24 = vld [vmem:[%s4451_s1 + $0x468] sm:$0xff]  ;;  %v504_v33 = vld [vmem:[%s4451_s1 + $0x460] sm:$0xff] }
 0x225   : > { %v2474_v54 = vadd.f32 %v2473_v36, %v2354_v49 }
 0x226   : > { %v1712_v55 = vpop.f32.mrf.mxu2 }
 0x227   : > { %v1982_v57 = vadd.f32 %v1981_v47, %v1712_v55  ;;  %2745 = vmatmul.msk.f32.gmra.mxu1 %vm756_vm1, %v661_v50  ;;  %2830 = vmatmul.msk.f32.gmra.mxu3 %vm756_vm1, %v661_v50  ;;  %v2194_v50 = vld [vmem:[%s4453_s3 + $0x330] sm:$0xff] }
 0x228   : > { %v1177_v59 = vpop.f32.mrf.mxu0 }
 0x229   : > { %v2355_v63 = vmul.f32 %v2187_v56, %v1982_v57  ;;  %v1447_v0 = vadd.f32 %v1446_v51, %v1177_v59  ;;  %v333_v51 = vld [vmem:[%s3038_s29 + $0x448] sm:$0xff] }
 0x22a   : > { %v1984_v1 = vpop.f32.mrf.mxu3 }
 0x22b   : > { %v2565_v2 = vadd.f32 %v2564_v48, %v2355_v63  ;;  %v2356_v3 = vmul.f32 %v2188_v60, %v1447_v0  ;;  %1224 = vmatmul.f32.gmra.mxu0 %v660_v58  ;;  %1762 = vmatmul.f32.gmra.mxu2 %v660_v58  ;;  %v666_v48 = vmul.f32 %v498_v43, %v330_v42  ;;  %v332_v60 = vld [vmem:[%s3038_s29 + $0x440] sm:$0xff]  ;;  %v2195_v0 = vld [vmem:[%s4453_s3 + $0x338] sm:$0xff] }
 0x22c   : > { %v1449_v5 = vpop.f32.mrf.mxu1  ;;  %v669_v58 = vmul.f32 %v501_v52, %v333_v51  ;;  %v507_v42 = vld [vmem:[%s4451_s1 + $0x478] sm:$0xff]  ;;  %v506_v51 = vld [vmem:[%s4451_s1 + $0x470] sm:$0xff] }
 0x22d   : > { %v2475_v8 = vadd.f32 %v2474_v54, %v2356_v3 }
 0x22e   : > { %v1715_v9 = vpop.f32.mrf.mxu2 }
 0x22f   : > { %v1985_v11 = vadd.f32 %v1984_v1, %v1715_v9  ;;  %2746 = vmatmul.msk.f32.gmra.mxu1 %vm756_vm1, %v663_v4  ;;  %2831 = vmatmul.msk.f32.gmra.mxu3 %vm756_vm1, %v663_v4  ;;  %v2196_v4 = vld [vmem:[%s4453_s3 + $0x340] sm:$0xff] }
 0x230   : > { %v1180_v13 = vpop.f32.mrf.mxu0 }
 0x231   : > { %v2357_v17 = vmul.f32 %v2189_v10, %v1985_v11  ;;  %v1450_v18 = vadd.f32 %v1449_v5, %v1180_v13  ;;  %v335_v5 = vld [vmem:[%s3038_s29 + $0x458] sm:$0xff] }
 0x232   : > { %v1987_v19 = vpop.f32.mrf.mxu3 }
 0x233   : > { %v2566_v20 = vadd.f32 %v2565_v2, %v2357_v17  ;;  %v2358_v21 = vmul.f32 %v2190_v14, %v1450_v18  ;;  %1227 = vmatmul.f32.gmra.mxu0 %v662_v12  ;;  %1765 = vmatmul.f32.gmra.mxu2 %v662_v12  ;;  %v668_v2 = vmul.f32 %v500_v61, %v332_v60  ;;  %v334_v14 = vld [vmem:[%s3038_s29 + $0x450] sm:$0xff]  ;;  %v2197_v18 = vld [vmem:[%s4453_s3 + $0x348] sm:$0xff] }
 0x234   : > { %v1452_v23 = vpop.f32.mrf.mxu1  ;;  %v671_v12 = vmul.f32 %v503_v6, %v335_v5  ;;  %v509_v60 = vld [vmem:[%s4451_s1 + $0x488] sm:$0xff]  ;;  %v508_v5 = vld [vmem:[%s4451_s1 + $0x480] sm:$0xff] }
 0x235   : > { %v2476_v26 = vadd.f32 %v2475_v8, %v2358_v21 }
 0x236   : > { %v1718_v27 = vpop.f32.mrf.mxu2 }
 0x237   : > { %v1988_v29 = vadd.f32 %v1987_v19, %v1718_v27  ;;  %2747 = vmatmul.msk.f32.gmra.mxu1 %vm756_vm1, %v665_v22  ;;  %2832 = vmatmul.msk.f32.gmra.mxu3 %vm756_vm1, %v665_v22  ;;  %v2198_v22 = vld [vmem:[%s4453_s3 + $0x350] sm:$0xff] }
 0x238   : > { %v1183_v31 = vpop.f32.mrf.mxu0 }
 0x239   : > { %v2359_v35 = vmul.f32 %v2191_v28, %v1988_v29  ;;  %v1453_v36 = vadd.f32 %v1452_v23, %v1183_v31  ;;  %v337_v23 = vld [vmem:[%s3038_s29 + $0x468] sm:$0xff] }
 0x23a   : > { %v1990_v37 = vpop.f32.mrf.mxu3 }
 0x23b   : > { %v2567_v38 = vadd.f32 %v2566_v20, %v2359_v35  ;;  %v2360_v39 = vmul.f32 %v2192_v32, %v1453_v36  ;;  %1230 = vmatmul.f32.gmra.mxu0 %v664_v30  ;;  %1768 = vmatmul.f32.gmra.mxu2 %v664_v30  ;;  %v670_v20 = vmul.f32 %v502_v15, %v334_v14  ;;  %v336_v32 = vld [vmem:[%s3038_s29 + $0x460] sm:$0xff]  ;;  %v2199_v36 = vld [vmem:[%s4453_s3 + $0x358] sm:$0xff] }
 0x23c   : > { %v1455_v41 = vpop.f32.mrf.mxu1  ;;  %v673_v30 = vmul.f32 %v505_v24, %v337_v23  ;;  %v511_v14 = vld [vmem:[%s4451_s1 + $0x498] sm:$0xff]  ;;  %v510_v23 = vld [vmem:[%s4451_s1 + $0x490] sm:$0xff] }
 0x23d   : > { %v2477_v44 = vadd.f32 %v2476_v26, %v2360_v39 }
 0x23e   : > { %v1721_v45 = vpop.f32.mrf.mxu2 }
 0x23f   : > { %v1991_v47 = vadd.f32 %v1990_v37, %v1721_v45  ;;  %2748 = vmatmul.msk.f32.gmra.mxu1 %vm756_vm1, %v667_v40  ;;  %2833 = vmatmul.msk.f32.gmra.mxu3 %vm756_vm1, %v667_v40  ;;  %v2200_v40 = vld [vmem:[%s4453_s3 + $0x360] sm:$0xff] }
 0x240   : > { %v1186_v49 = vpop.f32.mrf.mxu0 }
 0x241   : > { %v2361_v53 = vmul.f32 %v2193_v46, %v1991_v47  ;;  %v1456_v54 = vadd.f32 %v1455_v41, %v1186_v49  ;;  %v339_v41 = vld [vmem:[%s3038_s29 + $0x478] sm:$0xff] }
 0x242   : > { %v1993_v55 = vpop.f32.mrf.mxu3 }
 0x243   : > { %v2568_v56 = vadd.f32 %v2567_v38, %v2361_v53  ;;  %v2362_v57 = vmul.f32 %v2194_v50, %v1456_v54  ;;  %1233 = vmatmul.f32.gmra.mxu0 %v666_v48  ;;  %1771 = vmatmul.f32.gmra.mxu2 %v666_v48  ;;  %v672_v38 = vmul.f32 %v504_v33, %v336_v32  ;;  %v338_v50 = vld [vmem:[%s3038_s29 + $0x470] sm:$0xff]  ;;  %v2201_v54 = vld [vmem:[%s4453_s3 + $0x368] sm:$0xff] }
 0x244   : > { %v1458_v59 = vpop.f32.mrf.mxu1  ;;  %v675_v48 = vmul.f32 %v507_v42, %v339_v41  ;;  %v513_v32 = vld [vmem:[%s4451_s1 + $0x4a8] sm:$0xff]  ;;  %v512_v41 = vld [vmem:[%s4451_s1 + $0x4a0] sm:$0xff] }
 0x245   : > { %v2478_v62 = vadd.f32 %v2477_v44, %v2362_v57 }
 0x246   : > { %v1724_v63 = vpop.f32.mrf.mxu2 }
 0x247   : > { %v1994_v1 = vadd.f32 %v1993_v55, %v1724_v63  ;;  %2749 = vmatmul.msk.f32.gmra.mxu1 %vm756_vm1, %v669_v58  ;;  %2834 = vmatmul.msk.f32.gmra.mxu3 %vm756_vm1, %v669_v58  ;;  %v2202_v58 = vld [vmem:[%s4453_s3 + $0x370] sm:$0xff] }
 0x248   : > { %v1189_v3 = vpop.f32.mrf.mxu0 }
 0x249   : > { %v2363_v7 = vmul.f32 %v2195_v0, %v1994_v1  ;;  %v1459_v8 = vadd.f32 %v1458_v59, %v1189_v3  ;;  %v341_v59 = vld [vmem:[%s3038_s29 + $0x488] sm:$0xff] }
 0x24a   : > { %v1996_v9 = vpop.f32.mrf.mxu3 }
 0x24b   : > { %v2569_v10 = vadd.f32 %v2568_v56, %v2363_v7  ;;  %v2364_v11 = vmul.f32 %v2196_v4, %v1459_v8  ;;  %1236 = vmatmul.f32.gmra.mxu0 %v668_v2  ;;  %1774 = vmatmul.f32.gmra.mxu2 %v668_v2  ;;  %v674_v56 = vmul.f32 %v506_v51, %v338_v50  ;;  %v340_v4 = vld [vmem:[%s3038_s29 + $0x480] sm:$0xff]  ;;  %v2203_v8 = vld [vmem:[%s4453_s3 + $0x378] sm:$0xff] }
 0x24c   : > { %v1461_v13 = vpop.f32.mrf.mxu1  ;;  %v677_v2 = vmul.f32 %v509_v60, %v341_v59  ;;  %v515_v50 = vld [vmem:[%s4451_s1 + $0x4b8] sm:$0xff]  ;;  %v514_v59 = vld [vmem:[%s4451_s1 + $0x4b0] sm:$0xff] }
 0x24d   : > { %v2479_v16 = vadd.f32 %v2478_v62, %v2364_v11 }
 0x24e   : > { %v1727_v17 = vpop.f32.mrf.mxu2 }
 0x24f   : > { %v1997_v19 = vadd.f32 %v1996_v9, %v1727_v17  ;;  %2750 = vmatmul.msk.f32.gmra.mxu1 %vm756_vm1, %v671_v12  ;;  %2835 = vmatmul.msk.f32.gmra.mxu3 %vm756_vm1, %v671_v12  ;;  %v2204_v12 = vld [vmem:[%s4453_s3 + $0x380] sm:$0xff] }
 0x250   : > { %v1192_v21 = vpop.f32.mrf.mxu0 }
 0x251   : > { %v2365_v25 = vmul.f32 %v2197_v18, %v1997_v19  ;;  %v1462_v26 = vadd.f32 %v1461_v13, %v1192_v21  ;;  %v343_v13 = vld [vmem:[%s3038_s29 + $0x498] sm:$0xff] }
 0x252   : > { %v1999_v27 = vpop.f32.mrf.mxu3 }
 0x253   : > { %v2570_v28 = vadd.f32 %v2569_v10, %v2365_v25  ;;  %v2366_v29 = vmul.f32 %v2198_v22, %v1462_v26  ;;  %1239 = vmatmul.f32.gmra.mxu0 %v670_v20  ;;  %1777 = vmatmul.f32.gmra.mxu2 %v670_v20  ;;  %v676_v10 = vmul.f32 %v508_v5, %v340_v4  ;;  %v342_v22 = vld [vmem:[%s3038_s29 + $0x490] sm:$0xff]  ;;  %v2205_v26 = vld [vmem:[%s4453_s3 + $0x388] sm:$0xff] }
 0x254   : > { %v1464_v31 = vpop.f32.mrf.mxu1  ;;  %v679_v20 = vmul.f32 %v511_v14, %v343_v13  ;;  %v517_v4 = vld [vmem:[%s4451_s1 + $0x4c8] sm:$0xff]  ;;  %v516_v13 = vld [vmem:[%s4451_s1 + $0x4c0] sm:$0xff] }
 0x255   : > { %v2480_v34 = vadd.f32 %v2479_v16, %v2366_v29 }
 0x256   : > { %v1730_v35 = vpop.f32.mrf.mxu2 }
 0x257   : > { %v2000_v37 = vadd.f32 %v1999_v27, %v1730_v35  ;;  %2751 = vmatmul.msk.f32.gmra.mxu1 %vm756_vm1, %v673_v30  ;;  %2836 = vmatmul.msk.f32.gmra.mxu3 %vm756_vm1, %v673_v30  ;;  %v2206_v30 = vld [vmem:[%s4453_s3 + $0x390] sm:$0xff] }
 0x258   : > { %v1195_v39 = vpop.f32.mrf.mxu0 }
 0x259   : > { %v2367_v43 = vmul.f32 %v2199_v36, %v2000_v37  ;;  %v1465_v44 = vadd.f32 %v1464_v31, %v1195_v39  ;;  %v345_v31 = vld [vmem:[%s3038_s29 + $0x4a8] sm:$0xff] }
 0x25a   : > { %v2002_v45 = vpop.f32.mrf.mxu3 }
 0x25b   : > { %v2571_v46 = vadd.f32 %v2570_v28, %v2367_v43  ;;  %v2368_v47 = vmul.f32 %v2200_v40, %v1465_v44  ;;  %1242 = vmatmul.f32.gmra.mxu0 %v672_v38  ;;  %1780 = vmatmul.f32.gmra.mxu2 %v672_v38  ;;  %v678_v28 = vmul.f32 %v510_v23, %v342_v22  ;;  %v344_v40 = vld [vmem:[%s3038_s29 + $0x4a0] sm:$0xff]  ;;  %v2207_v44 = vld [vmem:[%s4453_s3 + $0x398] sm:$0xff] }
 0x25c   : > { %v1467_v49 = vpop.f32.mrf.mxu1  ;;  %v681_v38 = vmul.f32 %v513_v32, %v345_v31  ;;  %v519_v22 = vld [vmem:[%s4451_s1 + $0x4d8] sm:$0xff]  ;;  %v518_v31 = vld [vmem:[%s4451_s1 + $0x4d0] sm:$0xff] }
 0x25d   : > { %v2481_v52 = vadd.f32 %v2480_v34, %v2368_v47 }
 0x25e   : > { %v1733_v53 = vpop.f32.mrf.mxu2 }
 0x25f   : > { %v2003_v55 = vadd.f32 %v2002_v45, %v1733_v53  ;;  %2752 = vmatmul.msk.f32.gmra.mxu1 %vm756_vm1, %v675_v48  ;;  %2837 = vmatmul.msk.f32.gmra.mxu3 %vm756_vm1, %v675_v48  ;;  %v2208_v48 = vld [vmem:[%s4453_s3 + $0x3a0] sm:$0xff] }
 0x260   : > { %v1198_v57 = vpop.f32.mrf.mxu0 }
 0x261   : > { %v2369_v61 = vmul.f32 %v2201_v54, %v2003_v55  ;;  %v1468_v62 = vadd.f32 %v1467_v49, %v1198_v57  ;;  %v347_v49 = vld [vmem:[%s3038_s29 + $0x4b8] sm:$0xff] }
 0x262   : > { %v2005_v63 = vpop.f32.mrf.mxu3 }
 0x263   : > { %v2572_v0 = vadd.f32 %v2571_v46, %v2369_v61  ;;  %v2370_v1 = vmul.f32 %v2202_v58, %v1468_v62  ;;  %1245 = vmatmul.f32.gmra.mxu0 %v674_v56  ;;  %1783 = vmatmul.f32.gmra.mxu2 %v674_v56  ;;  %v680_v46 = vmul.f32 %v512_v41, %v344_v40  ;;  %v346_v58 = vld [vmem:[%s3038_s29 + $0x4b0] sm:$0xff]  ;;  %v2209_v62 = vld [vmem:[%s4453_s3 + $0x3a8] sm:$0xff] }
 0x264   : > { %v1470_v3 = vpop.f32.mrf.mxu1  ;;  %v683_v56 = vmul.f32 %v515_v50, %v347_v49  ;;  %v521_v40 = vld [vmem:[%s4451_s1 + $0x4e8] sm:$0xff]  ;;  %v520_v49 = vld [vmem:[%s4451_s1 + $0x4e0] sm:$0xff] }
 0x265   : > { %v2482_v6 = vadd.f32 %v2481_v52, %v2370_v1 }
 0x266   : > { %v1736_v7 = vpop.f32.mrf.mxu2 }
 0x267   : > { %v2006_v9 = vadd.f32 %v2005_v63, %v1736_v7  ;;  %2753 = vmatmul.msk.f32.gmra.mxu1 %vm756_vm1, %v677_v2  ;;  %2838 = vmatmul.msk.f32.gmra.mxu3 %vm756_vm1, %v677_v2  ;;  %v2210_v2 = vld [vmem:[%s4453_s3 + $0x3b0] sm:$0xff] }
 0x268   : > { %v1201_v11 = vpop.f32.mrf.mxu0 }
 0x269   : > { %v2371_v15 = vmul.f32 %v2203_v8, %v2006_v9  ;;  %v1471_v16 = vadd.f32 %v1470_v3, %v1201_v11  ;;  %v349_v3 = vld [vmem:[%s3038_s29 + $0x4c8] sm:$0xff] }
 0x26a   : > { %v2008_v17 = vpop.f32.mrf.mxu3 }
 0x26b   : > { %v2573_v18 = vadd.f32 %v2572_v0, %v2371_v15  ;;  %v2372_v19 = vmul.f32 %v2204_v12, %v1471_v16  ;;  %1248 = vmatmul.f32.gmra.mxu0 %v676_v10  ;;  %1786 = vmatmul.f32.gmra.mxu2 %v676_v10  ;;  %v682_v0 = vmul.f32 %v514_v59, %v346_v58  ;;  %v348_v12 = vld [vmem:[%s3038_s29 + $0x4c0] sm:$0xff]  ;;  %v2211_v16 = vld [vmem:[%s4453_s3 + $0x3b8] sm:$0xff] }
 0x26c   : > { %v1473_v21 = vpop.f32.mrf.mxu1  ;;  %v685_v10 = vmul.f32 %v517_v4, %v349_v3  ;;  %v523_v58 = vld [vmem:[%s4451_s1 + $0x4f8] sm:$0xff]  ;;  %v522_v3 = vld [vmem:[%s4451_s1 + $0x4f0] sm:$0xff] }
 0x26d   : > { %v2483_v24 = vadd.f32 %v2482_v6, %v2372_v19 }
 0x26e   : > { %v1739_v25 = vpop.f32.mrf.mxu2 }
 0x26f   : > { %v2009_v27 = vadd.f32 %v2008_v17, %v1739_v25  ;;  %2754 = vmatmul.msk.f32.gmra.mxu1 %vm756_vm1, %v679_v20  ;;  %2839 = vmatmul.msk.f32.gmra.mxu3 %vm756_vm1, %v679_v20  ;;  %v2212_v20 = vld [vmem:[%s4453_s3 + $0x3c0] sm:$0xff] }
 0x270   : > { %v1204_v29 = vpop.f32.mrf.mxu0 }
 0x271   : > { %v2373_v33 = vmul.f32 %v2205_v26, %v2009_v27  ;;  %v1474_v34 = vadd.f32 %v1473_v21, %v1204_v29  ;;  %v351_v21 = vld [vmem:[%s3038_s29 + $0x4d8] sm:$0xff] }
 0x272   : > { %v2011_v35 = vpop.f32.mrf.mxu3 }
 0x273   : > { %v2574_v36 = vadd.f32 %v2573_v18, %v2373_v33  ;;  %v2374_v37 = vmul.f32 %v2206_v30, %v1474_v34  ;;  %1251 = vmatmul.f32.gmra.mxu0 %v678_v28  ;;  %1789 = vmatmul.f32.gmra.mxu2 %v678_v28  ;;  %v684_v18 = vmul.f32 %v516_v13, %v348_v12  ;;  %v350_v30 = vld [vmem:[%s3038_s29 + $0x4d0] sm:$0xff]  ;;  %v2213_v34 = vld [vmem:[%s4453_s3 + $0x3c8] sm:$0xff] }
 0x274   : > { %v1476_v39 = vpop.f32.mrf.mxu1  ;;  %v687_v28 = vmul.f32 %v519_v22, %v351_v21  ;;  %v525_v12 = vld [vmem:[%s4451_s1 + $0x508] sm:$0xff]  ;;  %v524_v21 = vld [vmem:[%s4451_s1 + $0x500] sm:$0xff] }
 0x275   : > { %v2484_v42 = vadd.f32 %v2483_v24, %v2374_v37 }
 0x276   : > { %v1742_v43 = vpop.f32.mrf.mxu2 }
 0x277   : > { %v2012_v45 = vadd.f32 %v2011_v35, %v1742_v43  ;;  %2755 = vmatmul.msk.f32.gmra.mxu1 %vm756_vm1, %v681_v38  ;;  %2840 = vmatmul.msk.f32.gmra.mxu3 %vm756_vm1, %v681_v38  ;;  %v2214_v38 = vld [vmem:[%s4453_s3 + $0x3d0] sm:$0xff] }
 0x278   : > { %v1207_v47 = vpop.f32.mrf.mxu0 }
 0x279   : > { %v2375_v51 = vmul.f32 %v2207_v44, %v2012_v45  ;;  %v1477_v52 = vadd.f32 %v1476_v39, %v1207_v47  ;;  %v353_v39 = vld [vmem:[%s3038_s29 + $0x4e8] sm:$0xff] }
 0x27a   : > { %v2014_v53 = vpop.f32.mrf.mxu3 }
 0x27b   : > { %v2575_v54 = vadd.f32 %v2574_v36, %v2375_v51  ;;  %v2376_v55 = vmul.f32 %v2208_v48, %v1477_v52  ;;  %1254 = vmatmul.f32.gmra.mxu0 %v680_v46  ;;  %1792 = vmatmul.f32.gmra.mxu2 %v680_v46  ;;  %v686_v36 = vmul.f32 %v518_v31, %v350_v30  ;;  %v352_v48 = vld [vmem:[%s3038_s29 + $0x4e0] sm:$0xff]  ;;  %v2215_v52 = vld [vmem:[%s4453_s3 + $0x3d8] sm:$0xff] }
 0x27c   : > { %v1479_v57 = vpop.f32.mrf.mxu1  ;;  %v689_v46 = vmul.f32 %v521_v40, %v353_v39  ;;  %v527_v30 = vld [vmem:[%s4451_s1 + $0x518] sm:$0xff]  ;;  %v526_v39 = vld [vmem:[%s4451_s1 + $0x510] sm:$0xff] }
 0x27d   : > { %v2485_v60 = vadd.f32 %v2484_v42, %v2376_v55 }
 0x27e   : > { %v1745_v61 = vpop.f32.mrf.mxu2 }
 0x27f   : > { %v2015_v63 = vadd.f32 %v2014_v53, %v1745_v61  ;;  %2756 = vmatmul.msk.f32.gmra.mxu1 %vm756_vm1, %v683_v56  ;;  %2841 = vmatmul.msk.f32.gmra.mxu3 %vm756_vm1, %v683_v56  ;;  %v2216_v56 = vld [vmem:[%s4453_s3 + $0x3e0] sm:$0xff] }
 0x280   : > { %v1210_v1 = vpop.f32.mrf.mxu0 }
 0x281   : > { %v2377_v5 = vmul.f32 %v2209_v62, %v2015_v63  ;;  %v1480_v6 = vadd.f32 %v1479_v57, %v1210_v1  ;;  %v355_v57 = vld [vmem:[%s3038_s29 + $0x4f8] sm:$0xff] }
 0x282   : > { %v2017_v7 = vpop.f32.mrf.mxu3 }
 0x283   : > { %v2576_v8 = vadd.f32 %v2575_v54, %v2377_v5  ;;  %v2378_v9 = vmul.f32 %v2210_v2, %v1480_v6  ;;  %1257 = vmatmul.f32.gmra.mxu0 %v682_v0  ;;  %1795 = vmatmul.f32.gmra.mxu2 %v682_v0  ;;  %v688_v54 = vmul.f32 %v520_v49, %v352_v48  ;;  %v354_v2 = vld [vmem:[%s3038_s29 + $0x4f0] sm:$0xff]  ;;  %v2217_v6 = vld [vmem:[%s4453_s3 + $0x3e8] sm:$0xff] }
 0x284   : > { %v1482_v11 = vpop.f32.mrf.mxu1  ;;  %v691_v0 = vmul.f32 %v523_v58, %v355_v57  ;;  %v529_v48 = vld [vmem:[%s4451_s1 + $0x528] sm:$0xff]  ;;  %v528_v57 = vld [vmem:[%s4451_s1 + $0x520] sm:$0xff] }
 0x285   : > { %v2486_v14 = vadd.f32 %v2485_v60, %v2378_v9 }
 0x286   : > { %v1748_v15 = vpop.f32.mrf.mxu2 }
 0x287   : > { %v2018_v17 = vadd.f32 %v2017_v7, %v1748_v15  ;;  %2757 = vmatmul.msk.f32.gmra.mxu1 %vm756_vm1, %v685_v10  ;;  %2842 = vmatmul.msk.f32.gmra.mxu3 %vm756_vm1, %v685_v10  ;;  %v2218_v10 = vld [vmem:[%s4453_s3 + $0x3f0] sm:$0xff] }
 0x288   : > { %v1213_v19 = vpop.f32.mrf.mxu0 }
 0x289   : > { %v2379_v23 = vmul.f32 %v2211_v16, %v2018_v17  ;;  %v1483_v24 = vadd.f32 %v1482_v11, %v1213_v19  ;;  %v357_v11 = vld [vmem:[%s3038_s29 + $0x508] sm:$0xff] }
 0x28a   : > { %v2020_v25 = vpop.f32.mrf.mxu3 }
 0x28b   : > { %v2577_v26 = vadd.f32 %v2576_v8, %v2379_v23  ;;  %v2380_v27 = vmul.f32 %v2212_v20, %v1483_v24  ;;  %1260 = vmatmul.f32.gmra.mxu0 %v684_v18  ;;  %1798 = vmatmul.f32.gmra.mxu2 %v684_v18  ;;  %v690_v8 = vmul.f32 %v522_v3, %v354_v2  ;;  %v356_v20 = vld [vmem:[%s3038_s29 + $0x500] sm:$0xff]  ;;  %v2219_v24 = vld [vmem:[%s4453_s3 + $0x3f8] sm:$0xff] }
 0x28c   : > { %v1485_v29 = vpop.f32.mrf.mxu1  ;;  %v693_v18 = vmul.f32 %v525_v12, %v357_v11  ;;  %v531_v2 = vld [vmem:[%s4451_s1 + $0x538] sm:$0x3]  ;;  %v530_v11 = vld [vmem:[%s4451_s1 + $0x530] sm:$0x3] }
 0x28d   : > { %v2487_v32 = vadd.f32 %v2486_v14, %v2380_v27 }
 0x28e   : > { %v1751_v33 = vpop.f32.mrf.mxu2 }
 0x28f   : > { %v2021_v35 = vadd.f32 %v2020_v25, %v1751_v33  ;;  %2758 = vmatmul.msk.f32.gmra.mxu1 %vm756_vm1, %v687_v28  ;;  %2843 = vmatmul.msk.f32.gmra.mxu3 %vm756_vm1, %v687_v28  ;;  %v2220_v28 = vld [vmem:[%s4453_s3 + $0x400] sm:$0xff] }
 0x290   : > { %v1216_v37 = vpop.f32.mrf.mxu0 }
 0x291   : > { %v2381_v41 = vmul.f32 %v2213_v34, %v2021_v35  ;;  %v1486_v42 = vadd.f32 %v1485_v29, %v1216_v37  ;;  %v359_v29 = vld [vmem:[%s3038_s29 + $0x518] sm:$0xff] }
 0x292   : > { %v2023_v43 = vpop.f32.mrf.mxu3 }
 0x293   : > { %v2578_v44 = vadd.f32 %v2577_v26, %v2381_v41  ;;  %v2382_v45 = vmul.f32 %v2214_v38, %v1486_v42  ;;  %1263 = vmatmul.f32.gmra.mxu0 %v686_v36  ;;  %1801 = vmatmul.f32.gmra.mxu2 %v686_v36  ;;  %v692_v26 = vmul.f32 %v524_v21, %v356_v20  ;;  %v358_v38 = vld [vmem:[%s3038_s29 + $0x510] sm:$0xff]  ;;  %v2221_v42 = vld [vmem:[%s4453_s3 + $0x408] sm:$0xff] }
 0x294   : > { %v1488_v47 = vpop.f32.mrf.mxu1  ;;  %v695_v36 = vmul.f32 %v527_v30, %v359_v29  ;;  %v2228_v30 = vld [vmem:[%s4453_s3 + $0x440] sm:$0xff] }
 0x295   : > { %v2488_v50 = vadd.f32 %v2487_v32, %v2382_v45 }
 0x296   : > { %v1754_v51 = vpop.f32.mrf.mxu2 }
 0x297   : > { %v2024_v53 = vadd.f32 %v2023_v43, %v1754_v51  ;;  %2759 = vmatmul.msk.f32.gmra.mxu1 %vm756_vm1, %v689_v46  ;;  %2844 = vmatmul.msk.f32.gmra.mxu3 %vm756_vm1, %v689_v46  ;;  %v2222_v46 = vld [vmem:[%s4453_s3 + $0x410] sm:$0xff] }
 0x298   : > { %v1219_v55 = vpop.f32.mrf.mxu0 }
 0x299   : > { %v2383_v59 = vmul.f32 %v2215_v52, %v2024_v53  ;;  %v1489_v60 = vadd.f32 %v1488_v47, %v1219_v55  ;;  %v361_v47 = vld [vmem:[%s3038_s29 + $0x528] sm:$0xff] }
 0x29a   : > { %v2026_v61 = vpop.f32.mrf.mxu3 }
 0x29b   : > { %v2579_v62 = vadd.f32 %v2578_v44, %v2383_v59  ;;  %v2384_v63 = vmul.f32 %v2216_v56, %v1489_v60  ;;  %1266 = vmatmul.f32.gmra.mxu0 %v688_v54  ;;  %1804 = vmatmul.f32.gmra.mxu2 %v688_v54  ;;  %v694_v44 = vmul.f32 %v526_v39, %v358_v38  ;;  %v360_v56 = vld [vmem:[%s3038_s29 + $0x520] sm:$0xff]  ;;  %v2223_v60 = vld [vmem:[%s4453_s3 + $0x418] sm:$0xff]  ;;  %v2229_v39 = vld [vmem:[%s4453_s3 + $0x448] sm:$0xff] }
 0x29c   : > { %v1491_v1 = vpop.f32.mrf.mxu1  ;;  %v697_v54 = vmul.f32 %v529_v48, %v361_v47 }
 0x29d   : > { %v2489_v4 = vadd.f32 %v2488_v50, %v2384_v63 }
 0x29e   : > { %v1757_v5 = vpop.f32.mrf.mxu2 }
 0x29f   : > { %v2027_v7 = vadd.f32 %v2026_v61, %v1757_v5  ;;  %2760 = vmatmul.msk.f32.gmra.mxu1 %vm756_vm1, %v691_v0  ;;  %2845 = vmatmul.msk.f32.gmra.mxu3 %vm756_vm1, %v691_v0  ;;  %v2224_v0 = vld [vmem:[%s4453_s3 + $0x420] sm:$0xff] }
 0x2a0   : > { %v1222_v9 = vpop.f32.mrf.mxu0 }
 0x2a1   : > { %v2385_v13 = vmul.f32 %v2217_v6, %v2027_v7  ;;  %v1492_v14 = vadd.f32 %v1491_v1, %v1222_v9  ;;  %v363_v1 = vld [vmem:[%s3038_s29 + $0x538] sm:$0x3] }
 0x2a2   : > { %v2029_v15 = vpop.f32.mrf.mxu3 }
 0x2a3   : > { %v2580_v16 = vadd.f32 %v2579_v62, %v2385_v13  ;;  %v2386_v17 = vmul.f32 %v2218_v10, %v1492_v14  ;;  %1269 = vmatmul.f32.gmra.mxu0 %v690_v8  ;;  %1807 = vmatmul.f32.gmra.mxu2 %v690_v8  ;;  %v696_v62 = vmul.f32 %v528_v57, %v360_v56  ;;  %v362_v10 = vld [vmem:[%s3038_s29 + $0x530] sm:$0x3]  ;;  %v2225_v14 = vld [vmem:[%s4453_s3 + $0x428] sm:$0xff] }
 0x2a4   : > { %v1494_v19 = vpop.f32.mrf.mxu1  ;;  %v699_v8 = vmul.f32 %v531_v2, %v363_v1  ;;  %v2234_v2 = vld [vmem:[%s4453_s3 + $0x470] sm:$0xff] }
 0x2a5   : > { %v2490_v22 = vadd.f32 %v2489_v4, %v2386_v17 }
 0x2a6   : > { %v1760_v23 = vpop.f32.mrf.mxu2 }
 0x2a7   : > { %v2030_v25 = vadd.f32 %v2029_v15, %v1760_v23  ;;  %2761 = vmatmul.msk.f32.gmra.mxu1 %vm756_vm1, %v693_v18  ;;  %2846 = vmatmul.msk.f32.gmra.mxu3 %vm756_vm1, %v693_v18  ;;  %v2226_v18 = vld [vmem:[%s4453_s3 + $0x430] sm:$0xff] }
 0x2a8   : > { %v1225_v27 = vpop.f32.mrf.mxu0 }
 0x2a9   : > { %v2387_v31 = vmul.f32 %v2219_v24, %v2030_v25  ;;  %v1495_v32 = vadd.f32 %v1494_v19, %v1225_v27  ;;  %v2227_v27 = vld [vmem:[%s4453_s3 + $0x438] sm:$0xff] }
 0x2aa   : > { %v2032_v33 = vpop.f32.mrf.mxu3 }
 0x2ab   : > { %v2581_v34 = vadd.f32 %v2580_v16, %v2387_v31  ;;  %v2388_v35 = vmul.f32 %v2220_v28, %v1495_v32  ;;  %1272 = vmatmul.f32.gmra.mxu0 %v692_v26  ;;  %1810 = vmatmul.f32.gmra.mxu2 %v692_v26  ;;  %v698_v16 = vmul.f32 %v530_v11, %v362_v10  ;;  %v2235_v11 = vld [vmem:[%s4453_s3 + $0x478] sm:$0xff] }
 0x2ac   : > { %v1497_v37 = vpop.f32.mrf.mxu1 }
 0x2ad   : > { %v2491_v40 = vadd.f32 %v2490_v22, %v2388_v35 }
 0x2ae   : > { %v1763_v41 = vpop.f32.mrf.mxu2 }
 0x2af   : > { %v2033_v43 = vadd.f32 %v2032_v33, %v1763_v41  ;;  %2762 = vmatmul.msk.f32.gmra.mxu1 %vm756_vm1, %v695_v36  ;;  %2847 = vmatmul.msk.f32.gmra.mxu3 %vm756_vm1, %v695_v36 }
 0x2b0   : > { %v1228_v45 = vpop.f32.mrf.mxu0 }
 0x2b1   : > { %v2389_v49 = vmul.f32 %v2221_v42, %v2033_v43  ;;  %v1498_v50 = vadd.f32 %v1497_v37, %v1228_v45  ;;  %v2230_v42 = vld [vmem:[%s4453_s3 + $0x450] sm:$0xff] }
 0x2b2   : > { %v2035_v51 = vpop.f32.mrf.mxu3 }
 0x2b3   : > { %v2582_v52 = vadd.f32 %v2581_v34, %v2389_v49  ;;  %v2390_v53 = vmul.f32 %v2222_v46, %v1498_v50  ;;  %1275 = vmatmul.f32.gmra.mxu0 %v694_v44  ;;  %1813 = vmatmul.f32.gmra.mxu2 %v694_v44 }
 0x2b4   : > { %v1500_v55 = vpop.f32.mrf.mxu1 }
 0x2b5   : > { %v2492_v58 = vadd.f32 %v2491_v40, %v2390_v53 }
 0x2b6   : > { %v1766_v59 = vpop.f32.mrf.mxu2 }
 0x2b7   : > { %v2036_v61 = vadd.f32 %v2035_v51, %v1766_v59  ;;  %2763 = vmatmul.msk.f32.gmra.mxu1 %vm756_vm1, %v697_v54  ;;  %2848 = vmatmul.msk.f32.gmra.mxu3 %vm756_vm1, %v697_v54  ;;  %v2231_v51 = vld [vmem:[%s4453_s3 + $0x458] sm:$0xff]  ;;  %v2232_v54 = vld [vmem:[%s4453_s3 + $0x460] sm:$0xff] }
 0x2b8   : > { %v1231_v63 = vpop.f32.mrf.mxu0 }
 0x2b9   : > { %v2391_v3 = vmul.f32 %v2223_v60, %v2036_v61  ;;  %v1501_v4 = vadd.f32 %v1500_v55, %v1231_v63  ;;  %v2233_v63 = vld [vmem:[%s4453_s3 + $0x468] sm:$0xff] }
 0x2ba   : > { %v2038_v5 = vpop.f32.mrf.mxu3 }
 0x2bb   : > { %v2583_v6 = vadd.f32 %v2582_v52, %v2391_v3  ;;  %v2392_v7 = vmul.f32 %v2224_v0, %v1501_v4  ;;  %1278 = vmatmul.f32.gmra.mxu0 %v696_v62  ;;  %1816 = vmatmul.f32.gmra.mxu2 %v696_v62 }
 0x2bc   : > { %v1503_v9 = vpop.f32.mrf.mxu1 }
 0x2bd   : > { %v2493_v12 = vadd.f32 %v2492_v58, %v2392_v7 }
 0x2be   : > { %v1769_v13 = vpop.f32.mrf.mxu2 }
 0x2bf   : > { %v2039_v15 = vadd.f32 %v2038_v5, %v1769_v13  ;;  %2764 = vmatmul.msk.f32.gmra.mxu1 %vm756_vm1, %v699_v8  ;;  %2849 = vmatmul.msk.f32.gmra.mxu3 %vm756_vm1, %v699_v8 }
 0x2c0   : > { %v1234_v17 = vpop.f32.mrf.mxu0 }
 0x2c1   : > { %v2393_v19 = vmul.f32 %v2225_v14, %v2039_v15  ;;  %v1504_v20 = vadd.f32 %v1503_v9, %v1234_v17  ;;  %v2236_v14 = vld [vmem:[%s4453_s3 + $0x480] sm:$0xff] }
 0x2c2   : > { %v2041_v21 = vpop.f32.mrf.mxu3 }
 0x2c3   : > { %v2584_v22 = vadd.f32 %v2583_v6, %v2393_v19  ;;  %v2394_v23 = vmul.f32 %v2226_v18, %v1504_v20  ;;  %1281 = vmatmul.f32.gmra.mxu0 %v698_v16  ;;  %1819 = vmatmul.f32.gmra.mxu2 %v698_v16 }
 0x2c4   : > { %v1506_v24 = vpop.f32.mrf.mxu1 }
 0x2c5   : > { %v2494_v25 = vadd.f32 %v2493_v12, %v2394_v23  ;;  %v2237_v23 = vld [vmem:[%s4453_s3 + $0x488] sm:$0xff] }
 0x2c6   : > { %v1772_v26 = vpop.f32.mrf.mxu2 }
 0x2c7   : > { %v2042_v28 = vadd.f32 %v2041_v21, %v1772_v26 }
 0x2c8   : > { %v1237_v29 = vpop.f32.mrf.mxu0 }
 0x2c9   : > { %v2395_v31 = vmul.f32 %v2227_v27, %v2042_v28  ;;  %v1507_v32 = vadd.f32 %v1506_v24, %v1237_v29 }
 0x2ca   : > { %v2044_v33 = vpop.f32.mrf.mxu3 }
 0x2cb   : > { %v2585_v34 = vadd.f32 %v2584_v22, %v2395_v31  ;;  %v2396_v35 = vmul.f32 %v2228_v30, %v1507_v32 }
 0x2cc   : > { %v1509_v36 = vpop.f32.mrf.mxu1 }
 0x2cd   : > { %v2495_v37 = vadd.f32 %v2494_v25, %v2396_v35 }
 0x2ce   : > { %v1775_v38 = vpop.f32.mrf.mxu2 }
 0x2cf   : > { %v2045_v40 = vadd.f32 %v2044_v33, %v1775_v38 }
 0x2d0   : > { %v1240_v41 = vpop.f32.mrf.mxu0 }
 0x2d1   : > { %v2397_v43 = vmul.f32 %v2229_v39, %v2045_v40  ;;  %v1510_v44 = vadd.f32 %v1509_v36, %v1240_v41 }
 0x2d2   : > { %v2047_v45 = vpop.f32.mrf.mxu3 }
 0x2d3   : > { %v2586_v46 = vadd.f32 %v2585_v34, %v2397_v43  ;;  %v2398_v47 = vmul.f32 %v2230_v42, %v1510_v44 }
 0x2d4   : > { %v1512_v48 = vpop.f32.mrf.mxu1 }
 0x2d5   : > { %v2496_v49 = vadd.f32 %v2495_v37, %v2398_v47 }
 0x2d6   : > { %v1778_v50 = vpop.f32.mrf.mxu2 }
 0x2d7   : > { %v2048_v52 = vadd.f32 %v2047_v45, %v1778_v50 }
 0x2d8   : > { %v1243_v53 = vpop.f32.mrf.mxu0 }
 0x2d9   : > { %v2399_v55 = vmul.f32 %v2231_v51, %v2048_v52  ;;  %v1513_v56 = vadd.f32 %v1512_v48, %v1243_v53 }
 0x2da   : > { %v2050_v57 = vpop.f32.mrf.mxu3 }
 0x2db   : > { %v2587_v58 = vadd.f32 %v2586_v46, %v2399_v55  ;;  %v2400_v59 = vmul.f32 %v2232_v54, %v1513_v56 }
 0x2dc   : > { %v1515_v60 = vpop.f32.mrf.mxu1 }
 0x2dd   : > { %v2497_v61 = vadd.f32 %v2496_v49, %v2400_v59 }
 0x2de   : > { %v1781_v62 = vpop.f32.mrf.mxu2 }
 0x2df   : > { %v2051_v0 = vadd.f32 %v2050_v57, %v1781_v62 }
 0x2e0   : > { %v1246_v1 = vpop.f32.mrf.mxu0 }
 0x2e1   : > { %v2401_v3 = vmul.f32 %v2233_v63, %v2051_v0  ;;  %v1516_v4 = vadd.f32 %v1515_v60, %v1246_v1 }
 0x2e2   : > { %v2053_v5 = vpop.f32.mrf.mxu3 }
 0x2e3   : > { %v2588_v6 = vadd.f32 %v2587_v58, %v2401_v3  ;;  %v2402_v7 = vmul.f32 %v2234_v2, %v1516_v4  ;;  %v2238_v58 = vld [vmem:[%s4453_s3 + $0x490] sm:$0xff]  ;;  %v2239_v3 = vld [vmem:[%s4453_s3 + $0x498] sm:$0xff] }
 0x2e4   : > { %v1518_v8 = vpop.f32.mrf.mxu1  ;;  %v2242_v2 = vld [vmem:[%s4453_s3 + $0x4b0] sm:$0xff] }
 0x2e5   : > { %v2498_v9 = vadd.f32 %v2497_v61, %v2402_v7  ;;  %v2240_v61 = vld [vmem:[%s4453_s3 + $0x4a0] sm:$0xff] }
 0x2e6   : > { %v1784_v10 = vpop.f32.mrf.mxu2 }
 0x2e7   : > { %v2054_v12 = vadd.f32 %v2053_v5, %v1784_v10  ;;  %v2241_v10 = vld [vmem:[%s4453_s3 + $0x4a8] sm:$0xff] }
 0x2e8   : > { %v1249_v13 = vpop.f32.mrf.mxu0 }
 0x2e9   : > { %v2403_v15 = vmul.f32 %v2235_v11, %v2054_v12  ;;  %v1519_v16 = vadd.f32 %v1518_v8, %v1249_v13  ;;  %v2244_v8 = vld [vmem:[%s4453_s3 + $0x4c0] sm:$0xff] }
 0x2ea   : > { %v2056_v17 = vpop.f32.mrf.mxu3 }
 0x2eb   : > { %v2589_v18 = vadd.f32 %v2588_v6, %v2403_v15  ;;  %v2404_v19 = vmul.f32 %v2236_v14, %v1519_v16  ;;  %v2246_v16 = vld [vmem:[%s4453_s3 + $0x4d0] sm:$0xff] }
 0x2ec   : > { %v1521_v20 = vpop.f32.mrf.mxu1 }
 0x2ed   : > { %v2499_v21 = vadd.f32 %v2498_v9, %v2404_v19 }
 0x2ee   : > { %v1787_v22 = vpop.f32.mrf.mxu2 }
 0x2ef   : > { %v2057_v24 = vadd.f32 %v2056_v17, %v1787_v22 }
 0x2f0   : > { %v1252_v25 = vpop.f32.mrf.mxu0 }
 0x2f1   : > { %v2405_v26 = vmul.f32 %v2237_v23, %v2057_v24  ;;  %v1522_v56 = vadd.f32 %v1521_v20, %v1252_v25  ;;  %v2248_v24 = vld [vmem:[%s4453_s3 + $0x4e0] sm:$0xff] }
 0x2f2   : > { %v2059_v27 = vpop.f32.mrf.mxu3 }
 0x2f3   : > { %v4366_v28 = vadd.f32 %v2589_v18, %v2405_v26  ;;  %v2406_v62 = vmul.f32 %v2238_v58, %v1522_v56  ;;  %v2243_v18 = vld [vmem:[%s4453_s3 + $0x4b8] sm:$0xff]  ;;  %v2245_v26 = vld [vmem:[%s4453_s3 + $0x4c8] sm:$0xff] }
 0x2f4   : > { %v1524_v29 = vpop.f32.mrf.mxu1 }
 0x2f5   : > { %v2500_v9 = vadd.f32 %v2499_v21, %v2406_v62 }
 0x2f6   : > { %v1790_v30 = vpop.f32.mrf.mxu2 }
 0x2f7   : > { %v2060_v1 = vadd.f32 %v2059_v27, %v1790_v30 }
 0x2f8   : > { %v1255_v31 = vpop.f32.mrf.mxu0 }
 0x2f9   : > { %v1525_v59 = vadd.f32 %v1524_v29, %v1255_v31  ;;  %v2407_v14 = vmul.f32 %v2239_v3, %v2060_v1 }
 0x2fa   : > { %v2062_v32 = vpop.f32.mrf.mxu3 }
 0x2fb   : > { %v2408_v4 = vmul.f32 %v2240_v61, %v1525_v59  ;;  %v2591_v31 = vadd.f32 %v4366_v28, %v2407_v14  ;;  %v2252_v28 = vld [vmem:[%s4453_s3 + $0x500] sm:$0xff]  ;;  %v2251_v61 = vld [vmem:[%s4453_s3 + $0x4f8] sm:$0xff] }
 0x2fc   : > { %v1527_v33 = vpop.f32.mrf.mxu1 }
 0x2fd   : > { %v2501_v17 = vadd.f32 %v2500_v9, %v2408_v4  ;;  %v2258_v9 = vld [vmem:[%s4453_s3 + $0x530] sm:$0x3] }
 0x2fe   : > { %v1793_v34 = vpop.f32.mrf.mxu2 }
 0x2ff   : > { %v2063_v7 = vadd.f32 %v2062_v32, %v1793_v34  ;;  %v2250_v34 = vld [vmem:[%s4453_s3 + $0x4f0] sm:$0xff] }
 0x300   : > { %v1258_v35 = vpop.f32.mrf.mxu0 }
 0x301   : > { %v1528_v63 = vadd.f32 %v1527_v33, %v1258_v35  ;;  %v2409_v22 = vmul.f32 %v2241_v10, %v2063_v7 }
 0x302   : > { %v2065_v36 = vpop.f32.mrf.mxu3 }
 0x303   : > { %v2410_v11 = vmul.f32 %v2242_v2, %v1528_v63 }
 0x304   : > { %v1530_v37 = vpop.f32.mrf.mxu1 }
 0x305   : > { %v2502_v25 = vadd.f32 %v2501_v17, %v2410_v11 }
 0x306   : > { %v1796_v38 = vpop.f32.mrf.mxu2 }
 0x307   : > { %v2066_v15 = vadd.f32 %v2065_v36, %v1796_v38  ;;  %v2247_v36 = vld [vmem:[%s4453_s3 + $0x4d8] sm:$0xff] }
 0x308   : > { %v1261_v39 = vpop.f32.mrf.mxu0 }
 0x309   : > { %v1531_v5 = vadd.f32 %v1530_v37, %v1261_v39  ;;  %v2411_v32 = vmul.f32 %v2243_v18, %v2066_v15 }
 0x30a   : > { %v2068_v40 = vpop.f32.mrf.mxu3 }
 0x30b   : > { %v2412_v19 = vmul.f32 %v2244_v8, %v1531_v5 }
 0x30c   : > { %v1533_v41 = vpop.f32.mrf.mxu1 }
 0x30d   : > { %v2503_v35 = vadd.f32 %v2502_v25, %v2412_v19  ;;  %v2259_v25 = vld [vmem:[%s4453_s3 + $0x538] sm:$0x3] }
 0x30e   : > { %v1799_v42 = vpop.f32.mrf.mxu2 }
 0x30f   : > { %v2069_v23 = vadd.f32 %v2068_v40, %v1799_v42  ;;  %v2592_v40 = vadd.f32 %v2591_v31, %v2409_v22 }
 0x310   : > { %v1264_v43 = vpop.f32.mrf.mxu0 }
 0x311   : > { %v1534_v12 = vadd.f32 %v1533_v41, %v1264_v43  ;;  %v2413_v41 = vmul.f32 %v2245_v26, %v2069_v23 }
 0x312   : > { %v2071_v44 = vpop.f32.mrf.mxu3 }
 0x313   : > { %v2414_v27 = vmul.f32 %v2246_v16, %v1534_v12 }
 0x314   : > { %v1536_v45 = vpop.f32.mrf.mxu1 }
 0x315   : > { %v2504_v43 = vadd.f32 %v2503_v35, %v2414_v27 }
 0x316   : > { %v1802_v46 = vpop.f32.mrf.mxu2 }
 0x317   : > { %v2072_v33 = vadd.f32 %v2071_v44, %v1802_v46  ;;  %v2249_v44 = vld [vmem:[%s4453_s3 + $0x4e8] sm:$0xff] }
 0x318   : > { %v1267_v47 = vpop.f32.mrf.mxu0 }
 0x319   : > { %v1537_v20 = vadd.f32 %v1536_v45, %v1267_v47 }
 0x31a   : > { %v2074_v48 = vpop.f32.mrf.mxu3 }
 0x31b   : > { %v2416_v37 = vmul.f32 %v2248_v24, %v1537_v20 }
 0x31c   : > { %v1539_v49 = vpop.f32.mrf.mxu1 }
 0x31e   : > { %v1805_v50 = vpop.f32.mrf.mxu2 }
 0x31f   : > { %v2075_v42 = vadd.f32 %v2074_v48, %v1805_v50 }
 0x320   : > { %v1270_v51 = vpop.f32.mrf.mxu0 }
 0x321   : > { %v1540_v29 = vadd.f32 %v1539_v49, %v1270_v51  ;;  %v2593_v49 = vadd.f32 %v2592_v40, %v2411_v32  ;;  %v2415_v51 = vmul.f32 %v2247_v36, %v2072_v33  ;;  %v2417_v59 = vmul.f32 %v2249_v44, %v2075_v42 }
 0x322   : > { %v4368_v52 = vpop.f32.mrf.mxu3 }
 0x323   : > { %v2418_v45 = vmul.f32 %v2250_v34, %v1540_v29  ;;  %v2594_v58 = vadd.f32 %v2593_v49, %v2413_v41 }
 0x324   : > { %v1542_v53 = vpop.f32.mrf.mxu1 }
 0x325   : > { %v2595_v4 = vadd.f32 %v2594_v58, %v2415_v51 }
 0x326   : > { %v1808_v54 = vpop.f32.mrf.mxu2 }
 0x327   : > { %v2078_v48 = vadd.f32 %v4368_v52, %v1808_v54  ;;  %v2253_v52 = vld [vmem:[%s4453_s3 + $0x508] sm:$0xff]  ;;  %v2596_v10 = vadd.f32 %v2595_v4, %v2417_v59 }
 0x328   : > { %v1273_v55 = vpop.f32.mrf.mxu0 }
 0x329   : > { %v1543_v38 = vadd.f32 %v1542_v53, %v1273_v55  ;;  %v2254_v53 = vld [vmem:[%s4453_s3 + $0x510] sm:$0xff]  ;;  %v2505_v55 = vadd.f32 %v2504_v43, %v2416_v37  ;;  %v2419_v54 = vmul.f32 %v2251_v61, %v2078_v48 }
 0x32a   : > { %v4370_v57 = vpop.f32.mrf.mxu3 }
 0x32b   : > { %v2420_v50 = vmul.f32 %v2252_v28, %v1543_v38  ;;  %v2506_v62 = vadd.f32 %v2505_v55, %v2418_v45  ;;  %v2597_v16 = vadd.f32 %v2596_v10, %v2419_v54  ;;  %v2615_v28 = vlaneseq }
 0x32c   : > { %v1545_v60 = vpop.f32.mrf.mxu1 }
 0x32d   : > { %v2507_v5 = vadd.f32 %v2506_v62, %v2420_v50  ;;  %vm2617_vm4 = vcmp.lt.s32.totalorder %v2615_v28, 256 }
 0x32e   : > { %v1811_v0 = vpop.f32.mrf.mxu2 }
 0x32f   : > { %v2081_v63 = vadd.f32 %v4370_v57, %v1811_v0  ;;  %v2255_v57 = vld [vmem:[%s4453_s3 + $0x518] sm:$0xff] }
 0x330   : > { %v1276_v6 = vpop.f32.mrf.mxu0 }
 0x331   : > { %v1546_v46 = vadd.f32 %v1545_v60, %v1276_v6  ;;  %v2256_v60 = vld [vmem:[%s4453_s3 + $0x520] sm:$0xff]  ;;  %v2421_v11 = vmul.f32 %v2253_v52, %v2081_v63 }
 0x332   : > { %v2083_v13 = vpop.f32.mrf.mxu3 }
 0x333   : > { %v2422_v1 = vmul.f32 %v2254_v53, %v1546_v46 }
 0x334   : > { %v1548_v21 = vpop.f32.mrf.mxu1 }
 0x335   : > { %v2508_v12 = vadd.f32 %v2507_v5, %v2422_v1 }
 0x336   : > { %v1814_v30 = vpop.f32.mrf.mxu2 }
 0x337   : > { %v2084_v6 = vadd.f32 %v2083_v13, %v1814_v30  ;;  %v2257_v13 = vld [vmem:[%s4453_s3 + $0x528] sm:$0xff] }
 0x338   : > { %v1279_v39 = vpop.f32.mrf.mxu0 }
 0x339   : > { %v1549_v56 = vadd.f32 %v1548_v21, %v1279_v39  ;;  %v2423_v17 = vmul.f32 %v2255_v57, %v2084_v6  ;;  %v2598_v21 = vadd.f32 %v2597_v16, %v2421_v11 }
 0x33a   : > { %v2086_v47 = vpop.f32.mrf.mxu3 }
 0x33b   : > { %v2424_v7 = vmul.f32 %v2256_v60, %v1549_v56  ;;  %v2599_v27 = vadd.f32 %v2598_v21, %v2423_v17 }
 0x33c   : > { %v1551_v3 = vpop.f32.mrf.mxu1 }
 0x33d   : > { %v2509_v18 = vadd.f32 %v2508_v12, %v2424_v7 }
 0x33e   : > { %v1817_v2 = vpop.f32.mrf.mxu2 }
 0x33f   : > { %v2087_v14 = vadd.f32 %v2086_v47, %v1817_v2 }
 0x340   : > { %v1282_v8 = vpop.f32.mrf.mxu0 }
 0x341   : > { %v1552_v0 = vadd.f32 %v1551_v3, %v1282_v8  ;;  %v2425_v22 = vmul.f32 %v2257_v13, %v2087_v14 }
 0x342   : > { %v2089_v19 = vpop.f32.mrf.mxu3 }
 0x343   : > { %v2426_v15 = vmul.f32 %v2258_v9, %v1552_v0  ;;  %v2600_v31 = vadd.f32 %v2599_v27, %v2425_v22 }
 0x345   : > { %v2511_v20 = vsel %vm2510_vm2, %v2426_v15, 0.0 }
 0x346   : > { %v2512_v23 = vadd.f32 %v2511_v20, %v2509_v18  ;;  %v1820_v24 = vpop.f32.mrf.mxu2 }
 0x347   : > { %v2090_v26 = vadd.f32 %v2089_v19, %v1820_v24 }
 0x348   : > { %v2513_v29 = vrot.slane %v2512_v23, 4 }
 0x349   : > { %v2427_v30 = vmul.f32 %v2259_v25, %v2090_v26 }
 0x34a   : > { %v2514_v32 = vadd.f32 %v2513_v29, %v2512_v23 }
 0x34b   : > { %v2601_v33 = vsel %vm2510_vm2, %v2427_v30, 0.0 }
 0x34c   : > { %v2602_v34 = vadd.f32 %v2601_v33, %v2600_v31  ;;  %v2515_v35 = vrot.slane %v2514_v32, 2 }
 0x34e   : > { %v2603_v36 = vrot.slane %v2602_v34, 4  ;;  %v2516_v38 = vadd.f32 %v2515_v35, %v2514_v32 }
 0x350   : > { %v2604_v37 = vadd.f32 %v2603_v36, %v2602_v34  ;;  %v2517_v41 = vrot.slane %v2516_v38, 1 }
 0x352   : > { %v2605_v39 = vrot.slane %v2604_v37, 2  ;;  %v2518_v44 = vadd.f32 %v2517_v41, %v2516_v38 }
 0x354   : > { %v2606_v40 = vadd.f32 %v2605_v39, %v2604_v37 }
 0x356   : > { %v2607_v42 = vrot.slane %v2606_v40, 1 }
 0x358   : > { %v2608_v43 = vadd.f32 %v2607_v42, %v2606_v40 }
 0x35a   : > { %v2611_v45 = vrot.slane %v2608_v43, 7 }
 0x35c   : > { %v2613_v46 = vsel %vm2612_vm3, %v2518_v44, %v2611_v45 }
 0x35d   : > { %2619 = vst.msk [vmem:[%s195_s20] sm:$0x3] %vm2617_vm4, %v2613_v46 }
 0x35e PF: > { %s14_s15 = sadd.s32 1, %s2867_s15  }
 0x35f   : > { %p11_p4 = scmp.ge.s32.totalorder %s14_s15, 4  }
 0x361   :  { %13 = sbr.rel (!%p11_p4) target bundleno = 1 (0x1), region = 66 }

</bundles_post_ra>
